<compile_context>
chip_gen: v7x
topology: tpu7x:2x2x1
jax: 0.10.0
libtpu: 0.0.40
codegen_flags: <defaults>
</compile_context>

<pallas_src>
import jax
import jax.numpy as jnp
import numpy as np
from jax.experimental import pallas as pl
from jax.experimental.pallas import tpu as pltpu

N, C, H, W = 2, 4, 16, 16          # batch, conv_dim, spatial
NWC = N * W * C                    # 128 lanes: x2[y, n*W*C + x*C + c]
EPS = 1e-5
_PREC = jax.lax.Precision.HIGHEST  # exact f32 MXU passes (matches f32 reference)


def residual_block_kernel(x_ref, a_ref, gr_ref, ge_ref, gb_ref, o_ref):
    """x_ref:(H,NWC)   a_ref:(2, 3*NWC, NWC) fused conv operators (conv1, conv2)
       gr_ref:(NWC,C) lane->channel reducer   ge_ref:(C,NWC) channel->lane expander
       gb_ref:(4,C) rows = [gamma1, beta1, gamma2, beta2]   o_ref:(H,NWC)"""
    f32 = jnp.float32
    x = x_ref[...]                        # (H, NWC)
    gr = gr_ref[...]                      # (NWC, C)
    ge = ge_ref[...]                      # (C, NWC)
    cnt = float(N * H * W)

    # Boundary-row masks for the H taps (hoisted: computed once).
    row = jax.lax.broadcasted_iota(jnp.int32, (H, NWC), 0)
    top = row == 0
    bot = row == H - 1

    def dot(a, b):
        return jnp.dot(a, b, preferred_element_type=f32, precision=_PREC)

    def conv_bn(inp, a, g, b):
        # --- 3x3 "same" conv -------------------------------------------------
        # H taps: XLU sublane rolls + zeroed boundary rows (no shift matmuls).
        ym1 = jnp.where(top, 0.0, pltpu.roll(inp, shift=1, axis=0))      # row y-1
        yp1 = jnp.where(bot, 0.0, pltpu.roll(inp, shift=H - 1, axis=0))  # row y+1
        # W taps + channel contraction: one fused MXU matmul (K = 3*NWC = 384).
        y = dot(jnp.concatenate([ym1, inp, yp1], axis=1), a)             # (H, NWC)

        # --- training-mode BatchNorm2d (biased variance over N*H*W) ----------
        yc = dot(y, gr)                                      # (H, C) sums over n,x
        y2c = dot(y * y, gr)                                 # (H, C)
        mean = jnp.sum(yc, axis=0, keepdims=True) / cnt      # (1, C)
        var = jnp.sum(y2c, axis=0, keepdims=True) / cnt - mean * mean
        scale_c = g * jax.lax.rsqrt(var + EPS)               # (1, C)
        shift_c = b - mean * scale_c                         # (1, C)
        scale_l = dot(scale_c, ge)                           # (1, NWC)
        shift_l = dot(shift_c, ge)                           # (1, NWC)
        return y * scale_l + shift_l                         # free sublane bcast

    out1 = conv_bn(x, a_ref[0], gb_ref[0:1, :], gb_ref[1:2, :])
    out2 = conv_bn(out1, a_ref[1], gb_ref[2:3, :], gb_ref[3:4, :])
    o_ref[...] = (out2 + x).astype(o_ref.dtype)              # residual add


# --- constant operators (module-level numpy; wrapper is jitted) ---------------
_SEL = np.stack([np.eye(W, k=1 - kx, dtype=np.float32) for kx in range(3)])  # (3,W,W)
_EYE_N = np.eye(N, dtype=np.float32)
_GR = np.tile(np.eye(C, dtype=np.float32), (N * W, 1))        # (NWC, C)
_GE = np.ascontiguousarray(_GR.T)                              # (C, NWC)


def _conv_operator(w_hwio):
    """(3,3,C,C) HWIO conv weight -> (3*NWC, NWC) fused lane-space operator:
       A[ky*NWC + n*W*C + xi*C + ci, m*W*C + xo*C + co]
         = (n == m) * w[ky, xi - xo + 1, ci, co]   (zero outside the 3-tap W band
       => implicit zero padding along W; block-diagonal over the batch)."""
    a = jnp.einsum("nm,sxy,tsio->tnximyo", _EYE_N, _SEL,
                   w_hwio.astype(jnp.float32), precision=_PREC)
    return a.reshape(3 * NWC, NWC)


@jax.jit
def residual_block(x_nchw, w1, g1, b1, w2, g2, b2):
    """Wrapper: NCHW in / NCHW out (matches the PyTorch module interface).
    In an NHWC end-to-end model the transposes/reshapes here would be dropped."""
    # pack to the lane-dense (H, N*W*C) layout: x2[y, n*W*C + x*C + c]
    x2 = jnp.transpose(x_nchw.astype(jnp.float32), (2, 0, 3, 1)).reshape(H, NWC)

    a_all = jnp.stack([_conv_operator(w1), _conv_operator(w2)])   # (2, 3*NWC, NWC)
    gb = jnp.stack([g1, b1, g2, b2]).astype(jnp.float32)          # (4, C)

    out2d = pl.pallas_call(
        residual_block_kernel,
        out_shape=jax.ShapeDtypeStruct((H, NWC), jnp.float32),
        in_specs=[pl.BlockSpec(memory_space=pltpu.MemorySpace.VMEM)] * 5,
        out_specs=pl.BlockSpec(memory_space=pltpu.MemorySpace.VMEM),
    )(x2, a_all, jnp.asarray(_GR), jnp.asarray(_GE), gb)

    return jnp.transpose(out2d.reshape(H, N, W, C), (1, 3, 0, 2))


def residual_block_ref(x_nchw, w1, g1, b1, w2, g2, b2):
    """Pure-JAX reference (lax conv, training-mode BN) for correctness checking."""
    x = jnp.transpose(x_nchw, (0, 2, 3, 1)).astype(jnp.float32)

    def conv_bn(inp, w, g, b):
        y = jax.lax.conv_general_dilated(
            inp, w, window_strides=(1, 1), padding="SAME",
            dimension_numbers=("NHWC", "HWIO", "NHWC"), precision=_PREC)
        mean = jnp.mean(y, axis=(0, 1, 2), keepdims=True)
        var = jnp.mean((y - mean) ** 2, axis=(0, 1, 2), keepdims=True)
        return (y - mean) * jax.lax.rsqrt(var + EPS) * g + b

    o1 = conv_bn(x, w1, g1, b1)
    o2 = conv_bn(o1, w2, g2, b2) + x
    return jnp.transpose(o2, (0, 3, 1, 2))


if __name__ == "__main__":
    key = jax.random.PRNGKey(0)
    k_x, k_w1, k_w2 = jax.random.split(key, 3)

    x = jax.random.normal(k_x, (N, C, H, W), jnp.float32)            # NCHW input
    w1 = jax.random.normal(k_w1, (3, 3, C, C), jnp.float32) * 0.1    # conv1 weight (HWIO)
    w2 = jax.random.normal(k_w2, (3, 3, C, C), jnp.float32) * 0.1    # conv2 weight (HWIO)
    g1 = jnp.ones((C,), jnp.float32)    # BN gamma init (PyTorch default)
    b1 = jnp.zeros((C,), jnp.float32)   # BN beta init
    g2 = jnp.ones((C,), jnp.float32)
    b2 = jnp.zeros((C,), jnp.float32)

    out = jax.block_until_ready(residual_block(x, w1, g1, b1, w2, g2, b2))
    ref = jax.block_until_ready(residual_block_ref(x, w1, g1, b1, w2, g2, b2))
    np.testing.assert_allclose(np.asarray(out), np.asarray(ref),
                               rtol=1e-3, atol=1e-3)

    print("KERNEL_OK")
</pallas_src>

<mosaic_0001>
module attributes {stable_mosaic.version = 11 : i64} {
  func.func @residual_block_kernel(%arg0: memref<16x128xf32, #tpu.memory_space<vmem>>, %arg1: memref<2x384x128xf32, #tpu.memory_space<vmem>>, %arg2: memref<128x4xf32, #tpu.memory_space<vmem>>, %arg3: memref<4x128xf32, #tpu.memory_space<vmem>>, %arg4: memref<4x4xf32, #tpu.memory_space<vmem>>, %arg5: memref<16x128xf32, #tpu.memory_space<vmem>>) attributes {dimension_semantics = [], scalar_prefetch = 0 : i64, scratch_operands = 0 : i64, tpu.core_type = #tpu.core_type<tc>} {
    %c0 = arith.constant 0 : index
    %c0_0 = arith.constant 0 : index
    %0 = vector.load %arg0[%c0, %c0_0] : memref<16x128xf32, #tpu.memory_space<vmem>>, vector<16x128xf32>
    %c0_1 = arith.constant 0 : index
    %c0_2 = arith.constant 0 : index
    %1 = vector.load %arg2[%c0_1, %c0_2] : memref<128x4xf32, #tpu.memory_space<vmem>>, vector<128x4xf32>
    %c0_3 = arith.constant 0 : index
    %c0_4 = arith.constant 0 : index
    %2 = vector.load %arg3[%c0_3, %c0_4] : memref<4x128xf32, #tpu.memory_space<vmem>>, vector<4x128xf32>
    %3 = tpu.iota {dimensions = array<i32: 0>} : vector<16x128xi32>
    %c0_i32 = arith.constant 0 : i32
    %4 = vector.broadcast %c0_i32 : i32 to vector<16x128xi32>
    %5 = arith.cmpi eq, %3, %4 : vector<16x128xi32>
    %c15_i32 = arith.constant 15 : i32
    %6 = vector.broadcast %c15_i32 : i32 to vector<16x128xi32>
    %7 = arith.cmpi eq, %3, %6 : vector<16x128xi32>
    %c0_5 = arith.constant 0 : index
    %c0_6 = arith.constant 0 : index
    %c0_7 = arith.constant 0 : index
    %8 = vector.load %arg1[%c0_5, %c0_6, %c0_7] : memref<2x384x128xf32, #tpu.memory_space<vmem>>, vector<1x384x128xf32>
    %9 = vector.shape_cast %8 : vector<1x384x128xf32> to vector<384x128xf32>
    %c0_8 = arith.constant 0 : index
    %c0_9 = arith.constant 0 : index
    %10 = vector.load %arg4[%c0_8, %c0_9] : memref<4x4xf32, #tpu.memory_space<vmem>>, vector<1x4xf32>
    %c1 = arith.constant 1 : index
    %c0_10 = arith.constant 0 : index
    %11 = vector.load %arg4[%c1, %c0_10] : memref<4x4xf32, #tpu.memory_space<vmem>>, vector<1x4xf32>
    %c1_i32 = arith.constant 1 : i32
    %12 = tpu.dynamic_rotate %0 by %c1_i32 dim 0 : vector<16x128xf32>, i32 -> vector<16x128xf32>
    %cst = arith.constant 0.000000e+00 : f32
    %13 = vector.broadcast %cst : f32 to vector<16x128xf32>
    %14 = arith.select %5, %13, %12 : vector<16x128xi1>, vector<16x128xf32>
    %c15_i32_11 = arith.constant 15 : i32
    %15 = tpu.dynamic_rotate %0 by %c15_i32_11 dim 0 : vector<16x128xf32>, i32 -> vector<16x128xf32>
    %cst_12 = arith.constant 0.000000e+00 : f32
    %16 = vector.broadcast %cst_12 : f32 to vector<16x128xf32>
    %17 = arith.select %7, %16, %15 : vector<16x128xi1>, vector<16x128xf32>
    %18 = tpu.concatenate %14, %0, %17 in 1 : vector<16x128xf32>, vector<16x128xf32>, vector<16x128xf32> -> vector<16x384xf32>
    %cst_13 = arith.constant dense<0.000000e+00> : vector<16x128xf32>
    %19 = tpu.matmul %18, %9, %cst_13 {dimension_numbers = #tpu.dot_dimension_numbers<[1], [0], [0], [1], [0, 0, 1, 1], [], []>, precision = #tpu.contract_precision<fp32>} : vector<16x384xf32>, vector<384x128xf32>, vector<16x128xf32> -> vector<16x128xf32>
    %cst_14 = arith.constant dense<0.000000e+00> : vector<16x4xf32>
    %20 = tpu.matmul %19, %1, %cst_14 {dimension_numbers = #tpu.dot_dimension_numbers<[1], [0], [0], [1], [0, 0, 1, 1], [], []>, precision = #tpu.contract_precision<fp32>} : vector<16x128xf32>, vector<128x4xf32>, vector<16x4xf32> -> vector<16x4xf32>
    %21 = arith.mulf %19, %19 : vector<16x128xf32>
    %cst_15 = arith.constant dense<0.000000e+00> : vector<16x4xf32>
    %22 = tpu.matmul %21, %1, %cst_15 {dimension_numbers = #tpu.dot_dimension_numbers<[1], [0], [0], [1], [0, 0, 1, 1], [], []>, precision = #tpu.contract_precision<fp32>} : vector<16x128xf32>, vector<128x4xf32>, vector<16x4xf32> -> vector<16x4xf32>
    %cst_16 = arith.constant dense<0.000000e+00> : vector<4xf32>
    %23 = vector.multi_reduction <add>, %20, %cst_16 [0] : vector<16x4xf32> to vector<4xf32>
    %24 = vector.shape_cast %23 : vector<4xf32> to vector<1x4xf32>
    %cst_17 = arith.constant 5.120000e+02 : f32
    %25 = vector.broadcast %cst_17 : f32 to vector<1x4xf32>
    %26 = arith.divf %24, %25 : vector<1x4xf32>
    %cst_18 = arith.constant dense<0.000000e+00> : vector<4xf32>
    %27 = vector.multi_reduction <add>, %22, %cst_18 [0] : vector<16x4xf32> to vector<4xf32>
    %28 = vector.shape_cast %27 : vector<4xf32> to vector<1x4xf32>
    %cst_19 = arith.constant 5.120000e+02 : f32
    %29 = vector.broadcast %cst_19 : f32 to vector<1x4xf32>
    %30 = arith.divf %28, %29 : vector<1x4xf32>
    %31 = arith.mulf %26, %26 : vector<1x4xf32>
    %32 = arith.subf %30, %31 : vector<1x4xf32>
    %cst_20 = arith.constant 9.99999974E-6 : f32
    %33 = vector.broadcast %cst_20 : f32 to vector<1x4xf32>
    %34 = arith.addf %32, %33 : vector<1x4xf32>
    %35 = math.rsqrt %34 : vector<1x4xf32>
    %36 = arith.mulf %10, %35 : vector<1x4xf32>
    %37 = arith.mulf %26, %36 : vector<1x4xf32>
    %38 = arith.subf %11, %37 : vector<1x4xf32>
    %cst_21 = arith.constant dense<0.000000e+00> : vector<1x128xf32>
    %39 = tpu.matmul %36, %2, %cst_21 {dimension_numbers = #tpu.dot_dimension_numbers<[1], [0], [0], [1], [0, 0, 1, 1], [], []>, precision = #tpu.contract_precision<fp32>} : vector<1x4xf32>, vector<4x128xf32>, vector<1x128xf32> -> vector<1x128xf32>
    %cst_22 = arith.constant dense<0.000000e+00> : vector<1x128xf32>
    %40 = tpu.matmul %38, %2, %cst_22 {dimension_numbers = #tpu.dot_dimension_numbers<[1], [0], [0], [1], [0, 0, 1, 1], [], []>, precision = #tpu.contract_precision<fp32>} : vector<1x4xf32>, vector<4x128xf32>, vector<1x128xf32> -> vector<1x128xf32>
    %41 = vector.broadcast %39 : vector<1x128xf32> to vector<16x128xf32>
    %42 = arith.mulf %19, %41 : vector<16x128xf32>
    %43 = vector.broadcast %40 : vector<1x128xf32> to vector<16x128xf32>
    %44 = arith.addf %42, %43 : vector<16x128xf32>
    %c1_23 = arith.constant 1 : index
    %c0_24 = arith.constant 0 : index
    %c0_25 = arith.constant 0 : index
    %45 = vector.load %arg1[%c1_23, %c0_24, %c0_25] : memref<2x384x128xf32, #tpu.memory_space<vmem>>, vector<1x384x128xf32>
    %46 = vector.shape_cast %45 : vector<1x384x128xf32> to vector<384x128xf32>
    %c2 = arith.constant 2 : index
    %c0_26 = arith.constant 0 : index
    %47 = vector.load %arg4[%c2, %c0_26] : memref<4x4xf32, #tpu.memory_space<vmem>>, vector<1x4xf32>
    %c3 = arith.constant 3 : index
    %c0_27 = arith.constant 0 : index
    %48 = vector.load %arg4[%c3, %c0_27] : memref<4x4xf32, #tpu.memory_space<vmem>>, vector<1x4xf32>
    %c1_i32_28 = arith.constant 1 : i32
    %49 = tpu.dynamic_rotate %44 by %c1_i32_28 dim 0 : vector<16x128xf32>, i32 -> vector<16x128xf32>
    %cst_29 = arith.constant 0.000000e+00 : f32
    %50 = vector.broadcast %cst_29 : f32 to vector<16x128xf32>
    %51 = arith.select %5, %50, %49 : vector<16x128xi1>, vector<16x128xf32>
    %c15_i32_30 = arith.constant 15 : i32
    %52 = tpu.dynamic_rotate %44 by %c15_i32_30 dim 0 : vector<16x128xf32>, i32 -> vector<16x128xf32>
    %cst_31 = arith.constant 0.000000e+00 : f32
    %53 = vector.broadcast %cst_31 : f32 to vector<16x128xf32>
    %54 = arith.select %7, %53, %52 : vector<16x128xi1>, vector<16x128xf32>
    %55 = tpu.concatenate %51, %44, %54 in 1 : vector<16x128xf32>, vector<16x128xf32>, vector<16x128xf32> -> vector<16x384xf32>
    %cst_32 = arith.constant dense<0.000000e+00> : vector<16x128xf32>
    %56 = tpu.matmul %55, %46, %cst_32 {dimension_numbers = #tpu.dot_dimension_numbers<[1], [0], [0], [1], [0, 0, 1, 1], [], []>, precision = #tpu.contract_precision<fp32>} : vector<16x384xf32>, vector<384x128xf32>, vector<16x128xf32> -> vector<16x128xf32>
    %cst_33 = arith.constant dense<0.000000e+00> : vector<16x4xf32>
    %57 = tpu.matmul %56, %1, %cst_33 {dimension_numbers = #tpu.dot_dimension_numbers<[1], [0], [0], [1], [0, 0, 1, 1], [], []>, precision = #tpu.contract_precision<fp32>} : vector<16x128xf32>, vector<128x4xf32>, vector<16x4xf32> -> vector<16x4xf32>
    %58 = arith.mulf %56, %56 : vector<16x128xf32>
    %cst_34 = arith.constant dense<0.000000e+00> : vector<16x4xf32>
    %59 = tpu.matmul %58, %1, %cst_34 {dimension_numbers = #tpu.dot_dimension_numbers<[1], [0], [0], [1], [0, 0, 1, 1], [], []>, precision = #tpu.contract_precision<fp32>} : vector<16x128xf32>, vector<128x4xf32>, vector<16x4xf32> -> vector<16x4xf32>
    %cst_35 = arith.constant dense<0.000000e+00> : vector<4xf32>
    %60 = vector.multi_reduction <add>, %57, %cst_35 [0] : vector<16x4xf32> to vector<4xf32>
    %61 = vector.shape_cast %60 : vector<4xf32> to vector<1x4xf32>
    %cst_36 = arith.constant 5.120000e+02 : f32
    %62 = vector.broadcast %cst_36 : f32 to vector<1x4xf32>
    %63 = arith.divf %61, %62 : vector<1x4xf32>
    %cst_37 = arith.constant dense<0.000000e+00> : vector<4xf32>
    %64 = vector.multi_reduction <add>, %59, %cst_37 [0] : vector<16x4xf32> to vector<4xf32>
    %65 = vector.shape_cast %64 : vector<4xf32> to vector<1x4xf32>
    %cst_38 = arith.constant 5.120000e+02 : f32
    %66 = vector.broadcast %cst_38 : f32 to vector<1x4xf32>
    %67 = arith.divf %65, %66 : vector<1x4xf32>
    %68 = arith.mulf %63, %63 : vector<1x4xf32>
    %69 = arith.subf %67, %68 : vector<1x4xf32>
    %cst_39 = arith.constant 9.99999974E-6 : f32
    %70 = vector.broadcast %cst_39 : f32 to vector<1x4xf32>
    %71 = arith.addf %69, %70 : vector<1x4xf32>
    %72 = math.rsqrt %71 : vector<1x4xf32>
    %73 = arith.mulf %47, %72 : vector<1x4xf32>
    %74 = arith.mulf %63, %73 : vector<1x4xf32>
    %75 = arith.subf %48, %74 : vector<1x4xf32>
    %cst_40 = arith.constant dense<0.000000e+00> : vector<1x128xf32>
    %76 = tpu.matmul %73, %2, %cst_40 {dimension_numbers = #tpu.dot_dimension_numbers<[1], [0], [0], [1], [0, 0, 1, 1], [], []>, precision = #tpu.contract_precision<fp32>} : vector<1x4xf32>, vector<4x128xf32>, vector<1x128xf32> -> vector<1x128xf32>
    %cst_41 = arith.constant dense<0.000000e+00> : vector<1x128xf32>
    %77 = tpu.matmul %75, %2, %cst_41 {dimension_numbers = #tpu.dot_dimension_numbers<[1], [0], [0], [1], [0, 0, 1, 1], [], []>, precision = #tpu.contract_precision<fp32>} : vector<1x4xf32>, vector<4x128xf32>, vector<1x128xf32> -> vector<1x128xf32>
    %78 = vector.broadcast %76 : vector<1x128xf32> to vector<16x128xf32>
    %79 = arith.mulf %56, %78 : vector<16x128xf32>
    %80 = vector.broadcast %77 : vector<1x128xf32> to vector<16x128xf32>
    %81 = arith.addf %79, %80 : vector<16x128xf32>
    %82 = arith.addf %81, %0 : vector<16x128xf32>
    %c0_42 = arith.constant 0 : index
    %c0_43 = arith.constant 0 : index
    %83 = vector.load %arg5[%c0_42, %c0_43] : memref<16x128xf32, #tpu.memory_space<vmem>>, vector<16x128xf32>
    tpu.vector_store %arg5[%c0_42, %c0_43], %82 {strides = array<i32>} : memref<16x128xf32, #tpu.memory_space<vmem>>, vector<16x128xf32>,
    return
  }
}

</mosaic_0001>

<bundles_post_ra>
// kernel: residual_block.1
= control target key start
LH: loop header
LB: loop body
LE: loop exit
PB: predicated region body
PF: predicated region fallthrough
CT: control target
= control target key end

     0   :  { %v39_v63 = vlaneseq  ;;  %vm3114_vm4 = vcmask 1043456   ;;  %vm12234_vm5 = vmmov 0   ;;  %vm3082_vm6 = vcmask 31744   ;;  %s15255_s1 = inlined_call_operand.vmem [shape: f32[2,384,128], index: 1, kind: input, shape index: {}]   ;;  %s15256_s0 = inlined_call_operand.vmem [shape: f32[16,128], index: 0, kind: input, shape index: {}]   ;;  %s15257_s2 = inlined_call_operand.vmem [shape: f32[128,4], index: 2, kind: input, shape index: {}]   ;;  %s15258_s3 = inlined_call_operand.vmem [shape: f32[4,128], index: 3, kind: input, shape index: {}]   ;;  %s15259_s4 = inlined_call_operand.vmem [shape: f32[4,4], index: 4, kind: input, shape index: {}]   ;;  %s15260_s5 = inlined_call_operand.vmem [shape: f32[16,128], index: 5, kind: output, shape index: {}]  }
   0x1   :  { %v62_v0 = vld [vmem:[%s15255_s1 + $0x80] sm:$0xff]  ;;  %v63_v1 = vld [vmem:[%s15255_s1 + $0x88] sm:$0xff]  ;;  %v64_v7 = vld [vmem:[%s15255_s1 + $0x90] sm:$0xff] }
   0x2   :  { %v46_v2 = vld [vmem:[%s15255_s1] sm:$0xff]  ;;  %v159_v3 = vand.u32 4294901760, %v62_v0  ;;  %v162_v4 = vand.u32 4294901760, %v63_v1  ;;  %v47_v5 = vld [vmem:[%s15255_s1 + $0x8] sm:$0xff]  ;;  %v65_v8 = vld [vmem:[%s15255_s1 + $0x98] sm:$0xff]  ;;  %v165_v10 = vand.u32 4294901760, %v64_v7 }
   0x3   :  { %v111_v6 = vand.u32 4294901760, %v46_v2  ;;  %v114_v9 = vand.u32 4294901760, %v47_v5  ;;  %v168_v11 = vand.u32 4294901760, %v65_v8  ;;  %v48_v12 = vld [vmem:[%s15255_s1 + $0x10] sm:$0xff]  ;;  %v49_v13 = vld [vmem:[%s15255_s1 + $0x18] sm:$0xff]  ;;  %v66_v14 = vld [vmem:[%s15255_s1 + $0xa0] sm:$0xff] }
   0x4   :  { %v12292_v15 = vpack.c.bf16 %v162_v4, %v159_v3  ;;  %v67_v16 = vld [vmem:[%s15255_s1 + $0xa8] sm:$0xff]  ;;  %v50_v17 = vld [vmem:[%s15255_s1 + $0x20] sm:$0xff]  ;;  %v12303_v19 = vsub.f32 %v62_v0, %v159_v3  ;;  %v12305_v20 = vsub.f32 %v63_v1, %v162_v4  ;;  %v68_v23 = vld [vmem:[%s15255_s1 + $0xb0] sm:$0xff]  ;;  %v117_v25 = vand.u32 4294901760, %v48_v12 }
   0x5   :  { %v51_v18 = vld [vmem:[%s15255_s1 + $0x28] sm:$0xff]  ;;  %v12307_v21 = vpack.c.bf16 %v114_v9, %v111_v6  ;;  %v12309_v22 = vpack.c.bf16 %v168_v11, %v165_v10  ;;  %v12315_v24 = vsub.f32 %v46_v2, %v111_v6  ;;  %v120_v26 = vand.u32 4294901760, %v49_v13  ;;  %v69_v32 = vld [vmem:[%s15255_s1 + $0xb8] sm:$0xff]  ;;  %v52_v33 = vld [vmem:[%s15255_s1 + $0x30] sm:$0xff] }
   0x6   :  { %15481 = vst [vmem:[#allocation2_spill] sm:$0xff] %v12292_v15  ;;  %10586 = vmatprep.subr.bf16.mxu0 %v12292_v15  ;;  %v171_v27 = vand.u32 4294901760, %v66_v14  ;;  %10746 = vmatprep.subr.bf16.mxu1 %v12292_v15  ;;  %v12319_v28 = vsub.f32 %v47_v5, %v114_v9  ;;  %v174_v29 = vand.u32 4294901760, %v67_v16  ;;  %v123_v30 = vand.u32 4294901760, %v50_v17  ;;  %v53_v38 = vld [vmem:[%s15255_s1 + $0x38] sm:$0xff]  ;;  %v70_v39 = vld [vmem:[%s15255_s1 + $0xc0] sm:$0xff] }
   0x7   :  { %15482 = vst [vmem:[#allocation3_spill] sm:$0xff] %v12307_v21  ;;  %15483 = vst [vmem:[#allocation4_spill] sm:$0xff] %v12309_v22  ;;  %10588 = vmatpush3.bf16.msra.mxu0 %v12307_v21  ;;  %v126_v31 = vand.u32 4294901760, %v51_v18  ;;  %10748 = vmatpush3.bf16.msra.mxu1 %v12307_v21  ;;  %v12329_v34 = vsub.f32 %v64_v7, %v165_v10  ;;  %v12331_v35 = vsub.f32 %v65_v8, %v168_v11  ;;  %v71_v40 = vld [vmem:[%s15255_s1 + $0xc8] sm:$0xff]  ;;  %v54_v49 = vld [vmem:[%s15255_s1 + $0x40] sm:$0xff] }
   0x8   :  { %10590 = vmatprep.subr.bf16.mxu0 %v12309_v22  ;;  %v12333_v36 = vpack.c.bf16 %v120_v26, %v117_v25  ;;  %v177_v37 = vand.u32 4294901760, %v68_v23  ;;  %v12344_v41 = vsub.f32 %v48_v12, %v117_v25  ;;  %v12346_v42 = vsub.f32 %v49_v13, %v120_v26  ;;  %10750 = vmatprep.subr.bf16.mxu1 %v12309_v22  ;;  %v55_v50 = vld [vmem:[%s15255_s1 + $0x48] sm:$0xff]  ;;  %v72_v55 = vld [vmem:[%s15255_s1 + $0xd0] sm:$0xff]  ;;  %v73_v56 = vld [vmem:[%s15255_s1 + $0xd8] sm:$0xff] }
   0x9   :  { %v12348_v43 = vpack.c.bf16 %v174_v29, %v171_v27  ;;  %v12350_v44 = vsub.f32 %v66_v14, %v171_v27  ;;  %v12353_v45 = vsub.f32 %v67_v16, %v174_v29  ;;  %v12355_v46 = vpack.c.bf16 %v126_v31, %v123_v30  ;;  %v56_v60 = vld [vmem:[%s15255_s1 + $0x50] sm:$0xff]  ;;  %v57_v61 = vld [vmem:[%s15255_s1 + $0x58] sm:$0xff]  ;;  %v74_v62 = vld [vmem:[%s15255_s1 + $0xe0] sm:$0xff] }
   0xa   :  { %15484 = vst [vmem:[#allocation5_spill] sm:$0xff] %v12333_v36  ;;  %v180_v47 = vand.u32 4294901760, %v69_v32  ;;  %v129_v48 = vand.u32 4294901760, %v52_v33  ;;  %v12364_v51 = vsub.f32 %v50_v17, %v123_v30  ;;  %v132_v52 = vand.u32 4294901760, %v53_v38  ;;  %v75_v4 = vld [vmem:[%s15255_s1 + $0xe8] sm:$0xff]  ;;  %v58_v5 = vld [vmem:[%s15255_s1 + $0x60] sm:$0xff] }
   0xb   :  { %15485 = vst [vmem:[#allocation6_spill] sm:$0xff] %v12348_v43  ;;  %15486 = vst [vmem:[#allocation7_spill] sm:$0xff] %v12355_v46  ;;  %10592 = vmatpush3.bf16.msra.mxu0 %v12333_v36  ;;  %v183_v53 = vand.u32 4294901760, %v70_v39  ;;  %v186_v54 = vand.u32 4294901760, %v71_v40  ;;  %10752 = vmatpush3.bf16.msra.mxu1 %v12333_v36  ;;  %v12374_v57 = vsub.f32 %v51_v18, %v126_v31  ;;  %v135_v2 = vand.u32 4294901760, %v54_v49  ;;  %v59_v6 = vld [vmem:[%s15255_s1 + $0x68] sm:$0xff] }
   0xc   :  { %10594 = vmatprep.subr.bf16.mxu0 %v12348_v43  ;;  %v12376_v58 = vpack.c.bf16 %v180_v47, %v177_v37  ;;  %v12378_v59 = vsub.f32 %v68_v23, %v177_v37  ;;  %10754 = vmatprep.subr.bf16.mxu1 %v12348_v43  ;;  %v12390_v0 = vsub.f32 %v69_v32, %v180_v47  ;;  %v138_v3 = vand.u32 4294901760, %v55_v50  ;;  %v76_v30 = vld [vmem:[%s15255_s1 + $0xf0] sm:$0xff]  ;;  %v12429_v31 = vld [vmem:[%s15255_s1 + $0xf8] sm:$0xff] }
   0xd   :  { %v12392_v1 = vsub.f32 %v52_v33, %v129_v48  ;;  %v12403_v7 = vpack.c.bf16 %v132_v52, %v129_v48  ;;  %v12405_v8 = vsub.f32 %v53_v38, %v132_v52  ;;  %v12407_v9 = vpack.c.bf16 %v186_v54, %v183_v53  ;;  %v12461_v52 = vld [vmem:[%s15255_s1 + $0x70] sm:$0xff] }
   0xe   :  { %15487 = vst [vmem:[#allocation8_spill] sm:$0xff] %v12376_v58  ;;  %v12409_v10 = vsub.f32 %v70_v39, %v183_v53  ;;  %v189_v11 = vand.u32 4294901760, %v72_v55  ;;  %v192_v12 = vand.u32 4294901760, %v73_v56  ;;  %v141_v13 = vand.u32 4294901760, %v56_v60  ;;  %v12442_v39 = vld [vmem:[%s15256_s0] sm:$0xff]  ;;  %v12466_v53 = vld [vmem:[%s15255_s1 + $0x78] sm:$0xff] }
   0xf   :  { %15488 = vst [vmem:[#allocation9_spill] sm:$0xff] %v12403_v7  ;;  %15489 = vst [vmem:[#allocation10_spill] sm:$0xff] %v12407_v9  ;;  %10596 = vmatpush3.bf16.msra.mxu0 %v12355_v46  ;;  %v144_v14 = vand.u32 4294901760, %v57_v61  ;;  %10756 = vmatpush3.bf16.msra.mxu1 %v12355_v46  ;;  %v195_v16 = vand.u32 4294901760, %v74_v62  ;;  %v198_v17 = vand.u32 4294901760, %v75_v4  ;;  %v147_v18 = vand.u32 4294901760, %v58_v5 }
  0x10   :  { %10598 = vmatprep.subr.bf16.mxu0 %v12376_v58  ;;  %v150_v23 = vand.u32 4294901760, %v59_v6  ;;  %10758 = vmatprep.subr.bf16.mxu1 %v12376_v58  ;;  %v12415_v25 = vsub.f32 %v71_v40, %v186_v54  ;;  %v12417_v26 = vpack.c.bf16 %v138_v3, %v135_v2  ;;  %v12419_v27 = vsub.f32 %v54_v49, %v135_v2  ;;  %v12447_v40 = vld [vmem:[%s15256_s0 + $0x8] sm:$0xff] }
  0x11   :  { %v12421_v29 = vsub.f32 %v55_v50, %v138_v3  ;;  %v12431_v32 = vpack.c.bf16 %v192_v12, %v189_v11  ;;  %v12433_v33 = vsub.f32 %v72_v55, %v189_v11  ;;  %v12435_v37 = vsub.f32 %v73_v56, %v192_v12  ;;  %15493 = vst [vmem:[#allocation14_spill] sm:$0xff] %v12442_v39 }
  0x12   :  { %15490 = vst [vmem:[#allocation11_spill] sm:$0xff] %v12417_v26  ;;  %v12437_v38 = vpack.c.bf16 %v144_v14, %v141_v13  ;;  %15494 = vst [vmem:[#allocation15_spill] sm:$0xff] %v12447_v40  ;;  %v12450_v47 = vsub.f32 %v56_v60, %v141_v13  ;;  %v12452_v48 = vsub.f32 %v57_v61, %v144_v14  ;;  %v201_v56 = vand.u32 4294901760, %v76_v30 }
  0x13   :  { %15491 = vst [vmem:[#allocation12_spill] sm:$0xff] %v12431_v32  ;;  %10600 = vmatpush3.bf16.msra.mxu0 %v12403_v7  ;;  %v12454_v49 = vpack.c.bf16 %v198_v17, %v195_v16  ;;  %v12456_v50 = vsub.f32 %v74_v62, %v195_v16  ;;  %v12469_v54 = vsub.f32 %v75_v4, %v198_v17  ;;  %v15261_v60 = vand.u32 4294901760, %v12429_v31 }
  0x14   :  { %15492 = vst [vmem:[#allocation13_spill] sm:$0xff] %v12437_v38  ;;  %10602 = vmatprep.subr.bf16.mxu0 %v12407_v9  ;;  %v12471_v55 = vpack.c.bf16 %v150_v23, %v147_v18  ;;  %10760 = vmatpush3.bf16.msra.mxu1 %v12403_v7  ;;  %v12476_v61 = vand.u32 4294901760, %v12442_v39  ;;  %v12478_v62 = vshrl.u32 %v39_v63, 7  ;;  %v15262_v2 = vrot.slane %v12442_v39, 7 }
  0x15   :  { %15495 = vst [vmem:[#allocation16_spill] sm:$0xff] %v12454_v49  ;;  %v15263_v3 = vrot.slane %v12447_v40, 7  ;;  %10762 = vmatprep.subr.bf16.mxu1 %v12407_v9  ;;  %v12483_v4 = vsub.f32 %v58_v5, %v147_v18  ;;  %v12485_v11 = vsub.f32 %v59_v6, %v150_v23  ;;  %v12492_v63 = vpack.c.bf16 %v15261_v60, %v201_v56 }
  0x16   :  { %15496 = vst [vmem:[#allocation17_spill] sm:$0xff] %v12471_v55  ;;  %15497 = vst [vmem:[#allocation18_spill] sm:$0xff] %v12478_v62  ;;  %v12494_v14 = vsub.f32 %v76_v30, %v201_v56  ;;  %v12498_v16 = vsub.f32 %v12442_v39, %v12476_v61  ;;  %vm42_vm0 = vcmp.eq.s32.totalorder %v12478_v62, 0  ;;  %1014 = vmatprep.mubr.f32.mxu1 %v12476_v61  ;;  %vm98_vm1 = vcmp.lt.s32.totalorder %v12478_v62, 1 }
  0x17   :  { %10604 = vmatpush3.bf16.msra.mxu0 %v12417_v26  ;;  %15498 = vst [vmem:[#allocation19_spill] sm:$0xff] %v12492_v63  ;;  %v15264_v5 = vand.u32 4294901760, %v12303_v19  ;;  %v15265_v6 = vand.u32 4294901760, %v12305_v20  ;;  %v15266_v17 = vand.u32 4294901760, %v12315_v24  ;;  %v100_v23 = vsel %vm98_vm1, %v15263_v3, %v15262_v2 }
  0x18   :  { %10606 = vmatprep.subr.bf16.mxu0 %v12431_v32  ;;  %10764 = vmatpush3.bf16.msra.mxu1 %v12417_v26  ;;  %v15270_v18 = vand.u32 4294901760, %v12498_v16  ;;  %v15273_v30 = vand.u32 4294901760, %v12319_v28  ;;  %v101_v60 = vsel %vm42_vm0, 0.0, %v100_v23  ;;  %v15276_v7 = vand.u32 4294901760, %v12331_v35 }
  0x19   :  { %10766 = vmatprep.subr.bf16.mxu1 %v12431_v32  ;;  %v353_v13 = vsub.f32 %v12303_v19, %v15264_v5  ;;  %v360_v12 = vsub.f32 %v12305_v20, %v15265_v6  ;;  %v241_v2 = vsub.f32 %v12315_v24, %v15266_v17  ;;  %v12533_v56 = vand.u32 4294901760, %v101_v60 }
  0x1a   :  { %v209_v3 = vsub.f32 %v12498_v16, %v15270_v18  ;;  %v248_v23 = vsub.f32 %v12319_v28, %v15273_v30  ;;  %v15499_v5 = vand.u32 4294901760, %v12329_v34  ;;  %v15500_v17 = vand.u32 4294901760, %v12461_v52 }
  0x1b   :  { %10608 = vmatpush3.bf16.msra.mxu0 %v12437_v38  ;;  %v15501_v32 = vand.u32 4294901760, %v12466_v53  ;;  %v354_v9 = vand.u32 4294901760, %v353_v13  ;;  %v361_v18 = vand.u32 4294901760, %v360_v12  ;;  %v12551_v30 = vsub.f32 %v101_v60, %v12533_v56 }
  0x1c   :  { %v367_v6 = vsub.f32 %v12329_v34, %v15499_v5  ;;  %10610 = vmatprep.subr.bf16.mxu0 %v12454_v49  ;;  %10768 = vmatpush3.bf16.msra.mxu1 %v12437_v38  ;;  %v210_v58 = vand.u32 4294901760, %v209_v3  ;;  %v242_v46 = vand.u32 4294901760, %v241_v2  ;;  %v249_v5 = vand.u32 4294901760, %v248_v23 }
  0x1d   :  { %v12546_v26 = vpack.c.bf16 %v15501_v32, %v15500_v17  ;;  %15503 = vst [vmem:[#allocation21_spill] sm:$0xff] %v12551_v30  ;;  %10770 = vmatprep.subr.bf16.mxu1 %v12454_v49  ;;  %v374_v32 = vsub.f32 %v12331_v35, %v15276_v7  ;;  %v15277_v13 = vand.u32 4294901760, %v12344_v41  ;;  %v15278_v12 = vand.u32 4294901760, %v12346_v42 }
  0x1e   :  { %v368_v43 = vand.u32 4294901760, %v367_v6  ;;  %211 = vmatprep.mubr.f32.mxu0 %v210_v58  ;;  %v15282_v3 = vand.u32 4294901760, %v12551_v30  ;;  %v10617_v60 = vpack.c.bf16 %v361_v18, %v354_v9  ;;  %v15284_v2 = vand.u32 4294901760, %v12350_v44 }
  0x1f   :  { %15502 = vst [vmem:[#allocation20_spill] sm:$0xff] %v12546_v26  ;;  %10612 = vmatpush3.bf16.msra.mxu0 %v12471_v55  ;;  %v15285_v17 = vand.u32 4294901760, %v12353_v45  ;;  %v375_v6 = vand.u32 4294901760, %v374_v32  ;;  %v255_v23 = vsub.f32 %v12344_v41, %v15277_v13  ;;  %v262_v7 = vsub.f32 %v12346_v42, %v15278_v12 }
  0x20   :  { %10614 = vmatprep.subr.bf16.mxu0 %v12492_v63  ;;  %10772 = vmatpush3.bf16.msra.mxu1 %v12471_v55  ;;  %v215_v9 = vsub.f32 %v12551_v30, %v15282_v3  ;;  %v381_v18 = vsub.f32 %v12350_v44, %v15284_v2  ;;  %v15293_v13 = vand.u32 4294901760, %v12374_v57  ;;  %v10619_v12 = vpack.c.bf16 %v249_v5, %v242_v46 }
  0x21   :  { %v388_v32 = vsub.f32 %v12353_v45, %v15285_v17  ;;  %10774 = vmatprep.subr.bf16.mxu1 %v12492_v63  ;;  %v256_v58 = vand.u32 4294901760, %v255_v23  ;;  %v263_v49 = vand.u32 4294901760, %v262_v7  ;;  %v15504_v55 = vand.u32 4294901760, %v12364_v51 }
  0x22   :  { %v216_v3 = vand.u32 4294901760, %v215_v9  ;;  %v382_v36 = vand.u32 4294901760, %v381_v18  ;;  %v276_v17 = vsub.f32 %v12374_v57, %v15293_v13  ;;  %v10621_v22 = vpack.c.bf16 %v375_v6, %v368_v43 }
  0x23   :  { %v269_v38 = vsub.f32 %v12364_v51, %v15504_v55  ;;  %10616 = vmatpush3.bf16.msra.mxu0 %v12546_v26  ;;  %v389_v2 = vand.u32 4294901760, %v388_v32  ;;  %v10623_v21 = vpack.c.bf16 %v263_v49, %v256_v58  ;;  %v15291_v46 = vand.u32 4294901760, %v12378_v59 }
  0x24   :  { %10618 = vmatprep.subr.bf16.mxu0 %v10617_v60  ;;  %v15290_v7 = vand.u32 4294901760, %v12390_v0  ;;  %10776 = vmatpush3.bf16.msra.mxu1 %v12546_v26  ;;  %v277_v55 = vand.u32 4294901760, %v276_v17  ;;  %v15288_v23 = vand.u32 4294901760, %v12392_v1  ;;  %v15289_v9 = vand.u32 4294901760, %v12405_v8 }
  0x25   :  { %v270_v5 = vand.u32 4294901760, %v269_v38  ;;  %v395_v18 = vsub.f32 %v12378_v59, %v15291_v46  ;;  %v15292_v49 = vand.u32 4294901760, %v12409_v10  ;;  %v15294_v60 = vand.u32 4294901760, %v12415_v25 }
  0x26   :  { %217 = vmatmul.mubr.f32.vlgmr.msra.gmra.mrb[0].mxu0 %v216_v3  ;;  %v402_v43 = vsub.f32 %v12390_v0, %v15290_v7  ;;  %v10625_v38 = vpack.c.bf16 %v389_v2, %v382_v36  ;;  %v283_v17 = vsub.f32 %v12392_v1, %v15288_v23  ;;  %v290_v3 = vsub.f32 %v12405_v8, %v15289_v9 }
  0x27   :  { %10620 = vmatpush3.bf16.msra.mxu0 %v10619_v12  ;;  %v15298_v6 = vand.u32 4294901760, %v12419_v27  ;;  %1016 = vmatmul.mubr.f32.vlgmr.msra.gmra.mrb[0].mxu1 %v12533_v56  ;;  %v396_v58 = vand.u32 4294901760, %v395_v18  ;;  %v409_v12 = vsub.f32 %v12409_v10, %v15292_v49  ;;  %v416_v36 = vsub.f32 %v12415_v25, %v15294_v60 }
  0x28   :  { %10622 = vmatprep.subr.bf16.mxu0 %v10621_v22  ;;  %v403_v32 = vand.u32 4294901760, %v402_v43  ;;  %v15505_v2 = vand.u32 4294901760, %v12429_v31  ;;  %v10627_v9 = vpack.c.bf16 %v277_v55, %v270_v5  ;;  %v15296_v18 = vand.u32 4294901760, %v12421_v29 }
  0x29   :  { %v297_v22 = vsub.f32 %v12419_v27, %v15298_v6  ;;  %v284_v7 = vand.u32 4294901760, %v283_v17  ;;  %v291_v46 = vand.u32 4294901760, %v290_v3  ;;  %v15295_v49 = vand.u32 4294901760, %v12433_v33 }
  0x2a   :  { %v12620_v23 = vsub.f32 %v12429_v31, %v15505_v2  ;;  %v10629_v43 = vpack.c.bf16 %v403_v32, %v396_v58  ;;  %v410_v13 = vand.u32 4294901760, %v409_v12  ;;  %v417_v60 = vand.u32 4294901760, %v416_v36 }
  0x2b   :  { %10624 = vmatpush3.bf16.msra.mxu0 %v10623_v21  ;;  %v304_v31 = vsub.f32 %v12421_v29, %v15296_v18  ;;  %v15297_v5 = vand.u32 4294901760, %v12435_v37  ;;  %v298_v55 = vand.u32 4294901760, %v297_v22  ;;  %v423_v2 = vsub.f32 %v12433_v33, %v15295_v49 }
  0x2c   :  { %10626 = vmatprep.subr.bf16.mxu0 %v10625_v38  ;;  %v15299_v17 = vand.u32 4294901760, %v12450_v47  ;;  %v15300_v3 = vand.u32 4294901760, %v12452_v48  ;;  %v15302_v32 = vand.u32 4294901760, %v12456_v50  ;;  %v15510_v49 = vand.u32 4294901760, %v12469_v54 }
  0x2d   :  { %v305_v58 = vand.u32 4294901760, %v304_v31  ;;  %v430_v21 = vsub.f32 %v12435_v37, %v15297_v5  ;;  %v424_v36 = vand.u32 4294901760, %v423_v2  ;;  %v15506_v31 = vand.u32 4294901760, %v12461_v52 }
  0x2e   :  { %v311_v38 = vsub.f32 %v12450_v47, %v15299_v17  ;;  %v318_v22 = vsub.f32 %v12452_v48, %v15300_v3  ;;  %v10631_v5 = vpack.c.bf16 %v291_v46, %v284_v7  ;;  %v437_v2 = vsub.f32 %v12456_v50, %v15302_v32 }
  0x2f   :  { %v12651_v18 = vsub.f32 %v12461_v52, %v15506_v31  ;;  %10628 = vmatpush3.bf16.msra.mxu0 %v10627_v9  ;;  %v431_v6 = vand.u32 4294901760, %v430_v21  ;;  %v15508_v17 = vand.u32 4294901760, %v12466_v53  ;;  %v10633_v3 = vpack.c.bf16 %v417_v60, %v410_v13 }
  0x30   :  { %10630 = vmatprep.subr.bf16.mxu0 %v10629_v43  ;;  %v444_v26 = vsub.f32 %v12469_v54, %v15510_v49  ;;  %v15304_v52 = vand.u32 4294901760, %v12485_v11  ;;  %v10635_v9 = vpack.c.bf16 %v305_v58, %v298_v55  ;;  %v312_v46 = vand.u32 4294901760, %v311_v38 }
  0x31   :  { %15507 = vst [vmem:[#allocation22_spill] sm:$0xff] %v12651_v18  ;;  %v12659_v12 = vsub.f32 %v12466_v53, %v15508_v17  ;;  %v319_v7 = vand.u32 4294901760, %v318_v22  ;;  %v12666_v21 = vand.u32 4294901760, %v12447_v40  ;;  %v10637_v31 = vpack.c.bf16 %v431_v6, %v424_v36 }
  0x32   :  { %v438_v32 = vand.u32 4294901760, %v437_v2  ;;  %v15511_v63 = vand.u32 4294901760, %v12483_v4  ;;  %v15512_v13 = vrot.slane %v12447_v40, 7  ;;  %v15513_v60 = vrot.slane %v12442_v39, 7 }
  0x33   :  { %15509 = vst [vmem:[#allocation23_spill] sm:$0xff] %v12659_v12  ;;  %10632 = vmatpush3.bf16.msra.mxu0 %v10631_v5  ;;  %v332_v43 = vsub.f32 %v12485_v11, %v15304_v52  ;;  %v12682_v6 = vsub.f32 %v12447_v40, %v12666_v21  ;;  %1021 = vmatprep.mubr.f32.mxu1 %v12666_v21  ;;  %v445_v17 = vand.u32 4294901760, %v444_v26  ;;  %v457_v58 = vand.u32 4294901760, %v12620_v23 }
  0x34   :  { %v325_v53 = vsub.f32 %v12483_v4, %v15511_v63  ;;  %v99_v49 = vsel %vm98_vm1, %v15513_v60, %v15512_v13  ;;  %v450_v63 = vand.u32 4294901760, %v12494_v14  ;;  %10634 = vmatprep.subr.bf16.mxu0 %v10633_v3  ;;  %v338_v5 = vand.u32 4294901760, %v12651_v18 }
  0x35   :  { %v12684_v55 = vand.u32 4294901760, %v99_v49  ;;  %v345_v36 = vand.u32 4294901760, %v12659_v12  ;;  %v15314_v38 = vand.u32 4294901760, %v12682_v6  ;;  %v10639_v13 = vpack.c.bf16 %v319_v7, %v312_v46 }
  0x36   :  { %v451_v2 = vsub.f32 %v12494_v14, %v450_v63  ;;  %v458_v60 = vsub.f32 %v12620_v23, %v457_v58  ;;  %v339_v26 = vsub.f32 %v12651_v18, %v338_v5  ;;  %v326_v52 = vand.u32 4294901760, %v325_v53 }
  0x37   :  { %v12693_v22 = vsub.f32 %v99_v49, %v12684_v55  ;;  %1023 = vmatmul.mubr.f32.gmra.mrb[2].mxu1 %v12684_v55  ;;  %v346_v3 = vsub.f32 %v12659_v12, %v345_v36  ;;  %10636 = vmatpush3.bf16.msra.mxu0 %v10635_v9  ;;  %v333_v62 = vand.u32 4294901760, %v332_v43  ;;  %v224_v40 = vsub.f32 %v12682_v6, %v15314_v38 }
  0x38   :  { %10638 = vmatprep.subr.bf16.mxu0 %v10637_v31  ;;  %v10641_v39 = vpack.c.bf16 %v445_v17, %v438_v32  ;;  %v452_v30 = vand.u32 4294901760, %v451_v2  ;;  %v459_v15 = vand.u32 4294901760, %v458_v60  ;;  %v340_v18 = vand.u32 4294901760, %v339_v26 }
  0x39   :  { %v229_v49 = vand.u32 4294901760, %v12693_v22  ;;  %v225_v46 = vand.u32 4294901760, %v224_v40  ;;  %v347_v12 = vand.u32 4294901760, %v346_v3  ;;  %v10643_v9 = vpack.c.bf16 %v333_v62, %v326_v52 }
  0x3a   :  { %v10645_v43 = vpack.c.bf16 %v459_v15, %v452_v30  ;;  %v10649_v32 = vpack.c.bf16 %v12305_v20, %v12303_v19  ;;  %v15514_v31 = vand.u32 4294901760, %v12303_v19  ;;  %v15515_v40 = vand.u32 4294901760, %v12305_v20 }
  0x3b   :  { %v230_v7 = vsub.f32 %v12693_v22, %v229_v49  ;;  %10640 = vmatpush3.bf16.msra.mxu0 %v10639_v13  ;;  %226 = vmatprep.mubr.f32.mxu0 %v225_v46  ;;  %v10647_v38 = vpack.c.bf16 %v347_v12, %v340_v18  ;;  %v15516_v2 = vand.u32 4294901760, %v12315_v24  ;;  %v15517_v13 = vand.u32 4294901760, %v12319_v28 }
  0x3c   :  { %10642 = vmatprep.subr.bf16.mxu0 %v10641_v39  ;;  %v12713_v17 = vpack.c.bf16 %v15515_v40, %v15514_v31  ;;  %v15518_v15 = vand.u32 4294901760, %v12329_v34  ;;  %v15519_v39 = vand.u32 4294901760, %v12331_v35  ;;  %v15520_v19 = vand.u32 4294901760, %v12344_v41 }
  0x3d   :  { %v231_v53 = vand.u32 4294901760, %v230_v7  ;;  %v12719_v62 = vpack.c.bf16 %v15517_v13, %v15516_v2  ;;  %v15521_v20 = vand.u32 4294901760, %v12346_v42  ;;  %v15522_v12 = vand.u32 4294901760, %v12350_v44 }
  0x3e   :  { %v12726_v30 = vpack.c.bf16 %v15519_v39, %v15518_v15  ;;  %v15523_v52 = vand.u32 4294901760, %v12353_v45  ;;  %v15524_v26 = vand.u32 4294901760, %v12364_v51  ;;  %v15525_v3 = vand.u32 4294901760, %v12374_v57 }
  0x3f   :  { %232 = vmatmul.mubr.f32.gmra.mrb[2].mxu0 %v231_v53  ;;  %v12732_v18 = vpack.c.bf16 %v15521_v20, %v15520_v19  ;;  %v15526_v7 = vand.u32 4294901760, %v12378_v59  ;;  %v15527_v53 = vand.u32 4294901760, %v12390_v0  ;;  %v15528_v40 = vand.u32 4294901760, %v12392_v1 }
  0x40   :  { %462 = vmatprep.mubr.f32.mxu0 %v12476_v61  ;;  %v12738_v60 = vpack.c.bf16 %v15523_v52, %v15522_v12  ;;  %v12744_v46 = vpack.c.bf16 %v15525_v3, %v15524_v26  ;;  %10644 = vmatpush3.bf16.msra.mxu0 %v10643_v9  ;;  %v15529_v2 = vand.u32 4294901760, %v12405_v8  ;;  %v15530_v15 = vand.u32 4294901760, %v12409_v10 }
  0x41   :  { %v12750_v31 = vpack.c.bf16 %v15527_v53, %v15526_v7  ;;  %v15531_v39 = vand.u32 4294901760, %v12415_v25  ;;  %v15532_v9 = vand.u32 4294901760, %v12419_v27  ;;  %v15533_v20 = vand.u32 4294901760, %v12421_v29  ;;  %10646 = vmatprep.subr.bf16.mxu0 %v10645_v43 }
  0x42   :  { %v12756_v13 = vpack.c.bf16 %v15529_v2, %v15528_v40  ;;  %v15534_v52 = vand.u32 4294901760, %v12433_v33  ;;  %v15535_v26 = vand.u32 4294901760, %v12435_v37  ;;  %v15536_v7 = vand.u32 4294901760, %v12450_v47 }
  0x43   :  { %v12762_v19 = vpack.c.bf16 %v15531_v39, %v15530_v15  ;;  %v12768_v12 = vpack.c.bf16 %v15533_v20, %v15532_v9  ;;  %v15537_v53 = vand.u32 4294901760, %v12452_v48  ;;  %v15538_v2 = vand.u32 4294901760, %v12456_v50 }
  0x44   :  { %v12774_v3 = vpack.c.bf16 %v15535_v26, %v15534_v52  ;;  %v15539_v15 = vand.u32 4294901760, %v12469_v54  ;;  %v15540_v43 = vand.u32 4294901760, %v12483_v4  ;;  %v15541_v9 = vand.u32 4294901760, %v12485_v11  ;;  %10648 = vmatpush3.bf16.msra.mxu0 %v10647_v38 }
  0x45   :  { %v12780_v40 = vpack.c.bf16 %v15537_v53, %v15536_v7  ;;  %v12794_v52 = vpack.c.bf16 %v457_v58, %v450_v63  ;;  %v12796_v26 = vpack.c.bf16 %v345_v36, %v338_v5  ;;  %v10651_v7 = vpack.c.bf16 %v12319_v28, %v12315_v24  ;;  %10650 = vmatprep.subr.bf16.mxu0 %v10649_v32  ;;  %v15560_v58 = vld [vmem:[#allocation19_spill] sm:$0xff]  ;;  %v15561_v5 = vld [vmem:[#allocation20_spill] sm:$0xff]  ;;  %v15564_v32 = vld [vmem:[#allocation14_spill] sm:$0xff] }
  0x46   :  { %v12786_v39 = vpack.c.bf16 %v15539_v15, %v15538_v2  ;;  %v12792_v20 = vpack.c.bf16 %v15541_v9, %v15540_v43  ;;  %v10653_v53 = vpack.c.bf16 %v12331_v35, %v12329_v34  ;;  %v10655_v2 = vpack.c.bf16 %v12346_v42, %v12344_v41  ;;  %v15566_v15 = vld [vmem:[#allocation18_spill] sm:$0xff]  ;;  %v83_v43 = vld [vmem:[%s15255_s1 + $0x128] sm:$0xff] }
  0x47   :  { %464 = vmatmul.mubr.f32.vlgmr.msra.gmra.mrb[4].mxu0 %v12533_v56  ;;  %v10657_v63 = vpack.c.bf16 %v12353_v45, %v12350_v44  ;;  %v10659_v24 = vpack.c.bf16 %v12374_v57, %v12364_v51  ;;  %v10661_v28 = vpack.c.bf16 %v12390_v0, %v12378_v59  ;;  %v10663_v34 = vpack.c.bf16 %v12405_v8, %v12392_v1  ;;  %v15542_v59 = vld [vmem:[#allocation22_spill] sm:$0xff]  ;;  %v15543_v0 = vld [vmem:[#allocation23_spill] sm:$0xff] }
  0x48   :  { %10652 = vmatpush3.bf16.msra.mxu0 %v10651_v7  ;;  %469 = vmatprep.mubr.f32.mxu0 %v12666_v21  ;;  %v10665_v35 = vpack.c.bf16 %v12415_v25, %v12409_v10  ;;  %v10667_v41 = vpack.c.bf16 %v12421_v29, %v12419_v27  ;;  %v10669_v42 = vpack.c.bf16 %v12435_v37, %v12433_v33  ;;  %v15544_v8 = vld [vmem:[#allocation2_spill] sm:$0xff]  ;;  %v15545_v10 = vld [vmem:[#allocation21_spill] sm:$0xff]  ;;  %v15546_v25 = vld [vmem:[#allocation3_spill] sm:$0xff]  ;;  %v15549_v33 = vand.u32 4294901760, %v12498_v16 }
  0x49   :  { %10654 = vmatprep.subr.bf16.mxu0 %v10653_v53  ;;  %v10671_v44 = vpack.c.bf16 %v12452_v48, %v12450_v47  ;;  %v10673_v45 = vpack.c.bf16 %v12469_v54, %v12456_v50  ;;  %v10675_v51 = vpack.c.bf16 %v12485_v11, %v12483_v4  ;;  %v10677_v57 = vpack.c.bf16 %v12620_v23, %v12494_v14  ;;  %v15547_v27 = vld [vmem:[#allocation4_spill] sm:$0xff]  ;;  %v15548_v29 = vld [vmem:[#allocation5_spill] sm:$0xff]  ;;  %v15550_v37 = vld [vmem:[#allocation6_spill] sm:$0xff] }
  0x4a   :  { %v10679_v1 = vpack.c.bf16 %v15543_v0, %v15542_v59  ;;  %v15551_v47 = vld [vmem:[#allocation7_spill] sm:$0xff]  ;;  %v15552_v48 = vld [vmem:[#allocation8_spill] sm:$0xff]  ;;  %v15553_v50 = vld [vmem:[#allocation9_spill] sm:$0xff]  ;;  %v15562_v36 = vand.u32 4294901760, %v15545_v10  ;;  %v15563_v38 = vand.u32 4294901760, %v12682_v6  ;;  %vm105_vm2 = vcmp.lt.s32.totalorder %v15566_v15, 7 }
  0x4b   :  { %471 = vmatmul.mubr.f32.gmra.mrb[6].mxu0 %v12684_v55  ;;  %v15554_v54 = vld [vmem:[#allocation10_spill] sm:$0xff]  ;;  %v15555_v4 = vld [vmem:[#allocation11_spill] sm:$0xff]  ;;  %v15556_v11 = vld [vmem:[#allocation12_spill] sm:$0xff]  ;;  %v1044_v7 = vand.u32 4294901760, %v83_v43 }
  0x4c   :  { %10656 = vmatpush3.bf16.msra.mxu0 %v10655_v2  ;;  %606 = vmatprep.mubr.f32.mxu0 %v12498_v16  ;;  %v15557_v14 = vld [vmem:[#allocation13_spill] sm:$0xff]  ;;  %v15558_v23 = vld [vmem:[#allocation16_spill] sm:$0xff] }
  0x4d   :  { %10658 = vmatprep.subr.bf16.mxu0 %v10657_v63  ;;  %v15559_v16 = vld [vmem:[#allocation17_spill] sm:$0xff]  ;;  %v12916_v53 = vld [vmem:[%s15255_s1 + $0x130] sm:$0xff] }
  0x4e   :  { %v12921_v2 = vld [vmem:[%s15255_s1 + $0x138] sm:$0xff] }
  0x50   :  { %10660 = vmatpush3.bf16.msra.mxu0 %v10659_v24  ;;  %v1047_v24 = vand.u32 4294901760, %v12916_v53 }
  0x51   :  { %10662 = vmatprep.subr.bf16.mxu0 %v10661_v28  ;;  %v1050_v28 = vand.u32 4294901760, %v12921_v2 }
  0x54   :  { %10664 = vmatpush3.bf16.msra.mxu0 %v10663_v34  ;;  %v12934_v34 = vld [vmem:[%s15255_s1 + $0x140] sm:$0xff] }
  0x55   :  { %10666 = vmatprep.subr.bf16.mxu0 %v10665_v35  ;;  %v1053_v35 = vand.u32 4294901760, %v12934_v34 }
  0x58   :  { %10668 = vmatpush3.bf16.msra.mxu0 %v10667_v41  ;;  %v12948_v41 = vpack.c.bf16 %v1050_v28, %v1047_v24 }
  0x59   :  { %10670 = vmatprep.subr.bf16.mxu0 %v10669_v42 }
  0x5c   :  { %10672 = vmatpush3.bf16.msra.mxu0 %v10671_v44  ;;  %v12954_v44 = vld [vmem:[%s15255_s1 + $0x150] sm:$0xff] }
  0x5d   :  { %10674 = vmatprep.subr.bf16.mxu0 %v10673_v45 }
  0x60   :  { %10676 = vmatpush3.bf16.msra.mxu0 %v10675_v51  ;;  %v1059_v51 = vand.u32 4294901760, %v12954_v44 }
  0x61   :  { %10678 = vmatprep.subr.bf16.mxu0 %v10677_v57 }
  0x64   :  { %10680 = vmatpush3.bf16.msra.mxu0 %v10679_v1  ;;  %v12975_v1 = vld [vmem:[%s15255_s1 + $0x160] sm:$0xff] }
  0x65   :  { %10682 = vmatprep.subr.bf16.mxu0 %v15544_v8 }
  0x67   :  { %609 = vmatmul.mubr.f32.vlgmr.msra.gmra.mrb[8].mxu0 %v15545_v10 }
  0x68   :  { %10684 = vmatpush3.bf16.msra.mxu0 %v15546_v25  ;;  %615 = vmatprep.mubr.f32.mxu0 %v12682_v6  ;;  %v12984_v25 = vld [vmem:[%s15255_s1 + $0x168] sm:$0xff] }
  0x69   :  { %10686 = vmatprep.subr.bf16.mxu0 %v15547_v27 }
  0x6b   :  { %618 = vmatmul.mubr.f32.gmra.mrb[10].mxu0 %v12693_v22 }
  0x6c   :  { %10688 = vmatpush3.bf16.msra.mxu0 %v15548_v29  ;;  %722 = vmatprep.mubr.f32.mxu0 %v15549_v33  ;;  %v1065_v33 = vand.u32 4294901760, %v12975_v1 }
  0x6d   :  { %10690 = vmatprep.subr.bf16.mxu0 %v15550_v37  ;;  %v12995_v37 = vld [vmem:[%s15255_s1 + $0x170] sm:$0xff] }
  0x70   :  { %10692 = vmatpush3.bf16.msra.mxu0 %v15551_v47 }
  0x71   :  { %10694 = vmatprep.subr.bf16.mxu0 %v15552_v48 }
  0x74   :  { %10696 = vmatpush3.bf16.msra.mxu0 %v15553_v50  ;;  %v1068_v50 = vand.u32 4294901760, %v12984_v25 }
  0x75   :  { %10698 = vmatprep.subr.bf16.mxu0 %v15554_v54  ;;  %v13006_v54 = vld [vmem:[%s15255_s1 + $0x178] sm:$0xff] }
  0x78   :  { %10700 = vmatpush3.bf16.msra.mxu0 %v15555_v4 }
  0x79   :  { %10702 = vmatprep.subr.bf16.mxu0 %v15556_v11 }
  0x7c   :  { %10704 = vmatpush3.bf16.msra.mxu0 %v15557_v14  ;;  %v1071_v14 = vand.u32 4294901760, %v12995_v37 }
  0x7d   :  { %10706 = vmatprep.subr.bf16.mxu0 %v15558_v23 }
  0x80   :  { %10708 = vmatpush3.bf16.msra.mxu0 %v15559_v16 }
  0x81   :  { %10710 = vmatprep.subr.bf16.mxu0 %v15560_v58  ;;  %v1074_v58 = vand.u32 4294901760, %v13006_v54 }
  0x84   :  { %10712 = vmatpush3.bf16.msra.mxu0 %v15561_v5 }
  0x85   :  { %10714 = vmatprep.subr.bf16.mxu0 %v12713_v17  ;;  %v103_v17 = vrot.slane %v15564_v32, 1  ;;  %v13027_v32 = vpack.c.bf16 %v1068_v50, %v1065_v33 }
  0x87   :  { %726 = vmatmul.mubr.f32.vlgmr.msra.gmra.mrb[12].mxu0 %v15562_v36 }
  0x88   :  { %10716 = vmatpush3.bf16.msra.mxu0 %v12719_v62  ;;  %733 = vmatprep.mubr.f32.mxu0 %v15563_v38  ;;  %v15565_v62 = vld [vmem:[#allocation15_spill] sm:$0xff]  ;;  %v13020_v38 = vsub.f32 %v83_v43, %v1044_v7 }
  0x89   :  { %10718 = vmatprep.subr.bf16.mxu0 %v12726_v30  ;;  %v104_v6 = vrot.slane %v15565_v62, 1  ;;  %v79_v30 = vld [vmem:[%s15255_s1 + $0x108] sm:$0xff] }
  0x8b   :  { %737 = vmatmul.mubr.f32.gmra.mrb[14].mxu0 %v229_v49  ;;  %v106_v22 = vsel %vm105_vm2, %v103_v17, %v104_v6  ;;  %v78_v49 = vld [vmem:[%s15255_s1 + $0x100] sm:$0xff]  ;;  %v107_v45 = vsel %vm105_vm2, %v104_v6, %v103_v17 }
  0x8c   :  { %10720 = vmatpush3.bf16.msra.mxu0 %v12732_v18  ;;  %903 = vmatprep.mubr.f32.mxu0 %v12476_v61  ;;  %v12875_v61 = vand.u32 4294901760, %v106_v22 }
  0x8d   :  { %10722 = vmatprep.subr.bf16.mxu0 %v12738_v60  ;;  %v1029_v60 = vand.u32 4294901760, %v78_v49 }
  0x8e   :  { %v12886_v18 = vsub.f32 %v106_v22, %v12875_v61 }
  0x8f   :  { %v12977_v8 = vsub.f32 %v78_v49, %v1029_v60  ;;  %v13044_v49 = vpack.c.bf16 %v1074_v58, %v1071_v14 }
  0x90   :  { %10724 = vmatpush3.bf16.msra.mxu0 %v12744_v46  ;;  %v1032_v46 = vand.u32 4294901760, %v79_v30 }
  0x91   :  { %10726 = vmatprep.subr.bf16.mxu0 %v12750_v31  ;;  %v80_v31 = vld [vmem:[%s15255_s1 + $0x110] sm:$0xff]  ;;  %v1132_v4 = vand.u32 4294901760, %v12977_v8 }
  0x92   :  { %v12979_v10 = vsub.f32 %v79_v30, %v1032_v46 }
  0x93   :  { %v1133_v17 = vsub.f32 %v12977_v8, %v1132_v4 }
  0x94   :  { %10728 = vmatpush3.bf16.msra.mxu0 %v12756_v13  ;;  %v81_v13 = vld [vmem:[%s15255_s1 + $0x118] sm:$0xff]  ;;  %v1139_v11 = vand.u32 4294901760, %v12979_v10 }
  0x95   :  { %10730 = vmatprep.subr.bf16.mxu0 %v12762_v19  ;;  %v1111_v19 = vand.u32 4294901760, %v12886_v18 }
  0x96   :  { %v1140_v62 = vsub.f32 %v12979_v10, %v1139_v11 }
  0x97   :  { %v1112_v9 = vsub.f32 %v12886_v18, %v1111_v19 }
  0x98   :  { %10732 = vmatpush3.bf16.msra.mxu0 %v12768_v12  ;;  %v12898_v12 = vpack.c.bf16 %v1032_v46, %v1029_v60  ;;  %v1167_v46 = vand.u32 4294901760, %v13020_v38 }
  0x99   :  { %10734 = vmatprep.subr.bf16.mxu0 %v12774_v3  ;;  %v1035_v3 = vand.u32 4294901760, %v80_v31 }
  0x9b   :  { %v12988_v29 = vsub.f32 %v80_v31, %v1035_v3  ;;  %v1134_v31 = vand.u32 4294901760, %v1133_v17 }
  0x9c   :  { %10736 = vmatpush3.bf16.msra.mxu0 %v12780_v40  ;;  %v1038_v40 = vand.u32 4294901760, %v81_v13 }
  0x9d   :  { %10738 = vmatprep.subr.bf16.mxu0 %v12786_v39  ;;  %v82_v39 = vld [vmem:[%s15255_s1 + $0x120] sm:$0xff]  ;;  %v1146_v16 = vand.u32 4294901760, %v12988_v29 }
  0x9e   :  { %v12997_v47 = vsub.f32 %v81_v13, %v1038_v40  ;;  %v1141_v13 = vand.u32 4294901760, %v1140_v62 }
  0x9f   :  { %v1147_v22 = vsub.f32 %v12988_v29, %v1146_v16 }
  0xa0   :  { %10740 = vmatpush3.bf16.msra.mxu0 %v12792_v20  ;;  %v12911_v20 = vpack.c.bf16 %v1038_v40, %v1035_v3  ;;  %v1153_v5 = vand.u32 4294901760, %v12997_v47  ;;  %v13053_v3 = vsub.f32 %v12916_v53, %v1047_v24  ;;  %v13056_v40 = vsub.f32 %v12921_v2, %v1050_v28 }
  0xa1   :  { %10742 = vmatprep.subr.bf16.mxu0 %v12794_v52  ;;  %v1041_v52 = vand.u32 4294901760, %v82_v39  ;;  %v1148_v43 = vand.u32 4294901760, %v1147_v22  ;;  %v13069_v53 = vsub.f32 %v12934_v34, %v1053_v35  ;;  %v10809_v2 = vpack.c.bf16 %v1141_v13, %v1134_v31 }
  0xa2   :  { %v1154_v30 = vsub.f32 %v12997_v47, %v1153_v5  ;;  %v15333_v24 = vand.u32 4294901760, %v13056_v40  ;;  %v13100_v31 = vsub.f32 %v12975_v1, %v1065_v33 }
  0xa3   :  { %v12927_v63 = vpack.c.bf16 %v1044_v7, %v1041_v52  ;;  %v13018_v36 = vsub.f32 %v82_v39, %v1041_v52  ;;  %v1168_v7 = vsub.f32 %v13020_v38, %v1167_v46  ;;  %v15332_v34 = vand.u32 4294901760, %v13069_v53 }
  0xa4   :  { %10744 = vmatpush3.bf16.msra.mxu0 %v12796_v26  ;;  %v1113_v26 = vand.u32 4294901760, %v1112_v9  ;;  %v1155_v9 = vand.u32 4294901760, %v1154_v30 }
  0xa5   :  { %10778 = vmatprep.subr.bf16.mxu0 %v12898_v12  ;;  %v1160_v60 = vand.u32 4294901760, %v13018_v36  ;;  %v1169_v62 = vand.u32 4294901760, %v1168_v7  ;;  %v15324_v7 = vand.u32 4294901760, %v13100_v31 }
  0xa6   :  { %v10813_v22 = vpack.c.bf16 %v1155_v9, %v1148_v43  ;;  %v13109_v9 = vsub.f32 %v12984_v25, %v1068_v50 }
  0xa7   :  { %905 = vmatmul.mubr.f32.vlgmr.msra.gmra.mrb[16].mxu0 %v12533_v56  ;;  %v12937_v56 = vadd.s32 8, %v15566_v15  ;;  %v1161_v52 = vsub.f32 %v13018_v36, %v1160_v60 }
  0xa8   :  { %10780 = vmatpush3.bf16.msra.mxu0 %v12898_v12  ;;  %910 = vmatprep.mubr.f32.mxu0 %v12666_v21  ;;  %v12942_v21 = vld [vmem:[%s15255_s1 + $0x148] sm:$0xff] }
  0xa9   :  { %10782 = vmatprep.subr.bf16.mxu0 %v12911_v20  ;;  %15567 = vst [vmem:[#allocation22_spill] sm:$0xff] %v12937_v56  ;;  %v1056_v42 = vand.u32 4294901760, %v12942_v21  ;;  %vm45_vm3 = vcmp.eq.s32.totalorder %v12937_v56, 15  ;;  %v1162_v17 = vand.u32 4294901760, %v1161_v52 }
  0xaa   :  { %v109_v57 = vsel %vm45_vm3, 0.0, %v107_v45 }
  0xab   :  { %912 = vmatmul.mubr.f32.gmra.mrb[18].mxu0 %v12684_v55  ;;  %v12962_v55 = vld [vmem:[%s15255_s1 + $0x158] sm:$0xff]  ;;  %v12969_v59 = vpack.c.bf16 %v1056_v42, %v1053_v35  ;;  %v12986_v27 = vand.u32 4294901760, %v109_v57  ;;  %v13075_v28 = vsub.f32 %v12942_v21, %v1056_v42  ;;  %v1182_v42 = vsub.f32 %v13056_v40, %v15333_v24 }
  0xac   :  { %10784 = vmatpush3.bf16.msra.mxu0 %v12911_v20  ;;  %9237 = vmatprep.mubr.f32.mxu0 %v1113_v26  ;;  %v1062_v0 = vand.u32 4294901760, %v12962_v55  ;;  %v15334_v26 = vand.u32 4294901760, %v13053_v3  ;;  %v10817_v30 = vpack.c.bf16 %v1169_v62, %v1162_v17  ;;  %v13127_v17 = vsub.f32 %v13006_v54, %v1074_v58 }
  0xad   :  { %10786 = vmatprep.subr.bf16.mxu0 %v12927_v63  ;;  %v13012_v23 = vsub.f32 %v109_v57, %v12986_v27  ;;  %v13078_v57 = vsub.f32 %v12954_v44, %v1059_v51  ;;  %v15331_v44 = vand.u32 4294901760, %v13075_v28  ;;  %v10905_v24 = vpack.c.bf16 %v1139_v11, %v1132_v4 }
  0xae   :  { %v13000_v48 = vpack.c.bf16 %v1062_v0, %v1059_v51  ;;  %v13083_v35 = vsub.f32 %v12962_v55, %v1062_v0  ;;  %v1175_v21 = vsub.f32 %v13053_v3, %v15334_v26  ;;  %v1189_v55 = vsub.f32 %v13069_v53, %v15332_v34 }
  0xaf   :  { %v1121_v6 = vand.u32 4294901760, %v13012_v23  ;;  %v15326_v51 = vand.u32 4294901760, %v13078_v57  ;;  %v1196_v43 = vsub.f32 %v13075_v28, %v15331_v44  ;;  %v15570_v4 = vand.u32 4294901760, %v13069_v53 }
  0xb0   :  { %10788 = vmatpush3.bf16.msra.mxu0 %v12927_v63  ;;  %v15325_v0 = vand.u32 4294901760, %v13083_v35  ;;  %v1176_v13 = vand.u32 4294901760, %v1175_v21  ;;  %v1190_v1 = vand.u32 4294901760, %v1189_v55  ;;  %v1217_v21 = vsub.f32 %v13100_v31, %v15324_v7 }
  0xb1   :  { %10790 = vmatprep.subr.bf16.mxu0 %v12948_v41  ;;  %v1122_v39 = vsub.f32 %v13012_v23, %v1121_v6  ;;  %v1203_v52 = vsub.f32 %v13078_v57, %v15326_v51  ;;  %v1197_v50 = vand.u32 4294901760, %v1196_v43  ;;  %v15319_v55 = vand.u32 4294901760, %v13127_v17 }
  0xb2   :  { %v1210_v33 = vsub.f32 %v13083_v35, %v15325_v0  ;;  %v1218_v58 = vand.u32 4294901760, %v1217_v21  ;;  %v10857_v21 = vpack.c.bf16 %v13075_v28, %v13069_v53  ;;  %v15571_v11 = vand.u32 4294901760, %v13075_v28 }
  0xb3   :  { %v1123_v45 = vand.u32 4294901760, %v1122_v39  ;;  %v1183_v39 = vand.u32 4294901760, %v1182_v42  ;;  %v1204_v62 = vand.u32 4294901760, %v1203_v52 }
  0xb4   :  { %10792 = vmatpush3.bf16.msra.mxu0 %v12948_v41 }
  0xb5   :  { %10794 = vmatprep.subr.bf16.mxu0 %v12969_v59  ;;  %v10821_v25 = vpack.c.bf16 %v1183_v39, %v1176_v13  ;;  %v1238_v39 = vsub.f32 %v13127_v17, %v15319_v55 }
  0xb8   :  { %10796 = vmatpush3.bf16.msra.mxu0 %v12969_v59 }
  0xb9   :  { %10798 = vmatprep.subr.bf16.mxu0 %v13000_v48 }
  0xbc   :  { %10800 = vmatpush3.bf16.msra.mxu0 %v13000_v48 }
  0xbd   :  { %10802 = vmatprep.subr.bf16.mxu0 %v13027_v32 }
  0xc0   :  { %10804 = vmatpush3.bf16.msra.mxu0 %v13027_v32 }
  0xc1   :  { %10806 = vmatprep.subr.bf16.mxu0 %v13044_v49 }
  0xc4   :  { %10808 = vmatpush3.bf16.msra.mxu0 %v13044_v49 }
  0xc5   :  { %10810 = vmatprep.subr.bf16.mxu0 %v10809_v2 }
  0xc7   :  { %9238 = vmatmul.mubr.f32.vlgmr.msra.gmra.mrb[20].mxu0 %v1123_v45  ;;  %v15321_v45 = vand.u32 4294901760, %v13109_v9 }
  0xc8   :  { %10812 = vmatpush3.bf16.msra.mxu0 %v10809_v2  ;;  %9272 = vmatprep.mubr.f32.mxu0 %v12875_v61  ;;  %v13121_v2 = vsub.f32 %v12995_v37, %v1071_v14  ;;  %v10825_v37 = vpack.c.bf16 %v1197_v50, %v1190_v1  ;;  %v1239_v1 = vand.u32 4294901760, %v1238_v39  ;;  %v10845_v50 = vpack.c.bf16 %v12997_v47, %v12988_v29 }
  0xc9   :  { %10814 = vmatprep.subr.bf16.mxu0 %v10813_v22  ;;  %v1224_v14 = vsub.f32 %v13109_v9, %v15321_v45  ;;  %v13246_v45 = vld [vmem:[%s15257_s2 + $0x40] sm:$0xff]  ;;  %v15569_v29 = vand.u32 4294901760, %v13056_v40 }
  0xca   :  { %v15320_v42 = vand.u32 4294901760, %v13121_v2  ;;  %v10869_v39 = vpack.c.bf16 %v13127_v17, %v13121_v2  ;;  %v15576_v53 = vand.u32 4294901760, %v13121_v2 }
  0xcc   :  { %10816 = vmatpush3.bf16.msra.mxu0 %v10813_v22  ;;  %v1211_v22 = vand.u32 4294901760, %v1210_v33  ;;  %v1231_v13 = vsub.f32 %v13121_v2, %v15320_v42 }
  0xcd   :  { %10818 = vmatprep.subr.bf16.mxu0 %v10817_v30 }
  0xce   :  { %v10829_v54 = vpack.c.bf16 %v1211_v22, %v1204_v62  ;;  %v1232_v52 = vand.u32 4294901760, %v1231_v13  ;;  %v10849_v62 = vpack.c.bf16 %v13020_v38, %v13018_v36  ;;  %v10853_v22 = vpack.c.bf16 %v13056_v40, %v13053_v3 }
  0xcf   :  { %v15574_v38 = vand.u32 4294901760, %v13100_v31 }
  0xd0   :  { %10820 = vmatpush3.bf16.msra.mxu0 %v10817_v30  ;;  %v1225_v30 = vand.u32 4294901760, %v1224_v14  ;;  %v10837_v33 = vpack.c.bf16 %v1239_v1, %v1232_v52  ;;  %v10865_v14 = vpack.c.bf16 %v13109_v9, %v13100_v31  ;;  %v13168_v1 = vld [vmem:[%s15257_s2] sm:$0xff] }
  0xd1   :  { %10822 = vmatprep.subr.bf16.mxu0 %v10821_v25 }
  0xd2   :  { %v10833_v43 = vpack.c.bf16 %v1225_v30, %v1218_v58 }
  0xd4   :  { %10824 = vmatpush3.bf16.msra.mxu0 %v10821_v25  ;;  %v10841_v25 = vpack.c.bf16 %v12979_v10, %v12977_v8  ;;  %v10913_v8 = vpack.c.bf16 %v1167_v46, %v1160_v60  ;;  %v15568_v10 = vand.u32 4294901760, %v13053_v3 }
  0xd5   :  { %10826 = vmatprep.subr.bf16.mxu0 %v10825_v37 }
  0xd6   :  { %v10917_v47 = vpack.c.bf16 %v15569_v29, %v15568_v10 }
  0xd8   :  { %10828 = vmatpush3.bf16.msra.mxu0 %v10825_v37  ;;  %v10861_v37 = vpack.c.bf16 %v13083_v35, %v13078_v57 }
  0xd9   :  { %10830 = vmatprep.subr.bf16.mxu0 %v10829_v54 }
  0xdc   :  { %10832 = vmatpush3.bf16.msra.mxu0 %v10829_v54 }
  0xdd   :  { %10834 = vmatprep.subr.bf16.mxu0 %v10833_v43 }
  0xe0   :  { %10836 = vmatpush3.bf16.msra.mxu0 %v10833_v43 }
  0xe1   :  { %10838 = vmatprep.subr.bf16.mxu0 %v10837_v33 }
  0xe4   :  { %10840 = vmatpush3.bf16.msra.mxu0 %v10837_v33  ;;  %v13173_v33 = vld [vmem:[%s15257_s2 + $0x8] sm:$0xff] }
  0xe5   :  { %10842 = vmatprep.subr.bf16.mxu0 %v10841_v25 }
  0xe7   :  { %9273 = vmatmul.mubr.f32.vlgmr.msra.gmra.mrb[20].mxu0 %v12986_v27 }
  0xe8   :  { %10844 = vmatpush3.bf16.msra.mxu0 %v10841_v25  ;;  %9307 = vmatprep.mubr.f32.mxu0 %v12886_v18  ;;  %v13178_v25 = vld [vmem:[%s15257_s2 + $0x10] sm:$0xff] }
  0xe9   :  { %10846 = vmatprep.subr.bf16.mxu0 %v10845_v50 }
  0xec   :  { %10848 = vmatpush3.bf16.msra.mxu0 %v10845_v50  ;;  %v15316_v50 = vand.u32 4294901760, %v13168_v1 }
  0xed   :  { %10850 = vmatprep.subr.bf16.mxu0 %v10849_v62 }
  0xf0   :  { %10852 = vmatpush3.bf16.msra.mxu0 %v10849_v62  ;;  %v15315_v62 = vand.u32 4294901760, %v13173_v33 }
  0xf1   :  { %10854 = vmatprep.subr.bf16.mxu0 %v10853_v22 }
  0xf4   :  { %10856 = vmatpush3.bf16.msra.mxu0 %v10853_v22  ;;  %v13185_v22 = vld [vmem:[%s15257_s2 + $0x18] sm:$0xff] }
  0xf5   :  { %10858 = vmatprep.subr.bf16.mxu0 %v10857_v21 }
  0xf8   :  { %10860 = vmatpush3.bf16.msra.mxu0 %v10857_v21  ;;  %v15318_v21 = vand.u32 4294901760, %v13178_v25 }
  0xf9   :  { %10862 = vmatprep.subr.bf16.mxu0 %v10861_v37  ;;  %v8085_v54 = vpop.f32.mrb[0].mxu0 }
  0xfa   :  { %v8086_v58 = vpop.f32.mrb[1].mxu0  ;;  %v8275_v13 = vpop.f32.mrb[0].mxu1 }
  0xfb   :  { %v13159_v30 = vadd.f32 %v8086_v58, %v8085_v54  ;;  %v8276_v43 = vpop.f32.mrb[1].mxu1  ;;  %v15317_v54 = vand.u32 4294901760, %v13185_v22  ;;  %v13204_v58 = vpack.c.bf16 %v15315_v62, %v15316_v50  ;;  %v13221_v62 = vld [vmem:[%s15257_s2 + $0x30] sm:$0xff]  ;;  %v13226_v50 = vld [vmem:[%s15257_s2 + $0x38] sm:$0xff] }
  0xfc   :  { %10864 = vmatpush3.bf16.msra.mxu0 %v10861_v37  ;;  %v13163_v52 = vadd.f32 %v8276_v43, %v8275_v13  ;;  %v13191_v37 = vld [vmem:[%s15257_s2 + $0x20] sm:$0xff]  ;;  %v15328_v55 = vand.u32 4294901760, %v13221_v62  ;;  %v15327_v42 = vand.u32 4294901760, %v13226_v50 }
  0xfd   :  { %10866 = vmatprep.subr.bf16.mxu0 %v10865_v14  ;;  %v13211_v13 = vpack.c.bf16 %v15317_v54, %v15318_v21  ;;  %10970 = vmatprep.subr.bf16.mxu1 %v13204_v58 }
  0xfe   :  { %10972 = vmatpush3.bf16.msra.mxu1 %v13204_v58 }
  0xff   :  { %10974 = vmatprep.subr.bf16.mxu1 %v13211_v13 }
 0x100   :  { %10868 = vmatpush3.bf16.msra.mxu0 %v10865_v14  ;;  %v13196_v14 = vld [vmem:[%s15257_s2 + $0x28] sm:$0xff] }
 0x101   :  { %10870 = vmatprep.subr.bf16.mxu0 %v10869_v39  ;;  %v15322_v43 = vand.u32 4294901760, %v13196_v14 }
 0x102   :  { %10976 = vmatpush3.bf16.msra.mxu1 %v13211_v13 }
 0x104   :  { %10872 = vmatpush3.bf16.msra.mxu0 %v10869_v39  ;;  %v15323_v39 = vand.u32 4294901760, %v13191_v37 }
 0x105   :  { %10874 = vmatprep.subr.bf16.mxu0 %v12898_v12 }
 0x107   :  { %9308 = vmatmul.mubr.f32.vlgmr.msra.gmra.mrb[20].mxu0 %v13012_v23  ;;  %v10921_v23 = vpack.c.bf16 %v15571_v11, %v15570_v4  ;;  %v15579_v11 = vand.u32 4294901760, %v13168_v1 }
 0x108   :  { %10876 = vmatpush3.bf16.msra.mxu0 %v12898_v12  ;;  %9342 = vmatprep.mubr.f32.mxu0 %v1111_v19  ;;  %v13238_v19 = vpack.c.bf16 %v15322_v43, %v15323_v39  ;;  %v15330_v43 = vand.u32 4294901760, %v13246_v45 }
 0x109   :  { %10878 = vmatprep.subr.bf16.mxu0 %v12911_v20 }
 0x10a   :  { %v8278_v54 = vpop.f32.mrb[2].mxu1  ;;  %10978 = vmatprep.subr.bf16.mxu1 %v13238_v19 }
 0x10b   :  { %v8279_v21 = vpop.f32.mrb[3].mxu1  ;;  %10980 = vmatpush3.bf16.msra.mxu1 %v13238_v19 }
 0x10c   :  { %v13231_v18 = vadd.f32 %v8279_v21, %v8278_v54  ;;  %10880 = vmatpush3.bf16.msra.mxu0 %v12911_v20  ;;  %v13251_v21 = vld [vmem:[%s15257_s2 + $0x48] sm:$0xff]  ;;  %v13260_v54 = vpack.c.bf16 %v15327_v42, %v15328_v55 }
 0x10d   :  { %10882 = vmatprep.subr.bf16.mxu0 %v12927_v63  ;;  %v15329_v39 = vand.u32 4294901760, %v13251_v21 }
 0x10e   :  { %10982 = vmatprep.subr.bf16.mxu1 %v13260_v54 }
 0x10f   :  { %v13272_v42 = vpack.c.bf16 %v15329_v39, %v15330_v43  ;;  %10984 = vmatpush3.bf16.msra.mxu1 %v13260_v54 }
 0x110   :  { %10884 = vmatpush3.bf16.msra.mxu0 %v12927_v63 }
 0x111   :  { %10886 = vmatprep.subr.bf16.mxu0 %v12948_v41  ;;  %10986 = vmatprep.subr.bf16.mxu1 %v13272_v42 }
 0x112   :  { %v8088_v7 = vpop.f32.mrb[2].mxu0 }
 0x113   :  { %v8089_v0 = vpop.f32.mrb[3].mxu0  ;;  %10988 = vmatpush3.bf16.msra.mxu1 %v13272_v42 }
 0x114   :  { %v8090_v51 = vadd.f32 %v8089_v0, %v8088_v7  ;;  %10888 = vmatpush3.bf16.msra.mxu0 %v12948_v41 }
 0x115   :  { %10890 = vmatprep.subr.bf16.mxu0 %v12969_v59 }
 0x118   :  { %10892 = vmatpush3.bf16.msra.mxu0 %v12969_v59 }
 0x119   :  { %10894 = vmatprep.subr.bf16.mxu0 %v13000_v48 }
 0x11a   :  { %v8123_v0 = vpop.f32.mrb[4].mxu0 }
 0x11b   :  { %v8124_v7 = vpop.f32.mrb[5].mxu0 }
 0x11c   :  { %v8125_v55 = vadd.f32 %v8124_v7, %v8123_v0  ;;  %10896 = vmatpush3.bf16.msra.mxu0 %v13000_v48  ;;  %v32_v0 = vld [vmem:[%s15257_s2 + $0x50] sm:$0xff]  ;;  %v33_v7 = vld [vmem:[%s15257_s2 + $0x58] sm:$0xff] }
 0x11d   :  { %10898 = vmatprep.subr.bf16.mxu0 %v13027_v32 }
 0x11e   :  { %v466_v39 = vadd.f32 %v8125_v55, %v13159_v30  ;;  %v8126_v43 = vpop.f32.mrb[6].mxu0  ;;  %v10909_v55 = vpack.c.bf16 %v1153_v5, %v1146_v16  ;;  %v15572_v16 = vand.u32 4294901760, %v13078_v57  ;;  %v15573_v5 = vand.u32 4294901760, %v13083_v35 }
 0x11f   :  { %v8127_v44 = vpop.f32.mrb[7].mxu0 }
 0x120   :  { %v8128_v34 = vadd.f32 %v8127_v44, %v8126_v43  ;;  %10900 = vmatpush3.bf16.msra.mxu0 %v13027_v32  ;;  %v10925_v36 = vpack.c.bf16 %v15573_v5, %v15572_v16  ;;  %v15580_v16 = vand.u32 4294901760, %v13173_v33 }
 0x121   :  { %10902 = vmatprep.subr.bf16.mxu0 %v13044_v49 }
 0x122   :  { %v473_v26 = vadd.f32 %v8128_v34, %v8090_v51  ;;  %v13385_v5 = vsub.f32 %v13173_v33, %v15580_v16 }
 0x124   :  { %10904 = vmatpush3.bf16.msra.mxu0 %v13044_v49 }
 0x125   :  { %10906 = vmatprep.subr.bf16.mxu0 %v10905_v24 }
 0x127   :  { %9343 = vmatmul.mubr.f32.vlgmr.msra.gmra.mrb[20].mxu0 %v1121_v6  ;;  %v15575_v6 = vand.u32 4294901760, %v13109_v9 }
 0x128   :  { %10908 = vmatpush3.bf16.msra.mxu0 %v10905_v24  ;;  %9377 = vmatprep.mubr.f32.mxu0 %v12875_v61  ;;  %v15577_v24 = vand.u32 4294901760, %v13127_v17 }
 0x129   :  { %10910 = vmatprep.subr.bf16.mxu0 %v10909_v55  ;;  %v10929_v60 = vpack.c.bf16 %v15575_v6, %v15574_v38  ;;  %v37_v38 = vld [vmem:[%s15257_s2 + $0x78] sm:$0xff] }
 0x12a   :  { %v10933_v28 = vpack.c.bf16 %v15577_v24, %v15576_v53 }
 0x12c   :  { %10912 = vmatpush3.bf16.msra.mxu0 %v10909_v55  ;;  %v1743_v55 = vand.u32 4294901760, %v32_v0 }
 0x12d   :  { %10914 = vmatprep.subr.bf16.mxu0 %v10913_v8 }
 0x130   :  { %10916 = vmatpush3.bf16.msra.mxu0 %v10913_v8  ;;  %v1746_v8 = vand.u32 4294901760, %v33_v7 }
 0x131   :  { %10918 = vmatprep.subr.bf16.mxu0 %v10917_v47 }
 0x132   :  { %v13363_v10 = vpack.c.bf16 %v1746_v8, %v1743_v55 }
 0x134   :  { %10920 = vmatpush3.bf16.msra.mxu0 %v10917_v47  ;;  %10990 = vmatprep.subr.bf16.mxu1 %v13363_v10 }
 0x135   :  { %10922 = vmatprep.subr.bf16.mxu0 %v10921_v23  ;;  %10992 = vmatpush3.bf16.msra.mxu1 %v13363_v10 }
 0x138   :  { %10924 = vmatpush3.bf16.msra.mxu0 %v10921_v23  ;;  %v13380_v23 = vsub.f32 %v13168_v1, %v15579_v11  ;;  %v1758_v1 = vand.u32 4294901760, %v37_v38 }
 0x139   :  { %10926 = vmatprep.subr.bf16.mxu0 %v10925_v36 }
 0x13a   :  { %v8161_v46 = vpop.f32.mrb[8].mxu0 }
 0x13b   :  { %v8162_v3 = vpop.f32.mrb[9].mxu0 }
 0x13c   :  { %v8163_v40 = vadd.f32 %v8162_v3, %v8161_v46  ;;  %10928 = vmatpush3.bf16.msra.mxu0 %v10925_v36  ;;  %v36_v36 = vld [vmem:[%s15257_s2 + $0x70] sm:$0xff]  ;;  %v15346_v46 = vand.u32 4294901760, %v13385_v5 }
 0x13d   :  { %10930 = vmatprep.subr.bf16.mxu0 %v10929_v60  ;;  %v1755_v6 = vand.u32 4294901760, %v36_v36 }
 0x13e   :  { %v611_v57 = vadd.f32 %v8163_v40, %v466_v39  ;;  %v8164_v34 = vpop.f32.mrb[10].mxu0  ;;  %v1824_v40 = vsub.f32 %v13385_v5, %v15346_v46 }
 0x13f   :  { %v8165_v35 = vpop.f32.mrb[11].mxu0  ;;  %v13399_v33 = vpack.c.bf16 %v1758_v1, %v1755_v6 }
 0x140   :  { %v8166_v44 = vadd.f32 %v8165_v35, %v8164_v34  ;;  %10932 = vmatpush3.bf16.msra.mxu0 %v10929_v60  ;;  %v1816_v60 = vand.u32 4294901760, %v13380_v23  ;;  %v1825_v24 = vand.u32 4294901760, %v1824_v40  ;;  %v13417_v34 = vsub.f32 %v33_v7, %v1746_v8 }
 0x141   :  { %10934 = vmatprep.subr.bf16.mxu0 %v10933_v28  ;;  %15581 = vst [vmem:[#allocation2_spill] sm:$0xff] %v13399_v33 }
 0x142   :  { %v620_v51 = vadd.f32 %v8166_v44, %v473_v26  ;;  %v1817_v3 = vsub.f32 %v13380_v23, %v1816_v60  ;;  %v15339_v44 = vand.u32 4294901760, %v13417_v34 }
 0x144   :  { %10936 = vmatpush3.bf16.msra.mxu0 %v10933_v28  ;;  %v1818_v53 = vand.u32 4294901760, %v1817_v3 }
 0x145   :  { %10938 = vmatprep.subr.bf16.mxu0 %v12898_v12 }
 0x146   :  { %v13411_v28 = vpack.c.bf16 %v1825_v24, %v1818_v53  ;;  %v15592_v53 = vand.u32 4294901760, %v13191_v37 }
 0x147   :  { %9378 = vmatmul.mubr.f32.vlgmr.msra.gmra.mrb[20].mxu0 %v12986_v27 }
 0x148   :  { %10940 = vmatpush3.bf16.msra.mxu0 %v12898_v12  ;;  %9412 = vmatprep.mubr.f32.mxu0 %v12875_v61  ;;  %15582 = vst [vmem:[#allocation21_spill] sm:$0xff] %v13411_v28  ;;  %v13488_v24 = vsub.f32 %v13191_v37, %v15592_v53 }
 0x149   :  { %10942 = vmatprep.subr.bf16.mxu0 %v12911_v20 }
 0x14c   :  { %10944 = vmatpush3.bf16.msra.mxu0 %v12911_v20 }
 0x14d   :  { %10946 = vmatprep.subr.bf16.mxu0 %v12927_v63 }
 0x150   :  { %10948 = vmatpush3.bf16.msra.mxu0 %v12927_v63 }
 0x151   :  { %10950 = vmatprep.subr.bf16.mxu0 %v12948_v41 }
 0x154   :  { %10952 = vmatpush3.bf16.msra.mxu0 %v12948_v41 }
 0x155   :  { %10954 = vmatprep.subr.bf16.mxu0 %v12969_v59 }
 0x158   :  { %10956 = vmatpush3.bf16.msra.mxu0 %v12969_v59 }
 0x159   :  { %10958 = vmatprep.subr.bf16.mxu0 %v13000_v48 }
 0x15a   :  { %v8199_v12 = vpop.f32.mrb[12].mxu0 }
 0x15b   :  { %v8200_v61 = vpop.f32.mrb[13].mxu0 }
 0x15c   :  { %v8201_v26 = vadd.f32 %v8200_v61, %v8199_v12  ;;  %10960 = vmatpush3.bf16.msra.mxu0 %v13000_v48 }
 0x15d   :  { %10962 = vmatprep.subr.bf16.mxu0 %v13027_v32 }
 0x15e   :  { %v728_v20 = vadd.f32 %v8201_v26, %v611_v57  ;;  %v8202_v31 = vpop.f32.mrb[14].mxu0  ;;  %v13415_v57 = vsub.f32 %v32_v0, %v1743_v55  ;;  %v1894_v26 = vsub.f32 %v13417_v34, %v15339_v44 }
 0x15f   :  { %v8203_v63 = vpop.f32.mrb[15].mxu0 }
 0x160   :  { %v8204_v9 = vadd.f32 %v8203_v63, %v8202_v31  ;;  %10964 = vmatpush3.bf16.msra.mxu0 %v13027_v32  ;;  %v15340_v35 = vand.u32 4294901760, %v13415_v57 }
 0x161   :  { %10966 = vmatprep.subr.bf16.mxu0 %v13044_v49 }
 0x162   :  { %v739_v41 = vadd.f32 %v8204_v9, %v620_v51  ;;  %v1887_v51 = vsub.f32 %v13415_v57, %v15340_v35  ;;  %v1895_v9 = vand.u32 4294901760, %v1894_v26  ;;  %v15597_v35 = vand.u32 4294901760, %v13251_v21 }
 0x164   :  { %10968 = vmatpush3.bf16.msra.mxu0 %v13044_v49 }
 0x165   :  { %11162 = vmatprep.subr.bf16.mxu0 %v13204_v58 }
 0x167   :  { %9413 = vmatmul.mubr.f32.vlgmr.msra.gmra.mrb[20].mxu0 %v12986_v27 }
 0x168   :  { %11164 = vmatpush3.bf16.msra.mxu0 %v13204_v58 }
 0x169   :  { %11166 = vmatprep.subr.bf16.mxu0 %v13211_v13 }
 0x16c   :  { %11168 = vmatpush3.bf16.msra.mxu0 %v13211_v13 }
 0x16d   :  { %11170 = vmatprep.subr.bf16.mxu0 %v13238_v19 }
 0x170   :  { %11172 = vmatpush3.bf16.msra.mxu0 %v13238_v19 }
 0x171   :  { %11174 = vmatprep.subr.bf16.mxu0 %v13260_v54 }
 0x174   :  { %11176 = vmatpush3.bf16.msra.mxu0 %v13260_v54 }
 0x175   :  { %11178 = vmatprep.subr.bf16.mxu0 %v13272_v42 }
 0x178   :  { %11180 = vmatpush3.bf16.msra.mxu0 %v13272_v42 }
 0x179   :  { %11182 = vmatprep.subr.bf16.mxu0 %v13363_v10 }
 0x17a   :  { %v8237_v59 = vpop.f32.mrb[16].mxu0 }
 0x17b   :  { %v8238_v27 = vpop.f32.mrb[17].mxu0 }
 0x17c   :  { %v8239_v48 = vadd.f32 %v8238_v27, %v8237_v59  ;;  %11184 = vmatpush3.bf16.msra.mxu0 %v13363_v10  ;;  %v13439_v27 = vsub.f32 %v36_v36, %v1755_v6  ;;  %v15590_v36 = vand.u32 4294901760, %v13178_v25  ;;  %v15591_v6 = vand.u32 4294901760, %v13185_v22 }
 0x17e   :  { %v907_v32 = vadd.f32 %v8239_v48, %v728_v20  ;;  %v8240_v49 = vpop.f32.mrb[18].mxu0  ;;  %v1888_v20 = vand.u32 4294901760, %v1887_v51  ;;  %v13441_v48 = vsub.f32 %v37_v38, %v1758_v1  ;;  %v13476_v38 = vsub.f32 %v13178_v25, %v15590_v36 }
 0x17f   :  { %v8241_v2 = vpop.f32.mrb[19].mxu0  ;;  %v13481_v1 = vsub.f32 %v13185_v22, %v15591_v6  ;;  %v15593_v51 = vand.u32 4294901760, %v13196_v14 }
 0x180   :  { %v8242_v17 = vadd.f32 %v8241_v2, %v8240_v49  ;;  %v13352_v30 = vadd.f32 %v13163_v52, %v907_v32  ;;  %v34_v52 = vld [vmem:[%s15257_s2 + $0x60] sm:$0xff]  ;;  %v13443_v32 = vpack.c.bf16 %v1895_v9, %v1888_v20  ;;  %v13471_v16 = vpack.c.bf16 %v13441_v48, %v13439_v27 }
 0x181   :  { %v1749_v29 = vand.u32 4294901760, %v34_v52  ;;  %v15345_v3 = vand.u32 4294901760, %v13476_v38  ;;  %v15343_v40 = vand.u32 4294901760, %v13481_v1  ;;  %v13493_v26 = vsub.f32 %v13196_v14, %v15593_v51 }
 0x182   :  { %v914_v39 = vadd.f32 %v8242_v17, %v739_v41  ;;  %15583 = vst [vmem:[#allocation3_spill] sm:$0xff] %v13443_v32  ;;  %v15336_v17 = vand.u32 4294901760, %v13439_v27  ;;  %15589 = vst [vmem:[#allocation9_spill] sm:$0xff] %v13471_v16 }
 0x183   :  { %v13424_v12 = vsub.f32 %v34_v52, %v1749_v29  ;;  %v1838_v37 = vsub.f32 %v13481_v1, %v15343_v40 }
 0x184   :  { %v13355_v43 = vadd.f32 %v13231_v18, %v914_v39  ;;  %v35_v18 = vld [vmem:[%s15257_s2 + $0x68] sm:$0xff]  ;;  %v15335_v39 = vand.u32 4294901760, %v13441_v48  ;;  %v1915_v7 = vsub.f32 %v13439_v27, %v15336_v17 }
 0x185   :  { %v1752_v47 = vand.u32 4294901760, %v35_v18  ;;  %v15338_v31 = vand.u32 4294901760, %v13424_v12 }
 0x186   :  { %v1922_v55 = vsub.f32 %v13441_v48, %v15335_v39  ;;  %v1916_v8 = vand.u32 4294901760, %v1915_v7  ;;  %v15594_v7 = vand.u32 4294901760, %v13221_v62 }
 0x187   :  { %v13375_v4 = vpack.c.bf16 %v1752_v47, %v1749_v29  ;;  %v13426_v61 = vsub.f32 %v35_v18, %v1752_v47  ;;  %v1901_v41 = vsub.f32 %v13424_v12, %v15338_v31  ;;  %v13459_v29 = vpack.c.bf16 %v13385_v5, %v13380_v23 }
 0x188   :  { %v1923_v52 = vand.u32 4294901760, %v1922_v55  ;;  %v13463_v47 = vpack.c.bf16 %v13417_v34, %v13415_v57  ;;  %v13522_v55 = vsub.f32 %v13221_v62, %v15594_v7  ;;  %v1839_v62 = vand.u32 4294901760, %v1838_v37 }
 0x189   :  { %15578 = vst [vmem:[#allocation23_spill] sm:$0xff] %v13375_v4  ;;  %10994 = vmatprep.subr.bf16.mxu1 %v13375_v4  ;;  %11186 = vmatprep.subr.bf16.mxu0 %v13375_v4  ;;  %v15337_v63 = vand.u32 4294901760, %v13426_v61  ;;  %v1902_v49 = vand.u32 4294901760, %v1901_v41  ;;  %15586 = vst [vmem:[#allocation6_spill] sm:$0xff] %v13459_v29  ;;  %v13467_v11 = vpack.c.bf16 %v13426_v61, %v13424_v12  ;;  %v15596_v31 = vand.u32 4294901760, %v13246_v45 }
 0x18a   :  { %10996 = vmatpush3.bf16.msra.mxu1 %v13375_v4  ;;  %11188 = vmatpush3.bf16.msra.mxu0 %v13375_v4  ;;  %v13455_v18 = vpack.c.bf16 %v1923_v52, %v1916_v8  ;;  %15587 = vst [vmem:[#allocation7_spill] sm:$0xff] %v13463_v47  ;;  %v1831_v41 = vsub.f32 %v13476_v38, %v15345_v3  ;;  %v15595_v8 = vand.u32 4294901760, %v13226_v50 }
 0x18b   :  { %10998 = vmatprep.subr.bf16.mxu1 %v13399_v33  ;;  %11190 = vmatprep.subr.bf16.mxu0 %v13399_v33  ;;  %v1908_v59 = vsub.f32 %v13426_v61, %v15337_v63  ;;  %15588 = vst [vmem:[#allocation8_spill] sm:$0xff] %v13467_v11  ;;  %v13564_v44 = vsub.f32 %v13246_v45, %v15596_v31 }
 0x18c   :  { %15585 = vst [vmem:[#allocation5_spill] sm:$0xff] %v13455_v18  ;;  %v13527_v52 = vsub.f32 %v13226_v50, %v15595_v8 }
 0x18d   :  { %v1909_v2 = vand.u32 4294901760, %v1908_v59 }
 0x18e   :  { %11000 = vmatpush3.bf16.msra.mxu1 %v13399_v33  ;;  %11192 = vmatpush3.bf16.msra.mxu0 %v13399_v33  ;;  %v15349_v37 = vand.u32 4294901760, %v13527_v52 }
 0x18f   :  { %11002 = vmatprep.subr.bf16.mxu1 %v13411_v28  ;;  %11194 = vmatprep.subr.bf16.mxu0 %v13411_v28  ;;  %v13447_v0 = vpack.c.bf16 %v1909_v2, %v1902_v49  ;;  %v15341_v49 = vand.u32 4294901760, %v13493_v26 }
 0x191   :  { %15584 = vst [vmem:[#allocation4_spill] sm:$0xff] %v13447_v0  ;;  %v1852_v8 = vsub.f32 %v13493_v26, %v15341_v49 }
 0x193   :  { %v1853_v3 = vand.u32 4294901760, %v1852_v8 }
 0x23a   :  { %v9414_v25 = vpop.f32.mrb[20].mxu0 }
 0x23b   :  { %v13496_v20 = vadd.f32 %v9414_v25, %v13355_v43  ;;  %v1702_v22 = vpop.f32.mrb[21].mxu0  ;;  %v15342_v43 = vand.u32 4294901760, %v13488_v24  ;;  %v1832_v25 = vand.u32 4294901760, %v1831_v41  ;;  %v15348_v41 = vand.u32 4294901760, %v13522_v55 }
 0x23c   :  { %v13499_v9 = vadd.f32 %v1702_v22, %v13352_v30 }
 0x23d   :  { %v13508_v59 = vand.u32 4294901760, %v13496_v20  ;;  %v2397_v14 = vmul.f32 %v13496_v20, %v13496_v20  ;;  %v1845_v50 = vsub.f32 %v13488_v24, %v15342_v43  ;;  %v13575_v40 = vpack.c.bf16 %v1839_v62, %v1832_v25 }
 0x23e   :  { %v13515_v30 = vand.u32 4294901760, %v13499_v9  ;;  %v2396_v2 = vmul.f32 %v13499_v9, %v13499_v9  ;;  %v1866_v25 = vsub.f32 %v13527_v52, %v15349_v37  ;;  %v1872_v62 = vand.u32 4294901760, %v13564_v44 }
 0x23f   :  { %v13531_v36 = vsub.f32 %v13496_v20, %v13508_v59  ;;  %v13533_v6 = vand.u32 4294901760, %v2397_v14  ;;  %15598 = vst [vmem:[#allocation10_spill] sm:$0xff] %v13575_v40 }
 0x240   :  { %v13537_v53 = vsub.f32 %v13499_v9, %v13515_v30  ;;  %v13539_v51 = vand.u32 4294901760, %v2396_v2  ;;  %v1873_v37 = vsub.f32 %v13564_v44, %v1872_v62 }
 0x241   :  { %v15344_v22 = vand.u32 4294901760, %v13531_v36  ;;  %v13543_v7 = vsub.f32 %v2397_v14, %v13533_v6  ;;  %v15611_v23 = vand.u32 4294901760, %v13531_v36 }
 0x242   :  { %v1795_v39 = vand.u32 4294901760, %v13537_v53  ;;  %v13553_v17 = vsub.f32 %v2396_v2, %v13539_v51  ;;  %v13569_v2 = vsub.f32 %v13251_v21, %v15597_v35  ;;  %v1859_v35 = vsub.f32 %v13522_v55, %v15348_v41 }
 0x243   :  { %v1806_v14 = vsub.f32 %v13531_v36, %v15344_v22  ;;  %v15347_v63 = vand.u32 4294901760, %v13543_v7  ;;  %v1846_v22 = vand.u32 4294901760, %v1845_v50  ;;  %v1867_v41 = vand.u32 4294901760, %v1866_v25 }
 0x244   :  { %v1796_v49 = vsub.f32 %v13537_v53, %v1795_v39  ;;  %v2481_v43 = vand.u32 4294901760, %v13553_v17 }
 0x245   :  { %v2492_v21 = vsub.f32 %v13543_v7, %v15347_v63  ;;  %v1807_v31 = vand.u32 4294901760, %v1806_v14  ;;  %v13593_v63 = vpack.c.bf16 %v1853_v3, %v1846_v22  ;;  %v1860_v14 = vand.u32 4294901760, %v1859_v35 }
 0x246   :  { %v1797_v46 = vand.u32 4294901760, %v1796_v49  ;;  %v2482_v45 = vsub.f32 %v13553_v17, %v2481_v43  ;;  %v1879_v49 = vand.u32 4294901760, %v13569_v2  ;;  %v1874_v22 = vand.u32 4294901760, %v1873_v37 }
 0x247   :  { %v2493_v8 = vand.u32 4294901760, %v2492_v21  ;;  %15599 = vst [vmem:[#allocation11_spill] sm:$0xff] %v13593_v63  ;;  %v13607_v3 = vpack.c.bf16 %v1867_v41, %v1860_v14  ;;  %v13637_v41 = vpack.c.bf16 %v13481_v1, %v13476_v38  ;;  %v13647_v37 = vpack.c.bf16 %v13493_v26, %v13488_v24 }
 0x248   :  { %9447 = vmatprep.mubr.f32.mxu1 %v1797_v46  ;;  %v2483_v50 = vand.u32 4294901760, %v2482_v45  ;;  %v1880_v46 = vsub.f32 %v13569_v2, %v1879_v49  ;;  %v13657_v35 = vpack.c.bf16 %v13527_v52, %v13522_v55 }
 0x249   :  { %9448 = vmatmul.mubr.f32.vlgmr.msra.gmra.mrb[4].mxu1 %v1807_v31  ;;  %15600 = vst [vmem:[#allocation12_spill] sm:$0xff] %v13607_v3  ;;  %15602 = vst [vmem:[#allocation16_spill] sm:$0xff] %v13637_v41  ;;  %v13665_v31 = vpack.c.bf16 %v13569_v2, %v13564_v44  ;;  %v15623_v44 = vand.u32 4294901760, %v13424_v12  ;;  %v15624_v2 = vand.u32 4294901760, %v13426_v61  ;;  %v15350_v12 = vmov 0.0  }
 0x24a   :  { %11004 = vmatpush3.bf16.msra.mxu1 %v13411_v28  ;;  %9482 = vmatprep.mubr.f32.mxu1 %v13515_v30  ;;  %v1881_v45 = vand.u32 4294901760, %v1880_v46  ;;  %15603 = vst [vmem:[#allocation17_spill] sm:$0xff] %v13647_v37  ;;  %15604 = vst [vmem:[#allocation19_spill] sm:$0xff] %v13657_v35  ;;  %v38_v61 = vld [vmem:[%s15258_s3] sm:$0xf] }
 0x24b   :  { %9657 = vmatprep.mubr.f32.mxu0 %v2483_v50  ;;  %11006 = vmatprep.subr.bf16.mxu1 %v13575_v40  ;;  %15605 = vst [vmem:[#allocation20_spill] sm:$0xff] %v13665_v31 }
 0x24c   :  { %9658 = vmatmul.mubr.f32.vlgmr.msra.gmra.mrb[22].mxu0 %v2493_v8  ;;  %v13613_v21 = vpack.c.bf16 %v1881_v45, %v1874_v22 }
 0x24d   :  { %11196 = vmatpush3.bf16.msra.mxu0 %v13411_v28  ;;  %9692 = vmatprep.mubr.f32.mxu0 %v13539_v51 }
 0x24e   :  { %11008 = vmatpush3.bf16.msra.mxu1 %v13575_v40  ;;  %11198 = vmatprep.subr.bf16.mxu0 %v13575_v40  ;;  %15601 = vst [vmem:[#allocation13_spill] sm:$0xff] %v13613_v21 }
 0x24f   :  { %11010 = vmatprep.subr.bf16.mxu1 %v13593_v63 }
 0x251   :  { %11200 = vmatpush3.bf16.msra.mxu0 %v13575_v40 }
 0x252   :  { %11012 = vmatpush3.bf16.msra.mxu1 %v13593_v63  ;;  %11202 = vmatprep.subr.bf16.mxu0 %v13593_v63 }
 0x253   :  { %11014 = vmatprep.subr.bf16.mxu1 %v13607_v3 }
 0x255   :  { %11204 = vmatpush3.bf16.msra.mxu0 %v13593_v63  ;;  %v8036_v63 = vld [vmem:[%s15255_s1 + $0x278] sm:$0xff] }
 0x256   :  { %11016 = vmatpush3.bf16.msra.mxu1 %v13607_v3  ;;  %11206 = vmatprep.subr.bf16.mxu0 %v13607_v3  ;;  %v4182_v56 = vand.u32 4294901760, %v8036_v63 }
 0x257   :  { %11018 = vmatprep.subr.bf16.mxu1 %v13613_v21 }
 0x259   :  { %11208 = vmatpush3.bf16.msra.mxu0 %v13607_v3  ;;  %v8035_v3 = vld [vmem:[%s15255_s1 + $0x270] sm:$0xff] }
 0x25a   :  { %11020 = vmatpush3.bf16.msra.mxu1 %v13613_v21  ;;  %11210 = vmatprep.subr.bf16.mxu0 %v13613_v21  ;;  %v4179_v40 = vand.u32 4294901760, %v8035_v3 }
 0x25b   :  { %11022 = vmatprep.subr.bf16.mxu1 %v13443_v32 }
 0x25d   :  { %11212 = vmatpush3.bf16.msra.mxu0 %v13613_v21 }
 0x25e   :  { %11024 = vmatpush3.bf16.msra.mxu1 %v13443_v32  ;;  %11214 = vmatprep.subr.bf16.mxu0 %v13443_v32 }
 0x25f   :  { %11026 = vmatprep.subr.bf16.mxu1 %v13447_v0 }
 0x261   :  { %11216 = vmatpush3.bf16.msra.mxu0 %v13443_v32 }
 0x262   :  { %11028 = vmatpush3.bf16.msra.mxu1 %v13447_v0  ;;  %11218 = vmatprep.subr.bf16.mxu0 %v13447_v0 }
 0x263   :  { %11030 = vmatprep.subr.bf16.mxu1 %v13455_v18 }
 0x265   :  { %11220 = vmatpush3.bf16.msra.mxu0 %v13447_v0 }
 0x266   :  { %11032 = vmatpush3.bf16.msra.mxu1 %v13455_v18  ;;  %11222 = vmatprep.subr.bf16.mxu0 %v13455_v18 }
 0x267   :  { %11034 = vmatprep.subr.bf16.mxu1 %v13459_v29 }
 0x269   :  { %11224 = vmatpush3.bf16.msra.mxu0 %v13455_v18  ;;  %9483 = vmatmul.mubr.f32.vlgmr.msra.gmra.mrb[4].mxu1 %v13508_v59 }
 0x26a   :  { %11036 = vmatpush3.bf16.msra.mxu1 %v13459_v29  ;;  %9517 = vmatprep.mubr.f32.mxu1 %v13537_v53  ;;  %v15609_v53 = vand.u32 4294901760, %v13481_v1  ;;  %v15615_v1 = vand.u32 4294901760, %v13543_v7 }
 0x26b   :  { %11226 = vmatprep.subr.bf16.mxu0 %v13459_v29  ;;  %11038 = vmatprep.subr.bf16.mxu1 %v13637_v41 }
 0x26c   :  { %9693 = vmatmul.mubr.f32.vlgmr.msra.gmra.mrb[22].mxu0 %v13533_v6 }
 0x26d   :  { %11228 = vmatpush3.bf16.msra.mxu0 %v13459_v29  ;;  %9727 = vmatprep.mubr.f32.mxu0 %v13553_v17  ;;  %v15606_v17 = vand.u32 4294901760, %v13385_v5  ;;  %v15612_v5 = vand.u32 4294901760, %v13488_v24  ;;  %v15617_v24 = vand.u32 4294901760, %v13527_v52  ;;  %v15621_v52 = vand.u32 4294901760, %v13417_v34  ;;  %v8018_v29 = vld [vmem:[%s15255_s1 + $0x1e8] sm:$0xff] }
 0x26e   :  { %11040 = vmatpush3.bf16.msra.mxu1 %v13637_v41  ;;  %11230 = vmatprep.subr.bf16.mxu0 %v13637_v41  ;;  %v15627_v34 = vand.u32 4294901760, %v13441_v48  ;;  %v4128_v0 = vand.u32 4294901760, %v8018_v29 }
 0x26f   :  { %11042 = vmatprep.subr.bf16.mxu1 %v13647_v37 }
 0x271   :  { %11232 = vmatpush3.bf16.msra.mxu0 %v13637_v41 }
 0x272   :  { %11044 = vmatpush3.bf16.msra.mxu1 %v13647_v37  ;;  %11234 = vmatprep.subr.bf16.mxu0 %v13647_v37 }
 0x273   :  { %11046 = vmatprep.subr.bf16.mxu1 %v13657_v35 }
 0x275   :  { %11236 = vmatpush3.bf16.msra.mxu0 %v13647_v37 }
 0x276   :  { %11048 = vmatpush3.bf16.msra.mxu1 %v13657_v35  ;;  %11238 = vmatprep.subr.bf16.mxu0 %v13657_v35 }
 0x277   :  { %11050 = vmatprep.subr.bf16.mxu1 %v13665_v31 }
 0x279   :  { %11240 = vmatpush3.bf16.msra.mxu0 %v13657_v35 }
 0x27a   :  { %11052 = vmatpush3.bf16.msra.mxu1 %v13665_v31  ;;  %11242 = vmatprep.subr.bf16.mxu0 %v13665_v31 }
 0x27b   :  { %11054 = vmatprep.subr.bf16.mxu1 %v13463_v47 }
 0x27d   :  { %11244 = vmatpush3.bf16.msra.mxu0 %v13665_v31 }
 0x27e   :  { %11056 = vmatpush3.bf16.msra.mxu1 %v13463_v47  ;;  %11246 = vmatprep.subr.bf16.mxu0 %v13463_v47 }
 0x27f   :  { %11058 = vmatprep.subr.bf16.mxu1 %v13467_v11 }
 0x281   :  { %11248 = vmatpush3.bf16.msra.mxu0 %v13463_v47  ;;  %v8032_v47 = vld [vmem:[%s15255_s1 + $0x258] sm:$0xff] }
 0x282   :  { %11060 = vmatpush3.bf16.msra.mxu1 %v13467_v11  ;;  %11250 = vmatprep.subr.bf16.mxu0 %v13467_v11  ;;  %v4170_v41 = vand.u32 4294901760, %v8032_v47 }
 0x283   :  { %11062 = vmatprep.subr.bf16.mxu1 %v13471_v16 }
 0x285   :  { %11252 = vmatpush3.bf16.msra.mxu0 %v13467_v11 }
 0x286   :  { %11064 = vmatpush3.bf16.msra.mxu1 %v13471_v16  ;;  %11254 = vmatprep.subr.bf16.mxu0 %v13471_v16 }
 0x287   :  { %11066 = vmatprep.subr.bf16.mxu1 %v13204_v58 }
 0x289   :  { %11256 = vmatpush3.bf16.msra.mxu0 %v13471_v16  ;;  %9518 = vmatmul.mubr.f32.vlgmr.msra.gmra.mrb[4].mxu1 %v13531_v36  ;;  %v15616_v36 = vand.u32 4294901760, %v13522_v55  ;;  %v15620_v55 = vand.u32 4294901760, %v13415_v57  ;;  %v15626_v57 = vand.u32 4294901760, %v13439_v27  ;;  %v3116_v27 = vsel %vm3114_vm4, %v38_v61, 0 }
 0x28a   :  { %11068 = vmatpush3.bf16.msra.mxu1 %v13204_v58  ;;  %9552 = vmatprep.mubr.f32.mxu1 %v1795_v39  ;;  %v13725_v39 = vpack.c.bf16 %v15606_v17, %v1816_v60  ;;  %v15613_v60 = vand.u32 4294901760, %v13493_v26  ;;  %v13855_v48 = vand.u32 4294901760, %v3116_v27 }
 0x28b   :  { %11258 = vmatprep.subr.bf16.mxu0 %v13204_v58  ;;  %11070 = vmatprep.subr.bf16.mxu1 %v13211_v13  ;;  %v13761_v26 = vpack.c.bf16 %v15617_v24, %v15616_v36  ;;  %v13781_v50 = vpack.c.bf16 %v15621_v52, %v15620_v55 }
 0x28c   :  { %9728 = vmatmul.mubr.f32.vlgmr.msra.gmra.mrb[22].mxu0 %v13543_v7  ;;  %15607 = vst [vmem:[#allocation14_spill] sm:$0xff] %v13725_v39  ;;  %v13771_v7 = vpack.c.bf16 %v1879_v49, %v1872_v62  ;;  %v13791_v62 = vpack.c.bf16 %v15624_v2, %v15623_v44  ;;  %v13801_v49 = vpack.c.bf16 %v15627_v34, %v15626_v57  ;;  %15629 = vst [vmem:[#allocation29_spill] sm:$0xff] %v13855_v48 }
 0x28d   :  { %11260 = vmatpush3.bf16.msra.mxu0 %v13204_v58  ;;  %9762 = vmatprep.mubr.f32.mxu0 %v2481_v43  ;;  %v15608_v43 = vand.u32 4294901760, %v13476_v38  ;;  %v13748_v38 = vpack.c.bf16 %v15613_v60, %v15612_v5  ;;  %15618 = vst [vmem:[#allocation24_spill] sm:$0xff] %v13761_v26  ;;  %15622 = vst [vmem:[#allocation26_spill] sm:$0xff] %v13781_v50 }
 0x28e   :  { %11072 = vmatpush3.bf16.msra.mxu1 %v13211_v13  ;;  %11262 = vmatprep.subr.bf16.mxu0 %v13211_v13  ;;  %15619 = vst [vmem:[#allocation25_spill] sm:$0xff] %v13771_v7  ;;  %15625 = vst [vmem:[#allocation27_spill] sm:$0xff] %v13791_v62 }
 0x28f   :  { %11074 = vmatprep.subr.bf16.mxu1 %v13238_v19  ;;  %v13735_v25 = vpack.c.bf16 %v15609_v53, %v15608_v43  ;;  %15614 = vst [vmem:[#allocation18_spill] sm:$0xff] %v13748_v38  ;;  %15628 = vst [vmem:[#allocation28_spill] sm:$0xff] %v13801_v49 }
 0x291   :  { %11264 = vmatpush3.bf16.msra.mxu0 %v13211_v13  ;;  %15610 = vst [vmem:[#allocation15_spill] sm:$0xff] %v13735_v25 }
 0x292   :  { %11076 = vmatpush3.bf16.msra.mxu1 %v13238_v19  ;;  %11266 = vmatprep.subr.bf16.mxu0 %v13238_v19 }
 0x293   :  { %11078 = vmatprep.subr.bf16.mxu1 %v13260_v54 }
 0x295   :  { %11268 = vmatpush3.bf16.msra.mxu0 %v13238_v19 }
 0x296   :  { %11080 = vmatpush3.bf16.msra.mxu1 %v13260_v54  ;;  %11270 = vmatprep.subr.bf16.mxu0 %v13260_v54 }
 0x297   :  { %11082 = vmatprep.subr.bf16.mxu1 %v13272_v42 }
 0x299   :  { %11272 = vmatpush3.bf16.msra.mxu0 %v13260_v54 }
 0x29a   :  { %11084 = vmatpush3.bf16.msra.mxu1 %v13272_v42  ;;  %11274 = vmatprep.subr.bf16.mxu0 %v13272_v42 }
 0x29b   :  { %11086 = vmatprep.subr.bf16.mxu1 %v13363_v10 }
 0x29d   :  { %11276 = vmatpush3.bf16.msra.mxu0 %v13272_v42 }
 0x29e   :  { %11088 = vmatpush3.bf16.msra.mxu1 %v13363_v10  ;;  %11278 = vmatprep.subr.bf16.mxu0 %v13363_v10 }
 0x29f   :  { %11090 = vmatprep.subr.bf16.mxu1 %v13375_v4 }
 0x2a1   :  { %11280 = vmatpush3.bf16.msra.mxu0 %v13363_v10 }
 0x2a2   :  { %11092 = vmatpush3.bf16.msra.mxu1 %v13375_v4  ;;  %11282 = vmatprep.subr.bf16.mxu0 %v13375_v4 }
 0x2a3   :  { %11094 = vmatprep.subr.bf16.mxu1 %v13399_v33 }
 0x2a5   :  { %11284 = vmatpush3.bf16.msra.mxu0 %v13375_v4 }
 0x2a6   :  { %11096 = vmatpush3.bf16.msra.mxu1 %v13399_v33  ;;  %11286 = vmatprep.subr.bf16.mxu0 %v13399_v33 }
 0x2a7   :  { %11098 = vmatprep.subr.bf16.mxu1 %v13725_v39 }
 0x2a9   :  { %11288 = vmatpush3.bf16.msra.mxu0 %v13399_v33  ;;  %9553 = vmatmul.mubr.f32.vlgmr.msra.gmra.mrb[4].mxu1 %v15611_v23 }
 0x2aa   :  { %11100 = vmatpush3.bf16.msra.mxu1 %v13725_v39  ;;  %9587 = vmatprep.mubr.f32.mxu1 %v13515_v30 }
 0x2ab   :  { %11290 = vmatprep.subr.bf16.mxu0 %v13725_v39  ;;  %11102 = vmatprep.subr.bf16.mxu1 %v13735_v25 }
 0x2ac   :  { %9763 = vmatmul.mubr.f32.vlgmr.msra.gmra.mrb[22].mxu0 %v15615_v1 }
 0x2ad   :  { %11292 = vmatpush3.bf16.msra.mxu0 %v13725_v39  ;;  %9797 = vmatprep.mubr.f32.mxu0 %v13539_v51 }
 0x2ae   :  { %11104 = vmatpush3.bf16.msra.mxu1 %v13735_v25  ;;  %11294 = vmatprep.subr.bf16.mxu0 %v13735_v25 }
 0x2af   :  { %11106 = vmatprep.subr.bf16.mxu1 %v13748_v38 }
 0x2b1   :  { %11296 = vmatpush3.bf16.msra.mxu0 %v13735_v25 }
 0x2b2   :  { %11108 = vmatpush3.bf16.msra.mxu1 %v13748_v38  ;;  %11298 = vmatprep.subr.bf16.mxu0 %v13748_v38 }
 0x2b3   :  { %11110 = vmatprep.subr.bf16.mxu1 %v13761_v26 }
 0x2b5   :  { %11300 = vmatpush3.bf16.msra.mxu0 %v13748_v38 }
 0x2b6   :  { %11112 = vmatpush3.bf16.msra.mxu1 %v13761_v26  ;;  %11302 = vmatprep.subr.bf16.mxu0 %v13761_v26 }
 0x2b7   :  { %11114 = vmatprep.subr.bf16.mxu1 %v13771_v7 }
 0x2b9   :  { %11304 = vmatpush3.bf16.msra.mxu0 %v13761_v26  ;;  %v8013_v26 = vld [vmem:[%s15255_s1 + $0x1c0] sm:$0xff] }
 0x2ba   :  { %11116 = vmatpush3.bf16.msra.mxu1 %v13771_v7  ;;  %11306 = vmatprep.subr.bf16.mxu0 %v13771_v7 }
 0x2bb   :  { %11118 = vmatprep.subr.bf16.mxu1 %v13781_v50 }
 0x2bd   :  { %11308 = vmatpush3.bf16.msra.mxu0 %v13771_v7  ;;  %v8030_v7 = vld [vmem:[%s15255_s1 + $0x248] sm:$0xff] }
 0x2be   :  { %11120 = vmatpush3.bf16.msra.mxu1 %v13781_v50  ;;  %11310 = vmatprep.subr.bf16.mxu0 %v13781_v50 }
 0x2bf   :  { %11122 = vmatprep.subr.bf16.mxu1 %v13791_v62 }
 0x2c1   :  { %11312 = vmatpush3.bf16.msra.mxu0 %v13781_v50  ;;  %v8029_v50 = vld [vmem:[%s15255_s1 + $0x240] sm:$0xff] }
 0x2c2   :  { %11124 = vmatpush3.bf16.msra.mxu1 %v13791_v62  ;;  %11314 = vmatprep.subr.bf16.mxu0 %v13791_v62 }
 0x2c3   :  { %11126 = vmatprep.subr.bf16.mxu1 %v13801_v49 }
 0x2c5   :  { %11316 = vmatpush3.bf16.msra.mxu0 %v13791_v62 }
 0x2c6   :  { %11128 = vmatpush3.bf16.msra.mxu1 %v13801_v49  ;;  %11318 = vmatprep.subr.bf16.mxu0 %v13801_v49 }
 0x2c7   :  { %11130 = vmatprep.subr.bf16.mxu1 %v13204_v58 }
 0x2c9   :  { %11320 = vmatpush3.bf16.msra.mxu0 %v13801_v49  ;;  %9588 = vmatmul.mubr.f32.vlgmr.msra.gmra.mrb[4].mxu1 %v13508_v59 }
 0x2ca   :  { %11132 = vmatpush3.bf16.msra.mxu1 %v13204_v58  ;;  %9622 = vmatprep.mubr.f32.mxu1 %v13515_v30 }
 0x2cb   :  { %11322 = vmatprep.subr.bf16.mxu0 %v13204_v58  ;;  %11134 = vmatprep.subr.bf16.mxu1 %v13211_v13 }
 0x2cc   :  { %9798 = vmatmul.mubr.f32.vlgmr.msra.gmra.mrb[22].mxu0 %v13533_v6 }
 0x2cd   :  { %11324 = vmatpush3.bf16.msra.mxu0 %v13204_v58  ;;  %9832 = vmatprep.mubr.f32.mxu0 %v13539_v51 }
 0x2ce   :  { %11136 = vmatpush3.bf16.msra.mxu1 %v13211_v13  ;;  %11326 = vmatprep.subr.bf16.mxu0 %v13211_v13 }
 0x2cf   :  { %11138 = vmatprep.subr.bf16.mxu1 %v13238_v19 }
 0x2d1   :  { %11328 = vmatpush3.bf16.msra.mxu0 %v13211_v13 }
 0x2d2   :  { %11140 = vmatpush3.bf16.msra.mxu1 %v13238_v19  ;;  %11330 = vmatprep.subr.bf16.mxu0 %v13238_v19 }
 0x2d3   :  { %11142 = vmatprep.subr.bf16.mxu1 %v13260_v54 }
 0x2d5   :  { %11332 = vmatpush3.bf16.msra.mxu0 %v13238_v19 }
 0x2d6   :  { %11144 = vmatpush3.bf16.msra.mxu1 %v13260_v54  ;;  %11334 = vmatprep.subr.bf16.mxu0 %v13260_v54 }
 0x2d7   :  { %11146 = vmatprep.subr.bf16.mxu1 %v13272_v42 }
 0x2d9   :  { %11336 = vmatpush3.bf16.msra.mxu0 %v13260_v54 }
 0x2da   :  { %11148 = vmatpush3.bf16.msra.mxu1 %v13272_v42  ;;  %11338 = vmatprep.subr.bf16.mxu0 %v13272_v42 }
 0x2db   :  { %11150 = vmatprep.subr.bf16.mxu1 %v13363_v10 }
 0x2dd   :  { %11340 = vmatpush3.bf16.msra.mxu0 %v13272_v42 }
 0x2de   :  { %11152 = vmatpush3.bf16.msra.mxu1 %v13363_v10  ;;  %11342 = vmatprep.subr.bf16.mxu0 %v13363_v10 }
 0x2df   :  { %11154 = vmatprep.subr.bf16.mxu1 %v13375_v4 }
 0x2e1   :  { %11344 = vmatpush3.bf16.msra.mxu0 %v13363_v10 }
 0x2e2   :  { %11156 = vmatpush3.bf16.msra.mxu1 %v13375_v4  ;;  %11346 = vmatprep.subr.bf16.mxu0 %v13375_v4 }
 0x2e3   :  { %11158 = vmatprep.subr.bf16.mxu1 %v13399_v33 }
 0x2e5   :  { %11348 = vmatpush3.bf16.msra.mxu0 %v13375_v4 }
 0x2e6   :  { %11160 = vmatpush3.bf16.msra.mxu1 %v13399_v33  ;;  %11350 = vmatprep.subr.bf16.mxu0 %v13399_v33 }
 0x2e7   :  { %9835 = vmatprep.subr.mxu1 %v15350_v12 }
 0x2e9   :  { %11352 = vmatpush3.bf16.msra.mxu0 %v13399_v33  ;;  %9623 = vmatmul.mubr.f32.vlgmr.msra.gmra.mrb[4].mxu1 %v13508_v59 }
 0x2ea   :  { %9837 = vmatprep.mubr.msk.f32.mxu1 %vm12234_vm5, %v15350_v12  ;;  %9836 = vmatpush3.msra.mxu1 %v13855_v48 }
 0x2eb   :  { %9840 = vmatprep.subr.mxu1 %v15350_v12 }
 0x2ec   :  { %9833 = vmatmul.mubr.f32.vlgmr.msra.gmra.mrb[22].mxu0 %v13533_v6 }
 0x3bc   :  { %v9624_v59 = vpop.f32.mrb[4].mxu1 }
 0x3bd   :  { %v3084_v30 = vsel %vm3082_vm6, %v9624_v59, 0.0  ;;  %v2386_v6 = vpop.f32.mrb[5].mxu1 }
 0x3be   :  { %v3083_v51 = vsel %vm3082_vm6, %v2386_v6, 0.0  ;;  %v94_v6 = vld [vmem:[%s15259_s4] sm:$0x1] }
 0x3bf   :  { %v3085_v8 = vadd.f32 %v3084_v30, %v3083_v51  ;;  %v9834_v14 = vpop.f32.mrb[22].mxu0  ;;  %v13867_v51 = vsub.f32 %v3116_v27, %v13855_v48  ;;  %v95_v27 = vld [vmem:[%s15259_s4 + $0x1] sm:$0x1] }
 0x3c0   :  { %v3095_v46 = vsel %vm3082_vm6, %v9834_v14, 0.0  ;;  %v3072_v22 = vpop.f32.mrb[23].mxu0 }
 0x3c1   :  { %v3086_v45 = vrot.slane %v3085_v8, 4  ;;  %v3094_v17 = vsel %vm3082_vm6, %v3072_v22, 0.0  ;;  %15630 = vst [vmem:[#allocation30_spill] sm:$0xff] %v13867_v51  ;;  %v13871_v22 = vand.u32 4294901760, %v13867_v51 }
 0x3c2   :  { %v3096_v43 = vadd.f32 %v3095_v46, %v3094_v17 }
 0x3c3   :  { %v3087_v53 = vadd.f32 %v3086_v45, %v3085_v8  ;;  %15631 = vst [vmem:[#allocation31_spill] sm:$0xff] %v13871_v22 }
 0x3c4   :  { %v3097_v23 = vrot.slane %v3096_v43, 4 }
 0x3c5   :  { %v3088_v5 = vrot.slane %v3087_v53, 2 }
 0x3c6   :  { %v3098_v60 = vadd.f32 %v3097_v23, %v3096_v43 }
 0x3c7   :  { %v3089_v1 = vadd.f32 %v3088_v5, %v3087_v53  ;;  %v3198_v53 = vsub.f32 %v13867_v51, %v13871_v22 }
 0x3c8   :  { %v3099_v36 = vrot.slane %v3098_v60, 2 }
 0x3c9   :  { %v3090_v24 = vrot.slane %v3089_v1, 1 }
 0x3ca   :  { %v3100_v55 = vadd.f32 %v3099_v36, %v3098_v60  ;;  %v13875_v60 = vand.u32 4294901760, %v3198_v53 }
 0x3cb   :  { %v3091_v52 = vadd.f32 %v3090_v24, %v3089_v1 }
 0x3cc   :  { %v3101_v44 = vrot.slane %v3100_v55, 1  ;;  %15632 = vst [vmem:[#allocation32_spill] sm:$0xff] %v13875_v60 }
 0x3cd   :  { %v3093_v2 = vmul.f32 0.001953125, %v3091_v52 }
 0x3ce   :  { %v3102_v57 = vadd.f32 %v3101_v44, %v3100_v55 }
 0x3cf   :  { %v3104_v34 = vmul.f32 %v3093_v2, %v3093_v2 }
 0x3d0   :  { %v3103_v61 = vmul.f32 0.001953125, %v3102_v57 }
 0x3d2   :  { %v3105_v59 = vsub.f32 %v3103_v61, %v3104_v34  ;;  %v13927_v34 = vld [vmem:[%s15255_s1 + $0x200] sm:$0xff]  ;;  %v13932_v61 = vld [vmem:[%s15255_s1 + $0x208] sm:$0xff] }
 0x3d4   :  { %v3106_v30 = vadd.f32 1e-05, %v3105_v59  ;;  %v8005_v59 = vld [vmem:[%s15255_s1 + $0x180] sm:$0xff] }
 0x3d6   :  { %12227 = vrsqrt.f32 %v3106_v30  ;;  %v15353_v30 = vand.u32 4294901760, %v13927_v34 }
 0x3e0   :  { %v12228_v8 = vpop.eup %12227 }
 0x3e1   :  { %v3108_v14 = vmul.f32 %v12228_v8, %v94_v6  ;;  %v15352_v6 = vand.u32 4294901760, %v13932_v61  ;;  %v8006_v8 = vld [vmem:[%s15255_s1 + $0x188] sm:$0xff] }
 0x3e3   :  { %v3112_v46 = vsel %vm3082_vm6, %v3108_v14, 0  ;;  %v3109_v45 = vmul.f32 %v3108_v14, %v3093_v2  ;;  %v4089_v14 = vand.u32 4294901760, %v8005_v59 }
 0x3e4   :  { %v3184_v17 = vand.u32 4294901760, %v3112_v46 }
 0x3e5   :  { %v3110_v36 = vsub.f32 %v95_v27, %v3109_v45  ;;  %v8024_v45 = vld [vmem:[%s15255_s1 + $0x218] sm:$0xff]  ;;  %v13961_v27 = vpack.c.bf16 %v15352_v6, %v15353_v30 }
 0x3e6   :  { %v3185_v43 = vsub.f32 %v3112_v46, %v3184_v17  ;;  %v8023_v46 = vld [vmem:[%s15255_s1 + $0x210] sm:$0xff]  ;;  %v4146_v53 = vand.u32 4294901760, %v8024_v45 }
 0x3e7   :  { %v3565_v24 = vsel %vm3082_vm6, %v3110_v36, 0  ;;  %15633 = vst [vmem:[#allocation33_spill] sm:$0xff] %v13961_v27  ;;  %v13963_v36 = vsub.f32 %v8005_v59, %v4089_v14  ;;  %11514 = vmatprep.subr.bf16.mxu0 %v13961_v27 }
 0x3e8   :  { %v3186_v23 = vand.u32 4294901760, %v3185_v43  ;;  %v3633_v55 = vand.u32 4294901760, %v3565_v24  ;;  %v13986_v6 = vsub.f32 %v8024_v45, %v4146_v53  ;;  %v8011_v45 = vld [vmem:[%s15255_s1 + $0x1b0] sm:$0xff] }
 0x3e9   :  { %v4107_v16 = vand.u32 4294901760, %v8011_v45 }
 0x3ea   :  { %v3187_v5 = vsub.f32 %v3185_v43, %v3186_v23  ;;  %v3634_v52 = vsub.f32 %v3565_v24, %v3633_v55  ;;  %v8026_v24 = vld [vmem:[%s15255_s1 + $0x228] sm:$0xff] }
 0x3ec   :  { %v3188_v1 = vand.u32 4294901760, %v3187_v5  ;;  %v3635_v44 = vand.u32 4294901760, %v3634_v52  ;;  %v8008_v5 = vld [vmem:[%s15255_s1 + $0x198] sm:$0xff] }
 0x3ee   :  { %9838 = vmatmul.mubr.f32.vlgmr.msra.gmra.mrb[6].mxu1 %v3188_v1  ;;  %v3636_v2 = vsub.f32 %v3634_v52, %v3635_v44  ;;  %v8025_v1 = vld [vmem:[%s15255_s1 + $0x220] sm:$0xff] }
 0x3ef   :  { %9841 = vmatpush3.msra.mxu1 %v13875_v60  ;;  %9842 = vmatprep.mubr.msk.f32.mxu1 %vm12234_vm5, %v15350_v12 }
 0x3f0   :  { %9845 = vmatprep.subr.mxu1 %v15350_v12  ;;  %v3637_v57 = vand.u32 4294901760, %v3636_v2 }
 0x3f6   :  { %9843 = vmatmul.mubr.f32.vlgmr.msra.gmra.mrb[6].mxu1 %v3184_v17 }
 0x3f7   :  { %9846 = vmatpush3.msra.mxu1 %v13867_v51  ;;  %9847 = vmatprep.mubr.msk.f32.mxu1 %vm12234_vm5, %v15350_v12 }
 0x3f8   :  { %9850 = vmatprep.subr.mxu1 %v15350_v12 }
 0x3fe   :  { %9848 = vmatmul.mubr.f32.vlgmr.msra.gmra.mrb[6].mxu1 %v3185_v43  ;;  %v4143_v43 = vand.u32 4294901760, %v8023_v46 }
 0x3ff   :  { %9851 = vmatpush3.msra.mxu1 %v13855_v48  ;;  %9852 = vmatprep.mubr.msk.f32.mxu1 %vm12234_vm5, %v15350_v12 }
 0x400   :  { %9855 = vmatprep.subr.mxu1 %v15350_v12  ;;  %v13980_v59 = vsub.f32 %v8023_v46, %v4143_v43  ;;  %v4152_v46 = vand.u32 4294901760, %v8026_v24 }
 0x406   :  { %9853 = vmatmul.mubr.f32.vlgmr.msra.gmra.mrb[6].mxu1 %v3186_v23  ;;  %v8007_v23 = vld [vmem:[%s15255_s1 + $0x190] sm:$0xff] }
 0x407   :  { %9856 = vmatpush3.msra.mxu1 %v13871_v22  ;;  %9857 = vmatprep.mubr.msk.f32.mxu1 %vm12234_vm5, %v15350_v12  ;;  %v4095_v30 = vand.u32 4294901760, %v8007_v23 }
 0x408   :  { %9860 = vmatprep.subr.mxu1 %v15350_v12 }
 0x40e   :  { %9858 = vmatmul.mubr.f32.vlgmr.msra.gmra.mrb[6].mxu1 %v3184_v17 }
 0x40f   :  { %9861 = vmatpush3.msra.mxu1 %v13855_v48  ;;  %9862 = vmatprep.mubr.msk.f32.mxu1 %vm12234_vm5, %v15350_v12 }
 0x410   :  { %9865 = vmatprep.subr.mxu1 %v15350_v12 }
 0x416   :  { %9863 = vmatmul.mubr.f32.vlgmr.msra.gmra.mrb[6].mxu1 %v3184_v17  ;;  %v4092_v17 = vand.u32 4294901760, %v8006_v8 }
 0x417   :  { %9866 = vmatpush3.msra.mxu1 %v13855_v48  ;;  %9867 = vmatprep.mubr.msk.f32.mxu1 %vm12234_vm5, %v15350_v12 }
 0x418   :  { %9870 = vmatprep.subr.mxu1 %v15350_v12  ;;  %v13976_v2 = vsub.f32 %v8006_v8, %v4092_v17  ;;  %v8028_v8 = vld [vmem:[%s15255_s1 + $0x238] sm:$0xff] }
 0x419   :  { %v4158_v25 = vand.u32 4294901760, %v8028_v8 }
 0x41a   :  { %9868 = vmatmul.mubr.f32.vlgmr.msra.gmra.mrb[8].mxu1 %v3637_v57  ;;  %v13978_v57 = vpack.c.bf16 %v4146_v53, %v4143_v43  ;;  %v8012_v53 = vld [vmem:[%s15255_s1 + $0x1b8] sm:$0xff] }
 0x41b   :  { %9871 = vmatpush3.msra.mxu1 %v13875_v60  ;;  %9872 = vmatprep.mubr.msk.f32.mxu1 %vm12234_vm5, %v15350_v12  ;;  %v14039_v11 = vsub.f32 %v8028_v8, %v4158_v25 }
 0x41c   :  { %9875 = vmatprep.subr.mxu1 %v15350_v12  ;;  %15635 = vst [vmem:[#allocation35_spill] sm:$0xff] %v13978_v57 }
 0x422   :  { %9873 = vmatmul.mubr.f32.vlgmr.msra.gmra.mrb[8].mxu1 %v3633_v55 }
 0x423   :  { %9876 = vmatpush3.msra.mxu1 %v13867_v51  ;;  %9877 = vmatprep.mubr.msk.f32.mxu1 %vm12234_vm5, %v15350_v12 }
 0x424   :  { %9880 = vmatprep.subr.mxu1 %v15350_v12 }
 0x42a   :  { %9878 = vmatmul.mubr.f32.vlgmr.msra.gmra.mrb[8].mxu1 %v3634_v52  ;;  %v8010_v52 = vld [vmem:[%s15255_s1 + $0x1a8] sm:$0xff] }
 0x42b   :  { %9881 = vmatpush3.msra.mxu1 %v13855_v48  ;;  %9882 = vmatprep.mubr.msk.f32.mxu1 %vm12234_vm5, %v15350_v12  ;;  %v4104_v43 = vand.u32 4294901760, %v8010_v52 }
 0x42c   :  { %9885 = vmatprep.subr.mxu1 %v15350_v12 }
 0x432   :  { %9883 = vmatmul.mubr.f32.vlgmr.msra.gmra.mrb[8].mxu1 %v3635_v44  ;;  %v13974_v44 = vpack.c.bf16 %v4092_v17, %v4089_v14  ;;  %v4149_v14 = vand.u32 4294901760, %v8025_v1 }
 0x433   :  { %9886 = vmatpush3.msra.mxu1 %v13871_v22  ;;  %9887 = vmatprep.mubr.msk.f32.mxu1 %vm12234_vm5, %v15350_v12  ;;  %v4098_v22 = vand.u32 4294901760, %v8008_v5 }
 0x434   :  { %9890 = vmatprep.subr.mxu1 %v15350_v12  ;;  %15634 = vst [vmem:[#allocation34_spill] sm:$0xff] %v13974_v44  ;;  %11516 = vmatpush3.bf16.msra.mxu0 %v13974_v44  ;;  %v14007_v62 = vsub.f32 %v8025_v1, %v4149_v14  ;;  %v14018_v38 = vpack.c.bf16 %v4152_v46, %v4149_v14  ;;  %v4161_v14 = vand.u32 4294901760, %v8029_v50 }
 0x435   :  { %11518 = vmatprep.subr.bf16.mxu0 %v13978_v57  ;;  %v14001_v60 = vpack.c.bf16 %v4098_v22, %v4095_v30  ;;  %v14005_v49 = vsub.f32 %v8008_v5, %v4098_v22  ;;  %v8014_v5 = vld [vmem:[%s15255_s1 + $0x1c8] sm:$0xff]  ;;  %v14030_v1 = vsub.f32 %v8010_v52, %v4104_v43  ;;  %v14041_v52 = vsub.f32 %v8011_v45, %v4107_v16 }
 0x436   :  { %15637 = vst [vmem:[#allocation37_spill] sm:$0xff] %v14018_v38  ;;  %v14052_v35 = vsub.f32 %v8029_v50, %v4161_v14 }
 0x437   :  { %15636 = vst [vmem:[#allocation36_spill] sm:$0xff] %v14001_v60 }
 0x438   :  { %11520 = vmatpush3.bf16.msra.mxu0 %v14001_v60 }
 0x439   :  { %11522 = vmatprep.subr.bf16.mxu0 %v14018_v38 }
 0x43a   :  { %9888 = vmatmul.mubr.f32.vlgmr.msra.gmra.mrb[8].mxu1 %v3633_v55 }
 0x43b   :  { %9891 = vmatpush3.msra.mxu1 %v13855_v48  ;;  %9892 = vmatprep.mubr.msk.f32.mxu1 %vm12234_vm5, %v15350_v12  ;;  %v8027_v12 = vld [vmem:[%s15255_s1 + $0x230] sm:$0xff]  ;;  %v14003_v48 = vsub.f32 %v8007_v23, %v4095_v30  ;;  %v14020_v30 = vsub.f32 %v8026_v24, %v4152_v46  ;;  %v4110_v24 = vand.u32 4294901760, %v8012_v53  ;;  %v4113_v46 = vand.u32 4294901760, %v8013_v26 }
 0x43c   :  { %11354 = vmatprep.subr.bf16.mxu1 %v13961_v27  ;;  %v4155_v51 = vand.u32 4294901760, %v8027_v12 }
 0x43d   :  { %v14050_v31 = vsub.f32 %v8012_v53, %v4110_v24  ;;  %v14061_v45 = vpack.c.bf16 %v4110_v24, %v4107_v16 }
 0x43e   :  { %v14032_v39 = vsub.f32 %v8027_v12, %v4155_v51  ;;  %v4116_v12 = vand.u32 4294901760, %v8014_v5 }
 0x43f   :  { %15640 = vst [vmem:[#allocation40_spill] sm:$0xff] %v14061_v45 }
 0x440   :  { %v14058_v8 = vsub.f32 %v8014_v5, %v4116_v12  ;;  %v14073_v50 = vpack.c.bf16 %v4116_v12, %v4113_v46  ;;  %v8016_v5 = vld [vmem:[%s15255_s1 + $0x1d8] sm:$0xff] }
 0x442   :  { %9893 = vmatmul.mubr.f32.vlgmr.msra.gmra.mrb[8].mxu1 %v3633_v55  ;;  %v8009_v55 = vld [vmem:[%s15255_s1 + $0x1a0] sm:$0xff]  ;;  %15642 = vst [vmem:[#allocation42_spill] sm:$0xff] %v14073_v50 }
 0x443   :  { %11356 = vmatpush3.bf16.msra.mxu1 %v13974_v44  ;;  %v4101_v17 = vand.u32 4294901760, %v8009_v55 }
 0x444   :  { %11358 = vmatprep.subr.bf16.mxu1 %v13978_v57 }
 0x445   :  { %v14022_v22 = vpack.c.bf16 %v4104_v43, %v4101_v17  ;;  %v14024_v23 = vsub.f32 %v8009_v55, %v4101_v17  ;;  %v4164_v55 = vand.u32 4294901760, %v8030_v7  ;;  %v14037_v17 = vpack.c.bf16 %v4158_v25, %v4155_v51  ;;  %v8031_v43 = vld [vmem:[%s15255_s1 + $0x250] sm:$0xff] }
 0x446   :  { %v14056_v25 = vsub.f32 %v8013_v26, %v4113_v46  ;;  %v4167_v37 = vand.u32 4294901760, %v8031_v43  ;;  %v14070_v26 = vsub.f32 %v8032_v47, %v4170_v41  ;;  %v8015_v47 = vld [vmem:[%s15255_s1 + $0x1d0] sm:$0xff] }
 0x447   :  { %15638 = vst [vmem:[#allocation38_spill] sm:$0xff] %v14022_v22  ;;  %11360 = vmatpush3.bf16.msra.mxu1 %v14001_v60  ;;  %15639 = vst [vmem:[#allocation39_spill] sm:$0xff] %v14037_v17  ;;  %v14054_v51 = vsub.f32 %v8030_v7, %v4164_v55  ;;  %11524 = vmatpush3.bf16.msra.mxu0 %v14022_v22  ;;  %v14065_v53 = vpack.c.bf16 %v4164_v55, %v4161_v14  ;;  %v8033_v14 = vld [vmem:[%s15255_s1 + $0x260] sm:$0xff]  ;;  %v8034_v55 = vld [vmem:[%s15255_s1 + $0x268] sm:$0xff] }
 0x448   :  { %11362 = vmatprep.subr.bf16.mxu1 %v14018_v38  ;;  %11526 = vmatprep.subr.bf16.mxu0 %v14037_v17  ;;  %v14068_v7 = vsub.f32 %v8031_v43, %v4167_v37  ;;  %v14077_v16 = vpack.c.bf16 %v4170_v41, %v4167_v37  ;;  %v4119_v41 = vand.u32 4294901760, %v8015_v47  ;;  %v4122_v37 = vand.u32 4294901760, %v8016_v5  ;;  %v8017_v43 = vld [vmem:[%s15255_s1 + $0x1e0] sm:$0xff] }
 0x449   :  { %15641 = vst [vmem:[#allocation41_spill] sm:$0xff] %v14065_v53  ;;  %v4173_v46 = vand.u32 4294901760, %v8033_v14  ;;  %v4176_v12 = vand.u32 4294901760, %v8034_v55  ;;  %v4125_v18 = vand.u32 4294901760, %v8017_v43 }
 0x44a   :  { %15643 = vst [vmem:[#allocation43_spill] sm:$0xff] %v14077_v16  ;;  %v14090_v24 = vpack.c.bf16 %v4122_v37, %v4119_v41  ;;  %v14144_v57 = vsub.f32 %v8016_v5, %v4122_v37 }
 0x44b   :  { %11364 = vmatpush3.bf16.msra.mxu1 %v14022_v22  ;;  %11528 = vmatpush3.bf16.msra.mxu0 %v14061_v45  ;;  %v14106_v32 = vpack.c.bf16 %v4176_v12, %v4173_v46  ;;  %v14108_v21 = vpack.c.bf16 %v4128_v0, %v4125_v18  ;;  %v15649_v22 = vand.u32 4294901760, %v13932_v61  ;;  %v14146_v44 = vsub.f32 %v8033_v14, %v4173_v46 }
 0x44c   :  { %11366 = vmatprep.subr.bf16.mxu1 %v14037_v17  ;;  %11530 = vmatprep.subr.bf16.mxu0 %v14065_v53  ;;  %15644 = vst [vmem:[#allocation44_spill] sm:$0xff] %v14090_v24  ;;  %v15648_v17 = vand.u32 4294901760, %v13927_v34  ;;  %v14148_v27 = vsub.f32 %v8034_v55, %v4176_v12  ;;  %v15426_v14 = vand.u32 4294901760, %v13986_v6  ;;  %v15427_v46 = vand.u32 4294901760, %v14003_v48 }
 0x44d   :  { %15645 = vst [vmem:[#allocation45_spill] sm:$0xff] %v14106_v32  ;;  %15646 = vst [vmem:[#allocation46_spill] sm:$0xff] %v14108_v21  ;;  %v14136_v38 = vsub.f32 %v13932_v61, %v15649_v22  ;;  %v14153_v61 = vsub.f32 %v8018_v29, %v4128_v0  ;;  %v14155_v22 = vsub.f32 %v8035_v3, %v4179_v40  ;;  %v15425_v0 = vand.u32 4294901760, %v13976_v2 }
 0x44e   :  { %v15428_v12 = vand.u32 4294901760, %v14005_v49 }
 0x44f   :  { %11368 = vmatpush3.bf16.msra.mxu1 %v14061_v45  ;;  %11532 = vmatpush3.bf16.msra.mxu0 %v14073_v50  ;;  %15651 = vst [vmem:[#allocation49_spill] sm:$0xff] %v14155_v22  ;;  %v15430_v37 = vand.u32 4294901760, %v14136_v38 }
 0x450   :  { %11370 = vmatprep.subr.bf16.mxu1 %v14065_v53  ;;  %11534 = vmatprep.subr.bf16.mxu0 %v14077_v16 }
 0x453   :  { %11372 = vmatpush3.bf16.msra.mxu1 %v14073_v50  ;;  %11536 = vmatpush3.bf16.msra.mxu0 %v14090_v24  ;;  %v14126_v50 = vpack.c.bf16 %v4182_v56, %v4179_v40  ;;  %v4226_v40 = vsub.f32 %v13976_v2, %v15425_v0  ;;  %v15433_v0 = vand.u32 4294901760, %v14024_v23 }
 0x454   :  { %11374 = vmatprep.subr.bf16.mxu1 %v14077_v16  ;;  %11538 = vmatprep.subr.bf16.mxu0 %v14106_v32  ;;  %v8020_v16 = vld [vmem:[%s15255_s1 + $0x1f8] sm:$0xff] }
 0x455   :  { %15647 = vst [vmem:[#allocation47_spill] sm:$0xff] %v14126_v50  ;;  %v4134_v45 = vand.u32 4294901760, %v8020_v16 }
 0x457   :  { %11376 = vmatpush3.bf16.msra.mxu1 %v14090_v24  ;;  %11540 = vmatpush3.bf16.msra.mxu0 %v14108_v21  ;;  %v8019_v24 = vld [vmem:[%s15255_s1 + $0x1f0] sm:$0xff]  ;;  %v14162_v5 = vsub.f32 %v8020_v16, %v4134_v45  ;;  %v4227_v16 = vand.u32 4294901760, %v4226_v40 }
 0x458   :  { %11378 = vmatprep.subr.bf16.mxu1 %v14106_v32  ;;  %v4131_v53 = vand.u32 4294901760, %v8019_v24  ;;  %v14131_v32 = vsub.f32 %v13927_v34, %v15648_v17  ;;  %11542 = vmatprep.subr.bf16.mxu0 %v14126_v50  ;;  %v14151_v34 = vsub.f32 %v8017_v43, %v4125_v18  ;;  %v14157_v17 = vsub.f32 %v8036_v63, %v4182_v56 }
 0x459   :  { %15653 = vst [vmem:[#allocation51_spill] sm:$0xff] %v14162_v5  ;;  %v15423_v18 = vand.u32 4294901760, %v13963_v36  ;;  %v4338_v63 = vsub.f32 %v14136_v38, %v15430_v37 }
 0x45a   :  { %v14139_v60 = vpack.c.bf16 %v4134_v45, %v4131_v53 }
 0x45b   :  { %11380 = vmatpush3.bf16.msra.mxu1 %v14108_v21  ;;  %v14142_v21 = vsub.f32 %v8015_v47, %v4119_v41  ;;  %v14160_v47 = vsub.f32 %v8019_v24, %v4131_v53  ;;  %v15431_v41 = vand.u32 4294901760, %v14131_v32  ;;  %v4219_v29 = vsub.f32 %v13963_v36, %v15423_v18 }
 0x45c   :  { %15650 = vst [vmem:[#allocation48_spill] sm:$0xff] %v14139_v60  ;;  %11382 = vmatprep.subr.bf16.mxu1 %v14126_v50  ;;  %11544 = vmatpush3.bf16.msra.mxu0 %v14139_v60  ;;  %v4339_v45 = vand.u32 4294901760, %v4338_v63  ;;  %v15424_v24 = vand.u32 4294901760, %v13980_v59  ;;  %v4233_v63 = vsub.f32 %v14003_v48, %v15427_v46 }
 0x45d   :  { %15652 = vst [vmem:[#allocation50_spill] sm:$0xff] %v14160_v47  ;;  %11738 = vmatprep.subr.bf16.mxu0 %v13204_v58  ;;  %v4331_v56 = vsub.f32 %v14131_v32, %v15431_v41  ;;  %v4220_v53 = vand.u32 4294901760, %v4219_v29  ;;  %v4240_v29 = vsub.f32 %v14005_v49, %v15428_v12  ;;  %v15435_v12 = vand.u32 4294901760, %v14032_v39 }
 0x45e   :  { %v4345_v18 = vsub.f32 %v13980_v59, %v15424_v24 }
 0x45f   :  { %11384 = vmatpush3.bf16.msra.mxu1 %v14139_v60  ;;  %v4332_v3 = vand.u32 4294901760, %v4331_v56  ;;  %v14185_v43 = vpack.c.bf16 %v4227_v16, %v4220_v53  ;;  %v4352_v56 = vsub.f32 %v13986_v6, %v15426_v14  ;;  %v15432_v53 = vand.u32 4294901760, %v14020_v30 }
 0x460   :  { %v4346_v40 = vand.u32 4294901760, %v4345_v18  ;;  %v4234_v16 = vand.u32 4294901760, %v4233_v63  ;;  %v4241_v24 = vand.u32 4294901760, %v4240_v29  ;;  %v4247_v63 = vsub.f32 %v14024_v23, %v15433_v0 }
 0x461   :  { %v11385_v55 = vpack.c.bf16 %v4339_v45, %v4332_v3  ;;  %v4353_v3 = vand.u32 4294901760, %v4352_v56  ;;  %v15429_v45 = vand.u32 4294901760, %v14007_v62  ;;  %v4366_v18 = vsub.f32 %v14020_v30, %v15432_v53 }
 0x462   :  { %v14211_v56 = vpack.c.bf16 %v4241_v24, %v4234_v16  ;;  %v4248_v37 = vand.u32 4294901760, %v4247_v63  ;;  %v15439_v53 = vand.u32 4294901760, %v14041_v52  ;;  %v15440_v24 = vand.u32 4294901760, %v14050_v31 }
 0x463   :  { %11386 = vmatprep.subr.bf16.mxu1 %v11385_v55  ;;  %v15434_v55 = vand.u32 4294901760, %v14030_v1  ;;  %v14203_v14 = vpack.c.bf16 %v4353_v3, %v4346_v40  ;;  %v4359_v46 = vsub.f32 %v14007_v62, %v15429_v45  ;;  %v4367_v3 = vand.u32 4294901760, %v4366_v18 }
 0x464   :  { %v15438_v45 = vand.u32 4294901760, %v14039_v11  ;;  %v4373_v0 = vsub.f32 %v14032_v39, %v15435_v12  ;;  %v4261_v63 = vsub.f32 %v14041_v52, %v15439_v53  ;;  %v15446_v12 = vand.u32 4294901760, %v14054_v51 }
 0x465   :  { %v4254_v29 = vsub.f32 %v14030_v1, %v15434_v55  ;;  %v4360_v40 = vand.u32 4294901760, %v4359_v46  ;;  %v15441_v55 = vand.u32 4294901760, %v14052_v35 }
 0x466   :  { %v4380_v46 = vsub.f32 %v14039_v11, %v15438_v45  ;;  %v4262_v60 = vand.u32 4294901760, %v4261_v63  ;;  %v15447_v45 = vand.u32 4294901760, %v14056_v25 }
 0x467   :  { %v4255_v41 = vand.u32 4294901760, %v4254_v29  ;;  %v14223_v16 = vpack.c.bf16 %v4367_v3, %v4360_v40  ;;  %v4268_v29 = vsub.f32 %v14050_v31, %v15440_v24  ;;  %v4374_v40 = vand.u32 4294901760, %v4373_v0 }
 0x468   :  { %v4381_v3 = vand.u32 4294901760, %v4380_v46  ;;  %v4387_v53 = vsub.f32 %v14052_v35, %v15441_v55  ;;  %v4394_v0 = vsub.f32 %v14054_v51, %v15446_v12  ;;  %v4275_v63 = vsub.f32 %v14056_v25, %v15447_v45 }
 0x469   :  { %v14231_v18 = vpack.c.bf16 %v4255_v41, %v4248_v37  ;;  %v4269_v50 = vand.u32 4294901760, %v4268_v29  ;;  %v15448_v41 = vand.u32 4294901760, %v14058_v8  ;;  %v15449_v24 = vand.u32 4294901760, %v14068_v7 }
 0x46a   :  { %v14243_v37 = vpack.c.bf16 %v4381_v3, %v4374_v40  ;;  %v4388_v40 = vand.u32 4294901760, %v4387_v53  ;;  %v4395_v3 = vand.u32 4294901760, %v4394_v0  ;;  %v15452_v55 = vand.u32 4294901760, %v14070_v26 }
 0x46b   :  { %v14251_v46 = vpack.c.bf16 %v4269_v50, %v4262_v60  ;;  %v4282_v29 = vsub.f32 %v14058_v8, %v15448_v41  ;;  %v4276_v28 = vand.u32 4294901760, %v4275_v63  ;;  %v15453_v12 = vand.u32 4294901760, %v14142_v21 }
 0x46c   :  { %v15454_v60 = vand.u32 4294901760, %v14144_v57  ;;  %v14263_v50 = vpack.c.bf16 %v4395_v3, %v4388_v40  ;;  %v4401_v45 = vsub.f32 %v14068_v7, %v15449_v24  ;;  %v4408_v53 = vsub.f32 %v14070_v26, %v15452_v55 }
 0x46d   :  { %v4283_v33 = vand.u32 4294901760, %v4282_v29  ;;  %v4289_v63 = vsub.f32 %v14142_v21, %v15453_v12  ;;  %v15455_v41 = vand.u32 4294901760, %v14146_v44  ;;  %v15456_v24 = vand.u32 4294901760, %v14148_v27 }
 0x46e   :  { %15654 = vst [vmem:[#allocation52_spill] sm:$0xff] %v14263_v50  ;;  %v4296_v29 = vsub.f32 %v14144_v57, %v15454_v60  ;;  %v4402_v40 = vand.u32 4294901760, %v4401_v45  ;;  %v4409_v3 = vand.u32 4294901760, %v4408_v53  ;;  %v15457_v55 = vand.u32 4294901760, %v14151_v34 }
 0x46f   :  { %v14271_v0 = vpack.c.bf16 %v4283_v33, %v4276_v28  ;;  %v4290_v4 = vand.u32 4294901760, %v4289_v63  ;;  %v15458_v33 = vand.u32 4294901760, %v14153_v61  ;;  %v4415_v12 = vsub.f32 %v14146_v44, %v15455_v41 }
 0x470   :  { %v4297_v50 = vand.u32 4294901760, %v4296_v29  ;;  %v14283_v28 = vpack.c.bf16 %v4409_v3, %v4402_v40  ;;  %v4422_v45 = vsub.f32 %v14148_v27, %v15456_v24  ;;  %v4303_v63 = vsub.f32 %v14151_v34, %v15457_v55 }
 0x471   :  { %15655 = vst [vmem:[#allocation53_spill] sm:$0xff] %v14271_v0  ;;  %v4310_v29 = vsub.f32 %v14153_v61, %v15458_v33  ;;  %v4416_v40 = vand.u32 4294901760, %v4415_v12  ;;  %v15459_v60 = vand.u32 4294901760, %v14155_v22  ;;  %v15462_v41 = vand.u32 4294901760, %v14157_v17 }
 0x472   :  { %15656 = vst [vmem:[#allocation54_spill] sm:$0xff] %v14283_v28  ;;  %v14291_v53 = vpack.c.bf16 %v4297_v50, %v4290_v4  ;;  %v4423_v3 = vand.u32 4294901760, %v4422_v45  ;;  %v4304_v28 = vand.u32 4294901760, %v4303_v63  ;;  %v15460_v24 = vand.u32 4294901760, %v14160_v47 }
 0x473   :  { %v4311_v0 = vand.u32 4294901760, %v4310_v29  ;;  %v15461_v4 = vand.u32 4294901760, %v14162_v5  ;;  %v4429_v55 = vsub.f32 %v14155_v22, %v15459_v60  ;;  %v4436_v12 = vsub.f32 %v14157_v17, %v15462_v41 }
 0x474   :  { %15657 = vst [vmem:[#allocation55_spill] sm:$0xff] %v14291_v53  ;;  %v14303_v50 = vpack.c.bf16 %v4423_v3, %v4416_v40  ;;  %v4317_v63 = vsub.f32 %v14160_v47, %v15460_v24 }
 0x475   :  { %v14311_v45 = vpack.c.bf16 %v4311_v0, %v4304_v28  ;;  %v4324_v29 = vsub.f32 %v14162_v5, %v15461_v4  ;;  %v4430_v40 = vand.u32 4294901760, %v4429_v55  ;;  %v4437_v3 = vand.u32 4294901760, %v4436_v12 }
 0x476   :  { %15658 = vst [vmem:[#allocation56_spill] sm:$0xff] %v14303_v50  ;;  %v4318_v33 = vand.u32 4294901760, %v4317_v63  ;;  %v14356_v55 = vsub.s32 0, %v15566_v15 }
 0x477   :  { %v4325_v50 = vand.u32 4294901760, %v4324_v29  ;;  %v14319_v53 = vpack.c.bf16 %v4437_v3, %v4430_v40 }
 0x478   :  { %15659 = vst [vmem:[#allocation57_spill] sm:$0xff] %v14356_v55 }
 0x479   :  { %v14321_v60 = vpack.c.bf16 %v4325_v50, %v4318_v33 }
 0x4e9   :  { %v3560_v12 = vpop.f32.mrb[6].mxu1 }
 0x4ea   :  { %v9864_v29 = vpop.f32.mrb[7].mxu1  ;;  %v4016_v40 = vrot.slane %v3560_v12, %v14356_v55 }
 0x4ec   :  { %v4017_v4 = vmul.f32 %v13499_v9, %v4016_v40  ;;  %v4018_v41 = vmul.f32 %v13496_v20, %v4016_v40 }
 0x515   :  { %v4009_v3 = vpop.f32.mrb[8].mxu1 }
 0x516   :  { %v4022_v33 = vrot.slane %v4009_v3, %v14356_v55  ;;  %v9894_v24 = vpop.f32.mrb[9].mxu1 }
 0x518   :  { %v4023_v28 = vadd.f32 %v4022_v33, %v4017_v4  ;;  %v4024_v50 = vadd.f32 %v4022_v33, %v4018_v41 }
 0x51a   :  { %v4076_v0 = vrot.slane %v4023_v28, 7  ;;  %v4077_v22 = vrot.slane %v4024_v50, 7  ;;  %v4082_v63 = vrot.slane %v4023_v28, 1  ;;  %v4083_v47 = vrot.slane %v4024_v50, 1 }
 0x51b   :  { %v14362_v29 = vand.u32 4294901760, %v4023_v28  ;;  %v14364_v5 = vand.u32 4294901760, %v4024_v50 }
 0x51c   :  { %v14368_v12 = vsel %vm105_vm2, %v4083_v47, %v4082_v63  ;;  %v4079_v20 = vsel %vm98_vm1, %v4077_v22, %v4076_v0  ;;  %v4078_v9 = vsel %vm98_vm1, %v4076_v0, %v4077_v22  ;;  %v14376_v24 = vsel %vm105_vm2, %v4082_v63, %v4083_v47 }
 0x51d   :  { %4992 = vmatprep.mubr.f32.mxu0 %v14362_v29  ;;  %v4080_v41 = vsel %vm42_vm0, 0.0, %v4079_v20  ;;  %v14382_v4 = vsub.f32 %v4023_v28, %v14362_v29  ;;  %v14384_v33 = vand.u32 4294901760, %v4078_v9  ;;  %v14389_v3 = vsub.f32 %v4024_v50, %v14364_v5 }
 0x51e   :  { %v14386_v40 = vand.u32 4294901760, %v4080_v41 }
 0x51f   :  { %v15469_v22 = vand.u32 4294901760, %v14382_v4  ;;  %v14393_v47 = vsub.f32 %v4078_v9, %v14384_v33  ;;  %v15472_v15 = vand.u32 4294901760, %v14389_v3 }
 0x520   :  { %v14396_v0 = vsub.f32 %v4080_v41, %v14386_v40  ;;  %4994 = vmatmul.mubr.f32.vlgmr.msra.gmra.mrb[24].mxu0 %v14386_v40 }
 0x521   :  { %4999 = vmatprep.mubr.f32.mxu0 %v14364_v5  ;;  %v4187_v28 = vsub.f32 %v14382_v4, %v15469_v22  ;;  %11740 = vmatpush3.bf16.msra.mxu0 %v13204_v58  ;;  %v4207_v63 = vand.u32 4294901760, %v14393_v47  ;;  %v4202_v9 = vsub.f32 %v14389_v3, %v15472_v15 }
 0x522   :  { %v4192_v50 = vand.u32 4294901760, %v14396_v0  ;;  %11742 = vmatprep.subr.bf16.mxu0 %v13211_v13 }
 0x523   :  { %v4188_v20 = vand.u32 4294901760, %v4187_v28  ;;  %v4208_v55 = vsub.f32 %v14393_v47, %v4207_v63  ;;  %v4203_v28 = vand.u32 4294901760, %v4202_v9  ;;  %v15674_v9 = vpack.c.bf16 %v14039_v11, %v14032_v39 }
 0x524   :  { %5001 = vmatmul.mubr.f32.gmra.mrb[26].mxu0 %v14384_v33  ;;  %v4193_v41 = vsub.f32 %v14396_v0, %v4192_v50 }
 0x525   :  { %4189 = vmatprep.mubr.f32.mxu1 %v4188_v20  ;;  %11744 = vmatpush3.bf16.msra.mxu0 %v13211_v13  ;;  %v4209_v15 = vand.u32 4294901760, %v4208_v55  ;;  %v15666_v55 = vld [vmem:[#allocation56_spill] sm:$0xff]  ;;  %v15670_v20 = vpack.c.bf16 %v13986_v6, %v13980_v59 }
 0x526   :  { %v4194_v22 = vand.u32 4294901760, %v4193_v41  ;;  %11746 = vmatprep.subr.bf16.mxu0 %v13238_v19  ;;  %v15675_v41 = vpack.c.bf16 %v14050_v31, %v14041_v52 }
 0x528   :  { %4195 = vmatmul.mubr.f32.vlgmr.msra.gmra.mrb[10].mxu1 %v4194_v22  ;;  %v15668_v22 = vpack.c.bf16 %v14136_v38, %v14131_v32 }
 0x529   :  { %11388 = vmatpush3.bf16.msra.mxu1 %v14185_v43  ;;  %4204 = vmatprep.mubr.f32.mxu1 %v4203_v28  ;;  %v15661_v43 = vld [vmem:[#allocation23_spill] sm:$0xff]  ;;  %v15676_v28 = vpack.c.bf16 %v14054_v51, %v14052_v35 }
 0x52a   :  { %11390 = vmatprep.subr.bf16.mxu1 %v14203_v14  ;;  %11748 = vmatpush3.bf16.msra.mxu0 %v13238_v19  ;;  %v15660_v14 = vld [vmem:[#allocation52_spill] sm:$0xff] }
 0x52b   :  { %11750 = vmatprep.subr.bf16.mxu0 %v13260_v54 }
 0x52c   :  { %4210 = vmatmul.mubr.f32.gmra.mrb[12].mxu1 %v4209_v15  ;;  %v15669_v15 = vpack.c.bf16 %v13976_v2, %v13963_v36 }
 0x52d   :  { %11392 = vmatpush3.bf16.msra.mxu1 %v14211_v56  ;;  %4440 = vmatprep.mubr.f32.mxu1 %v14362_v29  ;;  %v15662_v56 = vld [vmem:[#allocation53_spill] sm:$0xff] }
 0x52e   :  { %11394 = vmatprep.subr.bf16.mxu1 %v14223_v16  ;;  %11752 = vmatpush3.bf16.msra.mxu0 %v13260_v54  ;;  %v15663_v16 = vld [vmem:[#allocation54_spill] sm:$0xff] }
 0x52f   :  { %11754 = vmatprep.subr.bf16.mxu0 %v13272_v42 }
 0x531   :  { %11396 = vmatpush3.bf16.msra.mxu1 %v14231_v18  ;;  %v15664_v18 = vld [vmem:[#allocation2_spill] sm:$0xff] }
 0x532   :  { %11398 = vmatprep.subr.bf16.mxu1 %v14243_v37  ;;  %11756 = vmatpush3.bf16.msra.mxu0 %v13272_v42  ;;  %v15665_v37 = vld [vmem:[#allocation55_spill] sm:$0xff] }
 0x533   :  { %11758 = vmatprep.subr.bf16.mxu0 %v13363_v10 }
 0x535   :  { %11400 = vmatpush3.bf16.msra.mxu1 %v14251_v46  ;;  %v15667_v46 = vld [vmem:[#allocation21_spill] sm:$0xff] }
 0x536   :  { %11402 = vmatprep.subr.bf16.mxu1 %v15660_v14  ;;  %11760 = vmatpush3.bf16.msra.mxu0 %v13363_v10  ;;  %v15677_v14 = vpack.c.bf16 %v14058_v8, %v14056_v25 }
 0x537   :  { %11762 = vmatprep.subr.bf16.mxu0 %v15661_v43 }
 0x539   :  { %11404 = vmatpush3.bf16.msra.mxu1 %v15662_v56  ;;  %v15678_v56 = vpack.c.bf16 %v14070_v26, %v14068_v7 }
 0x53a   :  { %11406 = vmatprep.subr.bf16.mxu1 %v15663_v16  ;;  %11764 = vmatpush3.bf16.msra.mxu0 %v15661_v43  ;;  %v15679_v16 = vpack.c.bf16 %v14144_v57, %v14142_v21 }
 0x53b   :  { %11766 = vmatprep.subr.bf16.mxu0 %v15664_v18 }
 0x53d   :  { %11408 = vmatpush3.bf16.msra.mxu1 %v15665_v37  ;;  %v15680_v37 = vpack.c.bf16 %v14148_v27, %v14146_v44 }
 0x53e   :  { %11410 = vmatprep.subr.bf16.mxu1 %v15666_v55  ;;  %11768 = vmatpush3.bf16.msra.mxu0 %v15664_v18  ;;  %v15681_v55 = vpack.c.bf16 %v14153_v61, %v14151_v34 }
 0x53f   :  { %11770 = vmatprep.subr.bf16.mxu0 %v15667_v46 }
 0x541   :  { %11412 = vmatpush3.bf16.msra.mxu1 %v14311_v45  ;;  %v15673_v45 = vpack.c.bf16 %v14030_v1, %v14024_v23 }
 0x542   :  { %11414 = vmatprep.subr.bf16.mxu1 %v14319_v53  ;;  %v15672_v53 = vpack.c.bf16 %v14020_v30, %v14007_v62 }
 0x545   :  { %11416 = vmatpush3.bf16.msra.mxu1 %v14321_v60  ;;  %v15671_v60 = vpack.c.bf16 %v14005_v49, %v14003_v48 }
 0x546   :  { %11418 = vmatprep.subr.bf16.mxu1 %v15668_v22  ;;  %v15682_v22 = vld [vmem:[#allocation49_spill] sm:$0xff] }
 0x548   :  { %4442 = vmatmul.mubr.f32.vlgmr.msra.gmra.mrb[14].mxu1 %v14386_v40 }
 0x549   :  { %4447 = vmatprep.mubr.f32.mxu1 %v14364_v5  ;;  %11420 = vmatpush3.bf16.msra.mxu1 %v15669_v15  ;;  %v15683_v15 = vpack.c.bf16 %v14157_v17, %v15682_v22 }
 0x54a   :  { %11422 = vmatprep.subr.bf16.mxu1 %v15670_v20  ;;  %v15684_v20 = vld [vmem:[#allocation51_spill] sm:$0xff] }
 0x54c   :  { %4449 = vmatmul.mubr.f32.gmra.mrb[16].mxu1 %v14384_v33 }
 0x54d   :  { %11424 = vmatpush3.bf16.msra.mxu1 %v15671_v60  ;;  %4584 = vmatprep.mubr.f32.mxu1 %v14382_v4  ;;  %v15685_v60 = vld [vmem:[#allocation50_spill] sm:$0xff] }
 0x54e   :  { %11426 = vmatprep.subr.bf16.mxu1 %v15672_v53  ;;  %v15686_v53 = vpack.c.bf16 %v15684_v20, %v15685_v60 }
 0x551   :  { %11428 = vmatpush3.bf16.msra.mxu1 %v15673_v45  ;;  %v15687_v45 = vld [vmem:[#allocation33_spill] sm:$0xff] }
 0x552   :  { %11430 = vmatprep.subr.bf16.mxu1 %v15674_v9  ;;  %v15688_v9 = vld [vmem:[#allocation34_spill] sm:$0xff] }
 0x555   :  { %11432 = vmatpush3.bf16.msra.mxu1 %v15675_v41  ;;  %v15689_v41 = vld [vmem:[#allocation35_spill] sm:$0xff] }
 0x556   :  { %11434 = vmatprep.subr.bf16.mxu1 %v15676_v28  ;;  %v15690_v28 = vld [vmem:[#allocation36_spill] sm:$0xff] }
 0x559   :  { %11436 = vmatpush3.bf16.msra.mxu1 %v15677_v14  ;;  %v15691_v14 = vand.u32 4294901760, %v14382_v4  ;;  %v15701_v4 = vld [vmem:[#allocation46_spill] sm:$0xff] }
 0x55a   :  { %11438 = vmatprep.subr.bf16.mxu1 %v15678_v56  ;;  %v15692_v56 = vld [vmem:[#allocation37_spill] sm:$0xff] }
 0x55d   :  { %11440 = vmatpush3.bf16.msra.mxu1 %v15679_v16  ;;  %v15693_v16 = vld [vmem:[#allocation38_spill] sm:$0xff] }
 0x55e   :  { %11442 = vmatprep.subr.bf16.mxu1 %v15680_v37  ;;  %v15694_v37 = vld [vmem:[#allocation39_spill] sm:$0xff] }
 0x561   :  { %11444 = vmatpush3.bf16.msra.mxu1 %v15681_v55  ;;  %v15695_v55 = vld [vmem:[#allocation40_spill] sm:$0xff] }
 0x562   :  { %11446 = vmatprep.subr.bf16.mxu1 %v15683_v15  ;;  %v15696_v15 = vld [vmem:[#allocation41_spill] sm:$0xff] }
 0x565   :  { %11448 = vmatpush3.bf16.msra.mxu1 %v15686_v53  ;;  %v15697_v53 = vld [vmem:[#allocation42_spill] sm:$0xff] }
 0x566   :  { %11450 = vmatprep.subr.bf16.mxu1 %v15687_v45  ;;  %v15698_v45 = vld [vmem:[#allocation43_spill] sm:$0xff] }
 0x568   :  { %4587 = vmatmul.mubr.f32.vlgmr.msra.gmra.mrb[18].mxu1 %v14396_v0  ;;  %v15718_v0 = vand.u32 4294901760, %v14039_v11  ;;  %v15725_v11 = vand.u32 4294901760, %v14068_v7  ;;  %v8038_v7 = vld [vmem:[%s15255_s1 + $0x288] sm:$0xff] }
 0x569   :  { %4593 = vmatprep.mubr.f32.mxu1 %v14389_v3  ;;  %11452 = vmatpush3.bf16.msra.mxu1 %v15688_v9  ;;  %v15699_v9 = vld [vmem:[#allocation44_spill] sm:$0xff] }
 0x56a   :  { %11454 = vmatprep.subr.bf16.mxu1 %v15689_v41  ;;  %v15700_v41 = vld [vmem:[#allocation45_spill] sm:$0xff] }
 0x56c   :  { %4596 = vmatmul.mubr.f32.gmra.mrb[20].mxu1 %v14393_v47  ;;  %v15720_v47 = vand.u32 4294901760, %v14050_v31  ;;  %v15727_v31 = vand.u32 4294901760, %v14142_v21  ;;  %v15731_v21 = vand.u32 4294901760, %v14151_v34 }
 0x56d   :  { %11456 = vmatpush3.bf16.msra.mxu1 %v15690_v28  ;;  %4700 = vmatprep.mubr.f32.mxu1 %v15691_v14  ;;  %v15702_v28 = vld [vmem:[#allocation47_spill] sm:$0xff]  ;;  %v15703_v14 = vand.u32 4294901760, %v14131_v32  ;;  %v15710_v32 = vand.u32 4294901760, %v14389_v3  ;;  %v15716_v3 = vand.u32 4294901760, %v14030_v1  ;;  %v15723_v1 = vand.u32 4294901760, %v14056_v25 }
 0x56e   :  { %11458 = vmatprep.subr.bf16.mxu1 %v15692_v56  ;;  %v15704_v56 = vand.u32 4294901760, %v14136_v38  ;;  %v15711_v38 = vand.u32 4294901760, %v14003_v48  ;;  %v15730_v25 = vand.u32 4294901760, %v14148_v27  ;;  %v15733_v27 = vand.u32 4294901760, %v15682_v22 }
 0x571   :  { %11460 = vmatpush3.bf16.msra.mxu1 %v15693_v16  ;;  %v11481_v16 = vpack.c.bf16 %v15704_v56, %v15703_v14 }
 0x572   :  { %11462 = vmatprep.subr.bf16.mxu1 %v15694_v37  ;;  %v15705_v37 = vld [vmem:[#allocation48_spill] sm:$0xff] }
 0x575   :  { %11464 = vmatpush3.bf16.msra.mxu1 %v15695_v55  ;;  %v15706_v55 = vand.u32 4294901760, %v13963_v36  ;;  %v15712_v36 = vand.u32 4294901760, %v14005_v49  ;;  %v15717_v49 = vand.u32 4294901760, %v14032_v39  ;;  %v15724_v39 = vand.u32 4294901760, %v14058_v8  ;;  %v8037_v8 = vld [vmem:[%s15255_s1 + $0x280] sm:$0xff] }
 0x576   :  { %11466 = vmatprep.subr.bf16.mxu1 %v15696_v15  ;;  %v15707_v15 = vand.u32 4294901760, %v13976_v2  ;;  %v15713_v2 = vand.u32 4294901760, %v14007_v62 }
 0x577   :  { %v11493_v62 = vpack.c.bf16 %v15718_v0, %v15717_v49  ;;  %v11499_v14 = vpack.c.bf16 %v15724_v39, %v15723_v1  ;;  %v14666_v1 = vld [vmem:[%s15255_s1 + $0x2e0] sm:$0xff]  ;;  %v14671_v39 = vld [vmem:[%s15255_s1 + $0x2e8] sm:$0xff] }
 0x579   :  { %11468 = vmatpush3.bf16.msra.mxu1 %v15697_v53  ;;  %v11483_v53 = vpack.c.bf16 %v15707_v15, %v15706_v55  ;;  %v15734_v55 = vand.u32 4294901760, %v14157_v17  ;;  %v15736_v17 = vand.u32 4294901760, %v15684_v20 }
 0x57a   :  { %11470 = vmatprep.subr.bf16.mxu1 %v15698_v45  ;;  %v15708_v45 = vand.u32 4294901760, %v13980_v59  ;;  %v15714_v59 = vand.u32 4294901760, %v14020_v30  ;;  %v15719_v30 = vand.u32 4294901760, %v14041_v52  ;;  %v15726_v52 = vand.u32 4294901760, %v14070_v26 }
 0x57b   :  { %v14587_v26 = vand.u32 4294901760, %v14376_v24  ;;  %v11509_v15 = vpack.c.bf16 %v15734_v55, %v15733_v27 }
 0x57c   :  { %v11501_v56 = vpack.c.bf16 %v15726_v52, %v15725_v11 }
 0x57d   :  { %11472 = vmatpush3.bf16.msra.mxu1 %v15699_v9  ;;  %v15709_v9 = vand.u32 4294901760, %v13986_v6  ;;  %v15715_v6 = vand.u32 4294901760, %v14024_v23  ;;  %v15722_v23 = vand.u32 4294901760, %v14054_v51  ;;  %v15729_v51 = vand.u32 4294901760, %v14146_v44 }
 0x57e   :  { %11474 = vmatprep.subr.bf16.mxu1 %v15700_v41  ;;  %v14605_v34 = vsub.f32 %v14376_v24, %v14587_v26  ;;  %v8042_v24 = vld [vmem:[%s15255_s1 + $0x2a8] sm:$0xff] }
 0x57f   :  { %v11485_v41 = vpack.c.bf16 %v15709_v9, %v15708_v45  ;;  %v11491_v48 = vpack.c.bf16 %v15716_v3, %v15715_v6  ;;  %v5010_v45 = vand.u32 4294901760, %v8038_v7  ;;  %v8039_v9 = vld [vmem:[%s15255_s1 + $0x290] sm:$0xff]  ;;  %v8044_v3 = vld [vmem:[%s15255_s1 + $0x2b8] sm:$0xff] }
 0x580   :  { %v8043_v6 = vld [vmem:[%s15255_s1 + $0x2b0] sm:$0xff]  ;;  %v5028_v0 = vand.u32 4294901760, %v8044_v3 }
 0x581   :  { %11476 = vmatpush3.bf16.msra.mxu1 %v15701_v4  ;;  %v11487_v4 = vpack.c.bf16 %v15712_v36, %v15711_v38  ;;  %v5013_v38 = vand.u32 4294901760, %v8039_v9  ;;  %v5025_v49 = vand.u32 4294901760, %v8043_v6  ;;  %v14675_v11 = vsub.f32 %v8038_v7, %v5010_v45  ;;  %v14700_v7 = vld [vmem:[%s15255_s1 + $0x2f8] sm:$0xff] }
 0x582   :  { %11478 = vmatprep.subr.bf16.mxu1 %v15702_v28  ;;  %v11489_v28 = vpack.c.bf16 %v15714_v59, %v15713_v2  ;;  %v8041_v2 = vld [vmem:[%s15255_s1 + $0x2a0] sm:$0xff]  ;;  %v5022_v59 = vand.u32 4294901760, %v8042_v24 }
 0x585   :  { %11480 = vmatpush3.bf16.msra.mxu1 %v15705_v37  ;;  %v11505_v37 = vpack.c.bf16 %v15730_v25, %v15729_v51  ;;  %v15475_v25 = vand.u32 4294901760, %v14675_v11 }
 0x586   :  { %11482 = vmatprep.subr.bf16.mxu1 %v11481_v16 }
 0x588   :  { %4704 = vmatmul.mubr.f32.vlgmr.msra.gmra.mrb[22].mxu1 %v4192_v50  ;;  %v11495_v50 = vpack.c.bf16 %v15720_v47, %v15719_v30  ;;  %v8045_v30 = vld [vmem:[%s15255_s1 + $0x2c0] sm:$0xff]  ;;  %v8046_v47 = vld [vmem:[%s15255_s1 + $0x2c8] sm:$0xff] }
 0x589   :  { %4711 = vmatprep.mubr.f32.mxu1 %v15710_v32  ;;  %11484 = vmatpush3.bf16.msra.mxu1 %v11483_v53  ;;  %v5007_v53 = vand.u32 4294901760, %v8037_v8 }
 0x58a   :  { %11486 = vmatprep.subr.bf16.mxu1 %v11485_v41  ;;  %v8040_v41 = vld [vmem:[%s15255_s1 + $0x298] sm:$0xff] }
 0x58b   :  { %v14611_v32 = vpack.c.bf16 %v5010_v45, %v5007_v53  ;;  %v5016_v36 = vand.u32 4294901760, %v8040_v41  ;;  %v5118_v45 = vsub.f32 %v14675_v11, %v15475_v25 }
 0x58c   :  { %4715 = vmatmul.mubr.f32.gmra.mrb[24].mxu1 %v4207_v63 }
 0x58d   :  { %11488 = vmatpush3.bf16.msra.mxu1 %v11487_v4  ;;  %4881 = vmatprep.mubr.f32.mxu1 %v14362_v29  ;;  %v15721_v29 = vand.u32 4294901760, %v14052_v35  ;;  %v15728_v35 = vand.u32 4294901760, %v14144_v57  ;;  %v15732_v57 = vand.u32 4294901760, %v14153_v61  ;;  %v15735_v61 = vand.u32 4294901760, %v15685_v60 }
 0x58e   :  { %11490 = vmatprep.subr.bf16.mxu1 %v11489_v28  ;;  %v5089_v4 = vand.u32 4294901760, %v14605_v34  ;;  %v14621_v20 = vpack.c.bf16 %v5016_v36, %v5013_v38  ;;  %v5019_v60 = vand.u32 4294901760, %v8041_v2 }
 0x58f   :  { %v11497_v63 = vpack.c.bf16 %v15722_v23, %v15721_v29  ;;  %v11503_v16 = vpack.c.bf16 %v15728_v35, %v15727_v31  ;;  %v11507_v44 = vpack.c.bf16 %v15732_v57, %v15731_v21  ;;  %v11511_v22 = vpack.c.bf16 %v15736_v17, %v15735_v61  ;;  %v14652_v29 = vld [vmem:[%s15255_s1 + $0x2d0] sm:$0xff]  ;;  %v14657_v23 = vld [vmem:[%s15255_s1 + $0x2d8] sm:$0xff] }
 0x590   :  { %v5090_v28 = vsub.f32 %v14605_v34, %v5089_v4  ;;  %v5043_v35 = vand.u32 4294901760, %v14666_v1  ;;  %v14702_v21 = vsub.f32 %v8039_v9, %v5013_v38  ;;  %v14704_v57 = vsub.f32 %v8040_v41, %v5016_v36 }
 0x591   :  { %11492 = vmatpush3.bf16.msra.mxu1 %v11491_v48  ;;  %v14636_v48 = vpack.c.bf16 %v5022_v59, %v5019_v60  ;;  %v14727_v61 = vsub.f32 %v8041_v2, %v5019_v60  ;;  %v14729_v17 = vsub.f32 %v8042_v24, %v5022_v59  ;;  %v14733_v38 = vsub.f32 %v8044_v3, %v5028_v0 }
 0x592   :  { %11494 = vmatprep.subr.bf16.mxu1 %v11493_v62  ;;  %v5091_v62 = vand.u32 4294901760, %v5090_v28  ;;  %v15474_v9 = vand.u32 4294901760, %v14702_v21  ;;  %v15473_v41 = vand.u32 4294901760, %v14704_v57 }
 0x593   :  { %v15478_v60 = vand.u32 4294901760, %v14727_v61  ;;  %v15477_v59 = vand.u32 4294901760, %v14729_v17  ;;  %v15479_v3 = vand.u32 4294901760, %v14733_v38 }
 0x594   :  { %v5125_v2 = vsub.f32 %v14702_v21, %v15474_v9  ;;  %v5132_v24 = vsub.f32 %v14704_v57, %v15473_v41 }
 0x595   :  { %11496 = vmatpush3.bf16.msra.mxu1 %v11495_v50  ;;  %v5034_v50 = vand.u32 4294901760, %v8046_v47  ;;  %v5139_v9 = vsub.f32 %v14727_v61, %v15478_v60  ;;  %v5146_v25 = vsub.f32 %v14729_v17, %v15477_v59 }
 0x596   :  { %11498 = vmatprep.subr.bf16.mxu1 %v11497_v63  ;;  %v4087_v63 = vsel %vm45_vm3, 0.0, %v14368_v12  ;;  %v5037_v12 = vand.u32 4294901760, %v14652_v29  ;;  %v5133_v41 = vand.u32 4294901760, %v5132_v24 }
 0x597   :  { %v14682_v31 = vand.u32 4294901760, %v4087_v63  ;;  %v5147_v59 = vand.u32 4294901760, %v5146_v25  ;;  %v14796_v25 = vsub.f32 %v14666_v1, %v5043_v35 }
 0x599   :  { %11500 = vmatpush3.bf16.msra.mxu1 %v11499_v14  ;;  %v14673_v14 = vsub.f32 %v8037_v8, %v5007_v53  ;;  %v14695_v8 = vld [vmem:[%s15255_s1 + $0x2f0] sm:$0xff]  ;;  %v14713_v27 = vsub.f32 %v4087_v63, %v14682_v31  ;;  %v5194_v1 = vand.u32 4294901760, %v14796_v25 }
 0x59a   :  { %11502 = vmatprep.subr.bf16.mxu1 %v11501_v56  ;;  %v5040_v56 = vand.u32 4294901760, %v14657_v23  ;;  %v5049_v55 = vand.u32 4294901760, %v14695_v8 }
 0x59b   :  { %v5110_v51 = vand.u32 4294901760, %v14673_v14  ;;  %v15480_v28 = vand.u32 4294901760, %v14713_v27 }
 0x59d   :  { %11504 = vmatpush3.bf16.msra.mxu1 %v11503_v16  ;;  %v5046_v16 = vand.u32 4294901760, %v14671_v39  ;;  %v5111_v53 = vsub.f32 %v14673_v14, %v5110_v51 }
 0x59e   :  { %11506 = vmatprep.subr.bf16.mxu1 %v11505_v37  ;;  %v14690_v37 = vpack.c.bf16 %v5040_v56, %v5037_v12 }
 0x5a1   :  { %11508 = vmatpush3.bf16.msra.mxu1 %v11507_v44  ;;  %v14710_v44 = vpack.c.bf16 %v5046_v16, %v5043_v35 }
 0x5a2   :  { %11510 = vmatprep.subr.bf16.mxu1 %v11509_v15  ;;  %v5052_v15 = vand.u32 4294901760, %v14700_v7 }
 0x5a4   :  { %v14740_v36 = vpack.c.bf16 %v5052_v15, %v5049_v55 }
 0x5a5   :  { %11512 = vmatpush3.bf16.msra.mxu1 %v11511_v22  ;;  %v14731_v22 = vsub.f32 %v8043_v6, %v5025_v49 }
 0x5a6   :  { %11546 = vmatprep.subr.bf16.mxu1 %v14611_v32 }
 0x5a7   :  { %v15476_v6 = vand.u32 4294901760, %v14731_v22 }
 0x5a8   :  { %4883 = vmatmul.mubr.f32.vlgmr.msra.gmra.mrb[26].mxu1 %v14386_v40  ;;  %v5031_v40 = vand.u32 4294901760, %v8045_v30 }
 0x5a9   :  { %4888 = vmatprep.mubr.f32.mxu1 %v14364_v5  ;;  %11548 = vmatpush3.bf16.msra.mxu1 %v14611_v32  ;;  %v14647_v5 = vpack.c.bf16 %v5028_v0, %v5025_v49  ;;  %v5100_v49 = vsub.f32 %v14713_v27, %v15480_v28 }
 0x5aa   :  { %11550 = vmatprep.subr.bf16.mxu1 %v14621_v20  ;;  %v14678_v52 = vpack.c.bf16 %v5034_v50, %v5031_v40  ;;  %v14758_v63 = vsub.f32 %v8045_v30, %v5031_v40  ;;  %v5160_v30 = vsub.f32 %v14733_v38, %v15479_v3 }
 0x5ac   :  { %4890 = vmatmul.mubr.f32.gmra.mrb[28].mxu1 %v14384_v33  ;;  %v5119_v33 = vand.u32 4294901760, %v5118_v45  ;;  %v5126_v45 = vand.u32 4294901760, %v5125_v2  ;;  %v5101_v2 = vand.u32 4294901760, %v5100_v49  ;;  %v5161_v3 = vand.u32 4294901760, %v5160_v30 }
 0x5ad   :  { %11552 = vmatpush3.bf16.msra.mxu1 %v14621_v20  ;;  %9927 = vmatprep.mubr.f32.mxu1 %v5091_v62  ;;  %v5112_v62 = vand.u32 4294901760, %v5111_v53  ;;  %v14760_v53 = vsub.f32 %v8046_v47, %v5034_v50  ;;  %v5166_v47 = vand.u32 4294901760, %v14758_v63  ;;  %v14779_v50 = vsub.f32 %v14652_v29, %v5037_v12 }
 0x5ae   :  { %11554 = vmatprep.subr.bf16.mxu1 %v14636_v48  ;;  %v11581_v24 = vpack.c.bf16 %v5133_v41, %v5126_v45 }
 0x5af   :  { %v11577_v0 = vpack.c.bf16 %v5119_v33, %v5112_v62  ;;  %v5153_v62 = vsub.f32 %v14731_v22, %v15476_v6  ;;  %v5173_v40 = vand.u32 4294901760, %v14760_v53  ;;  %v14782_v33 = vsub.f32 %v14657_v23, %v5040_v56 }
 0x5b0   :  { %v5140_v6 = vand.u32 4294901760, %v5139_v9  ;;  %v5167_v28 = vsub.f32 %v14758_v63, %v5166_v47  ;;  %v5180_v23 = vand.u32 4294901760, %v14779_v50  ;;  %v14801_v9 = vsub.f32 %v14671_v39, %v5046_v16 }
 0x5b1   :  { %11556 = vmatpush3.bf16.msra.mxu1 %v14636_v48  ;;  %v5154_v60 = vand.u32 4294901760, %v5153_v62  ;;  %v5174_v29 = vsub.f32 %v14760_v53, %v5173_v40  ;;  %v5187_v12 = vand.u32 4294901760, %v14782_v33  ;;  %v14814_v39 = vsub.f32 %v14695_v8, %v5049_v55 }
 0x5b2   :  { %11558 = vmatprep.subr.bf16.mxu1 %v14647_v5  ;;  %v11585_v56 = vpack.c.bf16 %v5147_v59, %v5140_v6  ;;  %v5168_v49 = vand.u32 4294901760, %v5167_v28  ;;  %v5181_v45 = vsub.f32 %v14779_v50, %v5180_v23  ;;  %v5201_v35 = vand.u32 4294901760, %v14801_v9 }
 0x5b3   :  { %v11589_v41 = vpack.c.bf16 %v5161_v3, %v5154_v60  ;;  %v5188_v59 = vsub.f32 %v14782_v33, %v5187_v12  ;;  %v14819_v16 = vsub.f32 %v14700_v7, %v5052_v15  ;;  %v5195_v3 = vsub.f32 %v14796_v25, %v5194_v1 }
 0x5b4   :  { %v5182_v60 = vand.u32 4294901760, %v5181_v45  ;;  %v5202_v62 = vsub.f32 %v14801_v9, %v5201_v35  ;;  %v5208_v8 = vand.u32 4294901760, %v14814_v39  ;;  %v11613_v45 = vpack.c.bf16 %v14704_v57, %v14702_v21 }
 0x5b5   :  { %11560 = vmatpush3.bf16.msra.mxu1 %v14647_v5  ;;  %v5189_v6 = vand.u32 4294901760, %v5188_v59  ;;  %v5215_v55 = vand.u32 4294901760, %v14819_v16  ;;  %v5196_v15 = vand.u32 4294901760, %v5195_v3  ;;  %v11617_v59 = vpack.c.bf16 %v14729_v17, %v14727_v61 }
 0x5b6   :  { %11562 = vmatprep.subr.bf16.mxu1 %v14678_v52  ;;  %v5203_v30 = vand.u32 4294901760, %v5202_v62 }
 0x5b7   :  { %v11597_v7 = vpack.c.bf16 %v5189_v6, %v5182_v60  ;;  %v11625_v60 = vpack.c.bf16 %v14760_v53, %v14758_v63  ;;  %v11701_v53 = vpack.c.bf16 %v5215_v55, %v5208_v8 }
 0x5b9   :  { %11564 = vmatpush3.bf16.msra.mxu1 %v14678_v52 }
 0x5ba   :  { %11566 = vmatprep.subr.bf16.mxu1 %v14690_v37 }
 0x5bd   :  { %11568 = vmatpush3.bf16.msra.mxu1 %v14690_v37 }
 0x5be   :  { %11570 = vmatprep.subr.bf16.mxu1 %v14710_v44 }
 0x5c1   :  { %11572 = vmatpush3.bf16.msra.mxu1 %v14710_v44 }
 0x5c2   :  { %11574 = vmatprep.subr.bf16.mxu1 %v14740_v36 }
 0x5c5   :  { %11576 = vmatpush3.bf16.msra.mxu1 %v14740_v36 }
 0x5c6   :  { %11578 = vmatprep.subr.bf16.mxu1 %v11577_v0 }
 0x5c8   :  { %9928 = vmatmul.mubr.f32.vlgmr.msra.gmra.mrb[30].mxu1 %v5101_v2  ;;  %v5209_v2 = vsub.f32 %v14814_v39, %v5208_v8 }
 0x5c9   :  { %11580 = vmatpush3.bf16.msra.mxu1 %v11577_v0  ;;  %9962 = vmatprep.mubr.f32.mxu1 %v14587_v26  ;;  %v5175_v0 = vand.u32 4294901760, %v5174_v29  ;;  %v11601_v29 = vpack.c.bf16 %v5203_v30, %v5196_v15 }
 0x5ca   :  { %11582 = vmatprep.subr.bf16.mxu1 %v11581_v24 }
 0x5cb   :  { %v11593_v28 = vpack.c.bf16 %v5175_v0, %v5168_v49  ;;  %v11609_v0 = vpack.c.bf16 %v14675_v11, %v14673_v14  ;;  %v15742_v14 = vand.u32 4294901760, %v14727_v61  ;;  %v11693_v61 = vpack.c.bf16 %v5187_v12, %v5180_v23 }
 0x5cd   :  { %11584 = vmatpush3.bf16.msra.mxu1 %v11581_v24  ;;  %v5216_v24 = vsub.f32 %v14819_v16, %v5215_v55 }
 0x5ce   :  { %11586 = vmatprep.subr.bf16.mxu1 %v11585_v56 }
 0x5cf   :  { %v5217_v49 = vand.u32 4294901760, %v5216_v24  ;;  %v11633_v24 = vpack.c.bf16 %v14801_v9, %v14796_v25 }
 0x5d1   :  { %11588 = vmatpush3.bf16.msra.mxu1 %v11585_v56  ;;  %v5210_v56 = vand.u32 4294901760, %v5209_v2 }
 0x5d2   :  { %11590 = vmatprep.subr.bf16.mxu1 %v11589_v41 }
 0x5d5   :  { %11592 = vmatpush3.bf16.msra.mxu1 %v11589_v41  ;;  %v11605_v41 = vpack.c.bf16 %v5217_v49, %v5210_v56 }
 0x5d6   :  { %11594 = vmatprep.subr.bf16.mxu1 %v11593_v28 }
 0x5d9   :  { %11596 = vmatpush3.bf16.msra.mxu1 %v11593_v28  ;;  %v11621_v28 = vpack.c.bf16 %v14733_v38, %v14731_v22 }
 0x5da   :  { %11598 = vmatprep.subr.bf16.mxu1 %v11597_v7 }
 0x5dd   :  { %11600 = vmatpush3.bf16.msra.mxu1 %v11597_v7  ;;  %v11629_v7 = vpack.c.bf16 %v14782_v33, %v14779_v50 }
 0x5de   :  { %11602 = vmatprep.subr.bf16.mxu1 %v11601_v29 }
 0x5e1   :  { %11604 = vmatpush3.bf16.msra.mxu1 %v11601_v29 }
 0x5e2   :  { %11606 = vmatprep.subr.bf16.mxu1 %v11605_v41 }
 0x5e5   :  { %11608 = vmatpush3.bf16.msra.mxu1 %v11605_v41  ;;  %v11637_v41 = vpack.c.bf16 %v14819_v16, %v14814_v39 }
 0x5e6   :  { %11610 = vmatprep.subr.bf16.mxu1 %v11609_v0 }
 0x5e8   :  { %9963 = vmatmul.mubr.f32.vlgmr.msra.gmra.mrb[30].mxu1 %v14682_v31 }
 0x5e9   :  { %11612 = vmatpush3.bf16.msra.mxu1 %v11609_v0  ;;  %9997 = vmatprep.mubr.f32.mxu1 %v14605_v34 }
 0x5ea   :  { %11614 = vmatprep.subr.bf16.mxu1 %v11613_v45 }
 0x5ed   :  { %11616 = vmatpush3.bf16.msra.mxu1 %v11613_v45 }
 0x5ee   :  { %11618 = vmatprep.subr.bf16.mxu1 %v11617_v59 }
 0x5f1   :  { %11620 = vmatpush3.bf16.msra.mxu1 %v11617_v59 }
 0x5f2   :  { %11622 = vmatprep.subr.bf16.mxu1 %v11621_v28 }
 0x5f3   :  { %v8851_v6 = vpop.f32.mrb[24].mxu0 }
 0x5f4   :  { %v8852_v3 = vpop.f32.mrb[25].mxu0 }
 0x5f5   :  { %v14847_v62 = vadd.f32 %v8852_v3, %v8851_v6  ;;  %11624 = vmatpush3.bf16.msra.mxu1 %v11621_v28 }
 0x5f6   :  { %11626 = vmatprep.subr.bf16.mxu1 %v11625_v60 }
 0x5f7   :  { %v8854_v15 = vpop.f32.mrb[26].mxu0 }
 0x5f8   :  { %v8855_v30 = vpop.f32.mrb[27].mxu0 }
 0x5f9   :  { %v14851_v2 = vadd.f32 %v8855_v30, %v8854_v15  ;;  %11628 = vmatpush3.bf16.msra.mxu1 %v11625_v60  ;;  %v15738_v15 = vand.u32 4294901760, %v14675_v11  ;;  %v15743_v11 = vand.u32 4294901760, %v14729_v17  ;;  %v11697_v17 = vpack.c.bf16 %v5201_v35, %v5194_v1 }
 0x5fa   :  { %11630 = vmatprep.subr.bf16.mxu1 %v11629_v7 }
 0x5fb   :  { %v8661_v29 = vpop.f32.mrb[10].mxu1  ;;  %v11673_v30 = vpack.c.bf16 %v15738_v15, %v5110_v51  ;;  %v11681_v51 = vpack.c.bf16 %v15743_v11, %v15742_v14 }
 0x5fc   :  { %v8662_v56 = vpop.f32.mrb[11].mxu1 }
 0x5fd   :  { %v8663_v49 = vadd.f32 %v8662_v56, %v8661_v29  ;;  %11632 = vmatpush3.bf16.msra.mxu1 %v11629_v7  ;;  %v15739_v29 = vand.u32 4294901760, %v14702_v21  ;;  %v15740_v56 = vand.u32 4294901760, %v14704_v57  ;;  %v15745_v21 = vand.u32 4294901760, %v14733_v38 }
 0x5fe   :  { %11634 = vmatprep.subr.bf16.mxu1 %v11633_v24 }
 0x5ff   :  { %v8664_v0 = vpop.f32.mrb[12].mxu1 }
 0x600   :  { %v8665_v45 = vpop.f32.mrb[13].mxu1 }
 0x601   :  { %v8666_v59 = vadd.f32 %v8665_v45, %v8664_v0  ;;  %11636 = vmatpush3.bf16.msra.mxu1 %v11633_v24  ;;  %v15744_v0 = vand.u32 4294901760, %v14731_v22 }
 0x602   :  { %11638 = vmatprep.subr.bf16.mxu1 %v11637_v41 }
 0x603   :  { %v11685_v57 = vpack.c.bf16 %v15745_v21, %v15744_v0 }
 0x605   :  { %11640 = vmatpush3.bf16.msra.mxu1 %v11637_v41  ;;  %v15741_v41 = vand.u32 4294901760, %v14713_v27 }
 0x606   :  { %11642 = vmatprep.subr.bf16.mxu1 %v14611_v32 }
 0x608   :  { %9998 = vmatmul.mubr.f32.vlgmr.msra.gmra.mrb[30].mxu1 %v14713_v27  ;;  %v11689_v27 = vpack.c.bf16 %v5173_v40, %v5166_v47 }
 0x609   :  { %11644 = vmatpush3.bf16.msra.mxu1 %v14611_v32  ;;  %10032 = vmatprep.mubr.f32.mxu1 %v5089_v4 }
 0x60a   :  { %11646 = vmatprep.subr.bf16.mxu1 %v14621_v20 }
 0x60d   :  { %11648 = vmatpush3.bf16.msra.mxu1 %v14621_v20 }
 0x60e   :  { %11650 = vmatprep.subr.bf16.mxu1 %v14636_v48 }
 0x611   :  { %11652 = vmatpush3.bf16.msra.mxu1 %v14636_v48 }
 0x612   :  { %11654 = vmatprep.subr.bf16.mxu1 %v14647_v5 }
 0x615   :  { %11656 = vmatpush3.bf16.msra.mxu1 %v14647_v5 }
 0x616   :  { %11658 = vmatprep.subr.bf16.mxu1 %v14678_v52 }
 0x619   :  { %11660 = vmatpush3.bf16.msra.mxu1 %v14678_v52 }
 0x61a   :  { %11662 = vmatprep.subr.bf16.mxu1 %v14690_v37 }
 0x61b   :  { %v8699_v34 = vpop.f32.mrb[14].mxu1 }
 0x61c   :  { %v8700_v4 = vpop.f32.mrb[15].mxu1 }
 0x61d   :  { %v8701_v28 = vadd.f32 %v8700_v4, %v8699_v34  ;;  %11664 = vmatpush3.bf16.msra.mxu1 %v14690_v37 }
 0x61e   :  { %11666 = vmatprep.subr.bf16.mxu1 %v14710_v44 }
 0x61f   :  { %v4444_v60 = vadd.f32 %v8701_v28, %v8663_v49  ;;  %v8702_v6 = vpop.f32.mrb[16].mxu1  ;;  %v11677_v49 = vpack.c.bf16 %v15740_v56, %v15739_v29 }
 0x620   :  { %v8703_v3 = vpop.f32.mrb[17].mxu1 }
 0x621   :  { %v8704_v7 = vadd.f32 %v8703_v3, %v8702_v6  ;;  %11668 = vmatpush3.bf16.msra.mxu1 %v14710_v44 }
 0x622   :  { %11670 = vmatprep.subr.bf16.mxu1 %v14740_v36 }
 0x623   :  { %v4451_v24 = vadd.f32 %v8704_v7, %v8666_v59 }
 0x625   :  { %11672 = vmatpush3.bf16.msra.mxu1 %v14740_v36 }
 0x626   :  { %11674 = vmatprep.subr.bf16.mxu1 %v11673_v30 }
 0x628   :  { %10033 = vmatmul.mubr.f32.vlgmr.msra.gmra.mrb[30].mxu1 %v15741_v41 }
 0x629   :  { %11676 = vmatpush3.bf16.msra.mxu1 %v11673_v30  ;;  %10067 = vmatprep.mubr.f32.mxu1 %v14587_v26 }
 0x62a   :  { %11678 = vmatprep.subr.bf16.mxu1 %v11677_v49 }
 0x62d   :  { %11680 = vmatpush3.bf16.msra.mxu1 %v11677_v49 }
 0x62e   :  { %11682 = vmatprep.subr.bf16.mxu1 %v11681_v51 }
 0x631   :  { %11684 = vmatpush3.bf16.msra.mxu1 %v11681_v51 }
 0x632   :  { %11686 = vmatprep.subr.bf16.mxu1 %v11685_v57 }
 0x635   :  { %11688 = vmatpush3.bf16.msra.mxu1 %v11685_v57 }
 0x636   :  { %11690 = vmatprep.subr.bf16.mxu1 %v11689_v27 }
 0x639   :  { %11692 = vmatpush3.bf16.msra.mxu1 %v11689_v27 }
 0x63a   :  { %11694 = vmatprep.subr.bf16.mxu1 %v11693_v61 }
 0x63b   :  { %v8737_v22 = vpop.f32.mrb[18].mxu1 }
 0x63c   :  { %v8738_v38 = vpop.f32.mrb[19].mxu1 }
 0x63d   :  { %v8739_v63 = vadd.f32 %v8738_v38, %v8737_v22  ;;  %11696 = vmatpush3.bf16.msra.mxu1 %v11693_v61  ;;  %v15746_v61 = vld [vmem:[#allocation10_spill] sm:$0xff]  ;;  %v15748_v22 = vld [vmem:[#allocation12_spill] sm:$0xff]  ;;  %v15750_v38 = vld [vmem:[#allocation3_spill] sm:$0xff] }
 0x63e   :  { %11698 = vmatprep.subr.bf16.mxu1 %v11697_v17 }
 0x63f   :  { %v4589_v47 = vadd.f32 %v8739_v63, %v4444_v60  ;;  %v8740_v40 = vpop.f32.mrb[20].mxu1  ;;  %v15751_v63 = vld [vmem:[#allocation4_spill] sm:$0xff] }
 0x640   :  { %v8741_v50 = vpop.f32.mrb[21].mxu1 }
 0x641   :  { %v8742_v33 = vadd.f32 %v8741_v50, %v8740_v40  ;;  %11700 = vmatpush3.bf16.msra.mxu1 %v11697_v17  ;;  %v15747_v17 = vld [vmem:[#allocation11_spill] sm:$0xff]  ;;  %v15754_v40 = vld [vmem:[#allocation16_spill] sm:$0xff]  ;;  %v15755_v50 = vld [vmem:[#allocation17_spill] sm:$0xff] }
 0x642   :  { %11702 = vmatprep.subr.bf16.mxu1 %v11701_v53 }
 0x643   :  { %v4598_v23 = vadd.f32 %v8742_v33, %v4451_v24  ;;  %v15756_v33 = vld [vmem:[#allocation19_spill] sm:$0xff] }
 0x645   :  { %11704 = vmatpush3.bf16.msra.mxu1 %v11701_v53  ;;  %v15752_v53 = vld [vmem:[#allocation5_spill] sm:$0xff] }
 0x646   :  { %11706 = vmatprep.subr.bf16.mxu1 %v14611_v32 }
 0x648   :  { %10068 = vmatmul.mubr.f32.vlgmr.msra.gmra.mrb[30].mxu1 %v14682_v31 }
 0x649   :  { %11708 = vmatpush3.bf16.msra.mxu1 %v14611_v32  ;;  %10102 = vmatprep.mubr.f32.mxu1 %v14587_v26 }
 0x64a   :  { %11710 = vmatprep.subr.bf16.mxu1 %v14621_v20 }
 0x64d   :  { %11712 = vmatpush3.bf16.msra.mxu1 %v14621_v20 }
 0x64e   :  { %11714 = vmatprep.subr.bf16.mxu1 %v14636_v48 }
 0x651   :  { %11716 = vmatpush3.bf16.msra.mxu1 %v14636_v48 }
 0x652   :  { %11718 = vmatprep.subr.bf16.mxu1 %v14647_v5 }
 0x655   :  { %11720 = vmatpush3.bf16.msra.mxu1 %v14647_v5 }
 0x656   :  { %11722 = vmatprep.subr.bf16.mxu1 %v14678_v52 }
 0x659   :  { %11724 = vmatpush3.bf16.msra.mxu1 %v14678_v52 }
 0x65a   :  { %11726 = vmatprep.subr.bf16.mxu1 %v14690_v37 }
 0x65b   :  { %v8775_v32 = vpop.f32.mrb[22].mxu1 }
 0x65c   :  { %v8776_v26 = vpop.f32.mrb[23].mxu1 }
 0x65d   :  { %v8777_v12 = vadd.f32 %v8776_v26, %v8775_v32  ;;  %11728 = vmatpush3.bf16.msra.mxu1 %v14690_v37  ;;  %v15758_v32 = vld [vmem:[#allocation7_spill] sm:$0xff]  ;;  %v15759_v26 = vld [vmem:[#allocation8_spill] sm:$0xff] }
 0x65e   :  { %11730 = vmatprep.subr.bf16.mxu1 %v14710_v44 }
 0x65f   :  { %v4706_v20 = vadd.f32 %v8777_v12, %v4589_v47  ;;  %v8778_v25 = vpop.f32.mrb[24].mxu1  ;;  %v15753_v47 = vld [vmem:[#allocation6_spill] sm:$0xff]  ;;  %v15760_v12 = vld [vmem:[#allocation9_spill] sm:$0xff] }
 0x660   :  { %v8779_v48 = vpop.f32.mrb[25].mxu1 }
 0x661   :  { %v8780_v9 = vadd.f32 %v8779_v48, %v8778_v25  ;;  %11732 = vmatpush3.bf16.msra.mxu1 %v14710_v44  ;;  %v15762_v25 = vld [vmem:[#allocation15_spill] sm:$0xff]  ;;  %v15763_v48 = vld [vmem:[#allocation18_spill] sm:$0xff] }
 0x662   :  { %11734 = vmatprep.subr.bf16.mxu1 %v14740_v36 }
 0x663   :  { %v4717_v5 = vadd.f32 %v8780_v9, %v4598_v23  ;;  %v15757_v23 = vld [vmem:[#allocation20_spill] sm:$0xff] }
 0x664   :  { %v15764_v9 = vld [vmem:[#allocation24_spill] sm:$0xff] }
 0x665   :  { %11736 = vmatpush3.bf16.msra.mxu1 %v14740_v36 }
 0x666   :  { %11930 = vmatprep.subr.bf16.mxu1 %v13204_v58 }
 0x668   :  { %10103 = vmatmul.mubr.f32.vlgmr.msra.gmra.mrb[30].mxu1 %v14682_v31 }
 0x669   :  { %11932 = vmatpush3.bf16.msra.mxu1 %v13204_v58 }
 0x66a   :  { %11934 = vmatprep.subr.bf16.mxu1 %v13211_v13 }
 0x66d   :  { %11936 = vmatpush3.bf16.msra.mxu1 %v13211_v13 }
 0x66e   :  { %11938 = vmatprep.subr.bf16.mxu1 %v13238_v19 }
 0x671   :  { %11940 = vmatpush3.bf16.msra.mxu1 %v13238_v19 }
 0x672   :  { %11942 = vmatprep.subr.bf16.mxu1 %v13260_v54 }
 0x675   :  { %11944 = vmatpush3.bf16.msra.mxu1 %v13260_v54 }
 0x676   :  { %11946 = vmatprep.subr.bf16.mxu1 %v13272_v42 }
 0x679   :  { %11948 = vmatpush3.bf16.msra.mxu1 %v13272_v42 }
 0x67a   :  { %11950 = vmatprep.subr.bf16.mxu1 %v13363_v10 }
 0x67b   :  { %v8813_v52 = vpop.f32.mrb[26].mxu1 }
 0x67c   :  { %v8814_v31 = vpop.f32.mrb[27].mxu1 }
 0x67d   :  { %v8815_v37 = vadd.f32 %v8814_v31, %v8813_v52  ;;  %11952 = vmatpush3.bf16.msra.mxu1 %v13363_v10  ;;  %v15766_v52 = vld [vmem:[#allocation26_spill] sm:$0xff]  ;;  %v15767_v31 = vld [vmem:[#allocation27_spill] sm:$0xff] }
 0x67e   :  { %11954 = vmatprep.subr.bf16.mxu1 %v15661_v43 }
 0x67f   :  { %v4885_v44 = vadd.f32 %v8815_v37, %v4706_v20  ;;  %v8816_v36 = vpop.f32.mrb[28].mxu1  ;;  %v15761_v20 = vld [vmem:[#allocation14_spill] sm:$0xff]  ;;  %v15768_v37 = vld [vmem:[#allocation28_spill] sm:$0xff] }
 0x680   :  { %v8817_v1 = vpop.f32.mrb[29].mxu1 }
 0x681   :  { %v8818_v35 = vadd.f32 %v8817_v1, %v8816_v36  ;;  %v4996_v39 = vadd.f32 %v14847_v62, %v4885_v44  ;;  %11956 = vmatpush3.bf16.msra.mxu1 %v15661_v43 }
 0x682   :  { %11958 = vmatprep.subr.bf16.mxu1 %v15664_v18 }
 0x683   :  { %v4892_v16 = vadd.f32 %v8818_v35, %v4717_v5  ;;  %v15765_v5 = vld [vmem:[#allocation25_spill] sm:$0xff] }
 0x685   :  { %v5003_v8 = vadd.f32 %v14851_v2, %v4892_v16  ;;  %11960 = vmatpush3.bf16.msra.mxu1 %v15664_v18 }
 0x686   :  { %11962 = vmatprep.subr.bf16.mxu1 %v15667_v46 }
 0x73b   :  { %v10104_v55 = vpop.f32.mrb[30].mxu1 }
 0x73c   :  { %v14949_v45 = vadd.f32 %v10104_v55, %v5003_v8  ;;  %v5680_v59 = vpop.f32.mrb[31].mxu1 }
 0x73d   :  { %v14951_v34 = vadd.f32 %v5680_v59, %v4996_v39 }
 0x73e   :  { %v14954_v4 = vand.u32 4294901760, %v14949_v45  ;;  %v6375_v62 = vmul.f32 %v14949_v45, %v14949_v45 }
 0x73f   :  { %v14959_v28 = vand.u32 4294901760, %v14951_v34  ;;  %v6374_v2 = vmul.f32 %v14951_v34, %v14951_v34 }
 0x740   :  { %v14965_v60 = vsub.f32 %v14949_v45, %v14954_v4  ;;  %v14967_v6 = vand.u32 4294901760, %v6375_v62 }
 0x741   :  { %v14971_v3 = vsub.f32 %v14951_v34, %v14959_v28  ;;  %v14973_v7 = vand.u32 4294901760, %v6374_v2 }
 0x742   :  { %v5783_v15 = vand.u32 4294901760, %v14965_v60  ;;  %v14977_v30 = vsub.f32 %v6375_v62, %v14967_v6 }
 0x743   :  { %v5773_v24 = vand.u32 4294901760, %v14971_v3  ;;  %v14981_v29 = vsub.f32 %v6374_v2, %v14973_v7 }
 0x744   :  { %v5784_v56 = vsub.f32 %v14965_v60, %v5783_v15  ;;  %v6469_v49 = vand.u32 4294901760, %v14977_v30 }
 0x745   :  { %v5774_v41 = vsub.f32 %v14971_v3, %v5773_v24  ;;  %v6459_v14 = vand.u32 4294901760, %v14981_v29 }
 0x746   :  { %v6470_v0 = vsub.f32 %v14977_v30, %v6469_v49  ;;  %v5785_v21 = vand.u32 4294901760, %v5784_v56  ;;  %v4074_v56 = vld [vmem:[%s15259_s4 + $0x2] sm:$0x1] }
 0x747   :  { %v5775_v11 = vand.u32 4294901760, %v5774_v41  ;;  %v6460_v51 = vsub.f32 %v14981_v29, %v6459_v14 }
 0x748   :  { %v6471_v27 = vand.u32 4294901760, %v6470_v0 }
 0x749   :  { %10137 = vmatprep.mubr.f32.mxu0 %v5775_v11  ;;  %v6461_v57 = vand.u32 4294901760, %v6460_v51 }
 0x74a   :  { %10138 = vmatmul.mubr.f32.vlgmr.msra.gmra.mrb[28].mxu0 %v5785_v21 }
 0x74b   :  { %11772 = vmatpush3.bf16.msra.mxu0 %v15667_v46  ;;  %10172 = vmatprep.mubr.f32.mxu0 %v14959_v28 }
 0x74c   :  { %10347 = vmatprep.mubr.f32.mxu1 %v6461_v57  ;;  %11774 = vmatprep.subr.bf16.mxu0 %v15746_v61 }
 0x74d   :  { %10348 = vmatmul.mubr.f32.vlgmr.msra.gmra.mrb[32].mxu1 %v6471_v27 }
 0x74e   :  { %11964 = vmatpush3.bf16.msra.mxu1 %v15667_v46  ;;  %10382 = vmatprep.mubr.f32.mxu1 %v14973_v7  ;;  %v15749_v46 = vld [vmem:[#allocation13_spill] sm:$0xff] }
 0x74f   :  { %11776 = vmatpush3.bf16.msra.mxu0 %v15746_v61  ;;  %11966 = vmatprep.subr.bf16.mxu1 %v15746_v61 }
 0x750   :  { %11778 = vmatprep.subr.bf16.mxu0 %v15747_v17 }
 0x752   :  { %11968 = vmatpush3.bf16.msra.mxu1 %v15746_v61  ;;  %v15771_v61 = vld [vmem:[#allocation32_spill] sm:$0xff] }
 0x753   :  { %11780 = vmatpush3.bf16.msra.mxu0 %v15747_v17  ;;  %11970 = vmatprep.subr.bf16.mxu1 %v15747_v17 }
 0x754   :  { %11782 = vmatprep.subr.bf16.mxu0 %v15748_v22 }
 0x756   :  { %11972 = vmatpush3.bf16.msra.mxu1 %v15747_v17  ;;  %v15772_v17 = vld [vmem:[#allocation30_spill] sm:$0xff] }
 0x757   :  { %11784 = vmatpush3.bf16.msra.mxu0 %v15748_v22  ;;  %11974 = vmatprep.subr.bf16.mxu1 %v15748_v22 }
 0x758   :  { %11786 = vmatprep.subr.bf16.mxu0 %v15749_v46 }
 0x75a   :  { %11976 = vmatpush3.bf16.msra.mxu1 %v15748_v22  ;;  %v4075_v22 = vld [vmem:[%s15259_s4 + $0x3] sm:$0x1] }
 0x75b   :  { %11788 = vmatpush3.bf16.msra.mxu0 %v15749_v46  ;;  %11978 = vmatprep.subr.bf16.mxu1 %v15749_v46 }
 0x75c   :  { %11790 = vmatprep.subr.bf16.mxu0 %v15750_v38 }
 0x75e   :  { %11980 = vmatpush3.bf16.msra.mxu1 %v15749_v46 }
 0x75f   :  { %11792 = vmatpush3.bf16.msra.mxu0 %v15750_v38  ;;  %11982 = vmatprep.subr.bf16.mxu1 %v15750_v38 }
 0x760   :  { %11794 = vmatprep.subr.bf16.mxu0 %v15751_v63 }
 0x762   :  { %11984 = vmatpush3.bf16.msra.mxu1 %v15750_v38 }
 0x763   :  { %11796 = vmatpush3.bf16.msra.mxu0 %v15751_v63  ;;  %11986 = vmatprep.subr.bf16.mxu1 %v15751_v63 }
 0x764   :  { %11798 = vmatprep.subr.bf16.mxu0 %v15752_v53 }
 0x766   :  { %11988 = vmatpush3.bf16.msra.mxu1 %v15751_v63  ;;  %v15773_v63 = vld [vmem:[#allocation31_spill] sm:$0xff] }
 0x767   :  { %11800 = vmatpush3.bf16.msra.mxu0 %v15752_v53  ;;  %11990 = vmatprep.subr.bf16.mxu1 %v15752_v53 }
 0x768   :  { %11802 = vmatprep.subr.bf16.mxu0 %v15753_v47 }
 0x76a   :  { %11992 = vmatpush3.bf16.msra.mxu1 %v15752_v53  ;;  %10173 = vmatmul.mubr.f32.vlgmr.msra.gmra.mrb[28].mxu0 %v14954_v4 }
 0x76b   :  { %11804 = vmatpush3.bf16.msra.mxu0 %v15753_v47  ;;  %10207 = vmatprep.mubr.f32.mxu0 %v14971_v3 }
 0x76c   :  { %11994 = vmatprep.subr.bf16.mxu1 %v15753_v47  ;;  %11806 = vmatprep.subr.bf16.mxu0 %v15754_v40 }
 0x76d   :  { %10383 = vmatmul.mubr.f32.vlgmr.msra.gmra.mrb[32].mxu1 %v14967_v6 }
 0x76e   :  { %11996 = vmatpush3.bf16.msra.mxu1 %v15753_v47  ;;  %10417 = vmatprep.mubr.f32.mxu1 %v14981_v29 }
 0x76f   :  { %11808 = vmatpush3.bf16.msra.mxu0 %v15754_v40  ;;  %11998 = vmatprep.subr.bf16.mxu1 %v15754_v40 }
 0x770   :  { %11810 = vmatprep.subr.bf16.mxu0 %v15755_v50 }
 0x772   :  { %12000 = vmatpush3.bf16.msra.mxu1 %v15754_v40 }
 0x773   :  { %11812 = vmatpush3.bf16.msra.mxu0 %v15755_v50  ;;  %12002 = vmatprep.subr.bf16.mxu1 %v15755_v50 }
 0x774   :  { %11814 = vmatprep.subr.bf16.mxu0 %v15756_v33 }
 0x776   :  { %12004 = vmatpush3.bf16.msra.mxu1 %v15755_v50 }
 0x777   :  { %11816 = vmatpush3.bf16.msra.mxu0 %v15756_v33  ;;  %12006 = vmatprep.subr.bf16.mxu1 %v15756_v33 }
 0x778   :  { %11818 = vmatprep.subr.bf16.mxu0 %v15757_v23 }
 0x77a   :  { %12008 = vmatpush3.bf16.msra.mxu1 %v15756_v33 }
 0x77b   :  { %11820 = vmatpush3.bf16.msra.mxu0 %v15757_v23  ;;  %12010 = vmatprep.subr.bf16.mxu1 %v15757_v23 }
 0x77c   :  { %11822 = vmatprep.subr.bf16.mxu0 %v15758_v32 }
 0x77e   :  { %12012 = vmatpush3.bf16.msra.mxu1 %v15757_v23 }
 0x77f   :  { %11824 = vmatpush3.bf16.msra.mxu0 %v15758_v32  ;;  %12014 = vmatprep.subr.bf16.mxu1 %v15758_v32 }
 0x780   :  { %11826 = vmatprep.subr.bf16.mxu0 %v15759_v26 }
 0x782   :  { %12016 = vmatpush3.bf16.msra.mxu1 %v15758_v32 }
 0x783   :  { %11828 = vmatpush3.bf16.msra.mxu0 %v15759_v26  ;;  %12018 = vmatprep.subr.bf16.mxu1 %v15759_v26 }
 0x784   :  { %11830 = vmatprep.subr.bf16.mxu0 %v15760_v12 }
 0x786   :  { %12020 = vmatpush3.bf16.msra.mxu1 %v15759_v26  ;;  %v15774_v26 = vld [vmem:[#allocation57_spill] sm:$0xff] }
 0x787   :  { %11832 = vmatpush3.bf16.msra.mxu0 %v15760_v12  ;;  %12022 = vmatprep.subr.bf16.mxu1 %v15760_v12 }
 0x788   :  { %11834 = vmatprep.subr.bf16.mxu0 %v13204_v58 }
 0x78a   :  { %12024 = vmatpush3.bf16.msra.mxu1 %v15760_v12  ;;  %10208 = vmatmul.mubr.f32.vlgmr.msra.gmra.mrb[28].mxu0 %v14965_v60 }
 0x78b   :  { %11836 = vmatpush3.bf16.msra.mxu0 %v13204_v58  ;;  %10242 = vmatprep.mubr.f32.mxu0 %v5773_v24 }
 0x78c   :  { %12026 = vmatprep.subr.bf16.mxu1 %v13204_v58  ;;  %11838 = vmatprep.subr.bf16.mxu0 %v13211_v13 }
 0x78d   :  { %10418 = vmatmul.mubr.f32.vlgmr.msra.gmra.mrb[32].mxu1 %v14977_v30 }
 0x78e   :  { %12028 = vmatpush3.bf16.msra.mxu1 %v13204_v58  ;;  %10452 = vmatprep.mubr.f32.mxu1 %v6459_v14 }
 0x78f   :  { %11840 = vmatpush3.bf16.msra.mxu0 %v13211_v13  ;;  %12030 = vmatprep.subr.bf16.mxu1 %v13211_v13 }
 0x790   :  { %11842 = vmatprep.subr.bf16.mxu0 %v13238_v19 }
 0x792   :  { %12032 = vmatpush3.bf16.msra.mxu1 %v13211_v13 }
 0x793   :  { %11844 = vmatpush3.bf16.msra.mxu0 %v13238_v19  ;;  %12034 = vmatprep.subr.bf16.mxu1 %v13238_v19 }
 0x794   :  { %11846 = vmatprep.subr.bf16.mxu0 %v13260_v54 }
 0x796   :  { %12036 = vmatpush3.bf16.msra.mxu1 %v13238_v19 }
 0x797   :  { %11848 = vmatpush3.bf16.msra.mxu0 %v13260_v54  ;;  %12038 = vmatprep.subr.bf16.mxu1 %v13260_v54 }
 0x798   :  { %11850 = vmatprep.subr.bf16.mxu0 %v13272_v42 }
 0x79a   :  { %12040 = vmatpush3.bf16.msra.mxu1 %v13260_v54 }
 0x79b   :  { %11852 = vmatpush3.bf16.msra.mxu0 %v13272_v42  ;;  %12042 = vmatprep.subr.bf16.mxu1 %v13272_v42 }
 0x79c   :  { %11854 = vmatprep.subr.bf16.mxu0 %v13363_v10 }
 0x79e   :  { %12044 = vmatpush3.bf16.msra.mxu1 %v13272_v42 }
 0x79f   :  { %11856 = vmatpush3.bf16.msra.mxu0 %v13363_v10  ;;  %12046 = vmatprep.subr.bf16.mxu1 %v13363_v10 }
 0x7a0   :  { %11858 = vmatprep.subr.bf16.mxu0 %v15661_v43 }
 0x7a2   :  { %12048 = vmatpush3.bf16.msra.mxu1 %v13363_v10 }
 0x7a3   :  { %11860 = vmatpush3.bf16.msra.mxu0 %v15661_v43  ;;  %12050 = vmatprep.subr.bf16.mxu1 %v15661_v43 }
 0x7a4   :  { %11862 = vmatprep.subr.bf16.mxu0 %v15664_v18 }
 0x7a6   :  { %12052 = vmatpush3.bf16.msra.mxu1 %v15661_v43 }
 0x7a7   :  { %11864 = vmatpush3.bf16.msra.mxu0 %v15664_v18  ;;  %12054 = vmatprep.subr.bf16.mxu1 %v15664_v18 }
 0x7a8   :  { %11866 = vmatprep.subr.bf16.mxu0 %v15761_v20 }
 0x7aa   :  { %12056 = vmatpush3.bf16.msra.mxu1 %v15664_v18  ;;  %10243 = vmatmul.mubr.f32.vlgmr.msra.gmra.mrb[28].mxu0 %v5783_v15 }
 0x7ab   :  { %11868 = vmatpush3.bf16.msra.mxu0 %v15761_v20  ;;  %10277 = vmatprep.mubr.f32.mxu0 %v14959_v28 }
 0x7ac   :  { %12058 = vmatprep.subr.bf16.mxu1 %v15761_v20  ;;  %11870 = vmatprep.subr.bf16.mxu0 %v15762_v25 }
 0x7ad   :  { %10453 = vmatmul.mubr.f32.vlgmr.msra.gmra.mrb[32].mxu1 %v6469_v49 }
 0x7ae   :  { %12060 = vmatpush3.bf16.msra.mxu1 %v15761_v20  ;;  %10487 = vmatprep.mubr.f32.mxu1 %v14973_v7 }
 0x7af   :  { %11872 = vmatpush3.bf16.msra.mxu0 %v15762_v25  ;;  %12062 = vmatprep.subr.bf16.mxu1 %v15762_v25 }
 0x7b0   :  { %11874 = vmatprep.subr.bf16.mxu0 %v15763_v48 }
 0x7b2   :  { %12064 = vmatpush3.bf16.msra.mxu1 %v15762_v25 }
 0x7b3   :  { %11876 = vmatpush3.bf16.msra.mxu0 %v15763_v48  ;;  %12066 = vmatprep.subr.bf16.mxu1 %v15763_v48 }
 0x7b4   :  { %11878 = vmatprep.subr.bf16.mxu0 %v15764_v9 }
 0x7b6   :  { %12068 = vmatpush3.bf16.msra.mxu1 %v15763_v48 }
 0x7b7   :  { %11880 = vmatpush3.bf16.msra.mxu0 %v15764_v9  ;;  %12070 = vmatprep.subr.bf16.mxu1 %v15764_v9 }
 0x7b8   :  { %11882 = vmatprep.subr.bf16.mxu0 %v15765_v5 }
 0x7ba   :  { %12072 = vmatpush3.bf16.msra.mxu1 %v15764_v9 }
 0x7bb   :  { %11884 = vmatpush3.bf16.msra.mxu0 %v15765_v5  ;;  %12074 = vmatprep.subr.bf16.mxu1 %v15765_v5 }
 0x7bc   :  { %11886 = vmatprep.subr.bf16.mxu0 %v15766_v52 }
 0x7be   :  { %12076 = vmatpush3.bf16.msra.mxu1 %v15765_v5 }
 0x7bf   :  { %11888 = vmatpush3.bf16.msra.mxu0 %v15766_v52  ;;  %12078 = vmatprep.subr.bf16.mxu1 %v15766_v52 }
 0x7c0   :  { %11890 = vmatprep.subr.bf16.mxu0 %v15767_v31 }
 0x7c2   :  { %12080 = vmatpush3.bf16.msra.mxu1 %v15766_v52 }
 0x7c3   :  { %11892 = vmatpush3.bf16.msra.mxu0 %v15767_v31  ;;  %12082 = vmatprep.subr.bf16.mxu1 %v15767_v31 }
 0x7c4   :  { %11894 = vmatprep.subr.bf16.mxu0 %v15768_v37 }
 0x7c6   :  { %12084 = vmatpush3.bf16.msra.mxu1 %v15767_v31 }
 0x7c7   :  { %11896 = vmatpush3.bf16.msra.mxu0 %v15768_v37  ;;  %12086 = vmatprep.subr.bf16.mxu1 %v15768_v37 }
 0x7c8   :  { %11898 = vmatprep.subr.bf16.mxu0 %v13204_v58 }
 0x7ca   :  { %12088 = vmatpush3.bf16.msra.mxu1 %v15768_v37  ;;  %10278 = vmatmul.mubr.f32.vlgmr.msra.gmra.mrb[28].mxu0 %v14954_v4  ;;  %v12231_v37 = vld [vmem:[%s15256_s0] sm:$0xff] }
 0x7cb   :  { %11900 = vmatpush3.bf16.msra.mxu0 %v13204_v58  ;;  %10312 = vmatprep.mubr.f32.mxu0 %v14959_v28 }
 0x7cc   :  { %12090 = vmatprep.subr.bf16.mxu1 %v13204_v58  ;;  %11902 = vmatprep.subr.bf16.mxu0 %v13211_v13 }
 0x7cd   :  { %10488 = vmatmul.mubr.f32.vlgmr.msra.gmra.mrb[32].mxu1 %v14967_v6 }
 0x7ce   :  { %12092 = vmatpush3.bf16.msra.mxu1 %v13204_v58  ;;  %10522 = vmatprep.mubr.f32.mxu1 %v14973_v7  ;;  %v15770_v58 = vld [vmem:[#allocation29_spill] sm:$0xff] }
 0x7cf   :  { %11904 = vmatpush3.bf16.msra.mxu0 %v13211_v13  ;;  %12094 = vmatprep.subr.bf16.mxu1 %v13211_v13 }
 0x7d0   :  { %11906 = vmatprep.subr.bf16.mxu0 %v13238_v19 }
 0x7d2   :  { %12096 = vmatpush3.bf16.msra.mxu1 %v13211_v13 }
 0x7d3   :  { %11908 = vmatpush3.bf16.msra.mxu0 %v13238_v19  ;;  %12098 = vmatprep.subr.bf16.mxu1 %v13238_v19 }
 0x7d4   :  { %11910 = vmatprep.subr.bf16.mxu0 %v13260_v54 }
 0x7d6   :  { %12100 = vmatpush3.bf16.msra.mxu1 %v13238_v19 }
 0x7d7   :  { %11912 = vmatpush3.bf16.msra.mxu0 %v13260_v54  ;;  %12102 = vmatprep.subr.bf16.mxu1 %v13260_v54 }
 0x7d8   :  { %11914 = vmatprep.subr.bf16.mxu0 %v13272_v42 }
 0x7da   :  { %12104 = vmatpush3.bf16.msra.mxu1 %v13260_v54 }
 0x7db   :  { %11916 = vmatpush3.bf16.msra.mxu0 %v13272_v42  ;;  %12106 = vmatprep.subr.bf16.mxu1 %v13272_v42 }
 0x7dc   :  { %11918 = vmatprep.subr.bf16.mxu0 %v13363_v10 }
 0x7de   :  { %12108 = vmatpush3.bf16.msra.mxu1 %v13272_v42  ;;  %v15769_v42 = vmov 0.0  }
 0x7df   :  { %11920 = vmatpush3.bf16.msra.mxu0 %v13363_v10  ;;  %12110 = vmatprep.subr.bf16.mxu1 %v13363_v10 }
 0x7e0   :  { %11922 = vmatprep.subr.bf16.mxu0 %v15661_v43 }
 0x7e2   :  { %12112 = vmatpush3.bf16.msra.mxu1 %v13363_v10 }
 0x7e3   :  { %11924 = vmatpush3.bf16.msra.mxu0 %v15661_v43  ;;  %12114 = vmatprep.subr.bf16.mxu1 %v15661_v43 }
 0x7e4   :  { %11926 = vmatprep.subr.bf16.mxu0 %v15664_v18 }
 0x7e6   :  { %12116 = vmatpush3.bf16.msra.mxu1 %v15661_v43 }
 0x7e7   :  { %11928 = vmatpush3.bf16.msra.mxu0 %v15664_v18  ;;  %12118 = vmatprep.subr.bf16.mxu1 %v15664_v18 }
 0x7e8   :  { %10525 = vmatprep.subr.mxu0 %v15769_v42 }
 0x7ea   :  { %12120 = vmatpush3.bf16.msra.mxu1 %v15664_v18  ;;  %10313 = vmatmul.mubr.f32.vlgmr.msra.gmra.mrb[28].mxu0 %v14954_v4 }
 0x7eb   :  { %10526 = vmatpush3.msra.mxu0 %v15770_v58  ;;  %10527 = vmatprep.mubr.msk.f32.mxu0 %vm12234_vm5, %v15769_v42 }
 0x7ec   :  { %10530 = vmatprep.subr.mxu0 %v15769_v42 }
 0x7ed   :  { %10523 = vmatmul.mubr.f32.vlgmr.msra.gmra.mrb[32].mxu1 %v14967_v6 }
 0x8bd   :  { %v10314_v13 = vpop.f32.mrb[28].mxu0 }
 0x8be   :  { %v7061_v19 = vsel %vm3082_vm6, %v10314_v13, 0.0  ;;  %v6364_v54 = vpop.f32.mrb[29].mxu0 }
 0x8bf   :  { %v7060_v10 = vsel %vm3082_vm6, %v6364_v54, 0.0 }
 0x8c0   :  { %v7062_v43 = vadd.f32 %v7061_v19, %v7060_v10  ;;  %v10524_v44 = vpop.f32.mrb[32].mxu1 }
 0x8c1   :  { %v7071_v18 = vsel %vm3082_vm6, %v10524_v44, 0.0  ;;  %v7050_v36 = vpop.f32.mrb[33].mxu1 }
 0x8c2   :  { %v7063_v1 = vrot.slane %v7062_v43, 4  ;;  %v7070_v35 = vsel %vm3082_vm6, %v7050_v36, 0.0 }
 0x8c3   :  { %v7072_v39 = vadd.f32 %v7071_v18, %v7070_v35 }
 0x8c4   :  { %v7064_v16 = vadd.f32 %v7063_v1, %v7062_v43 }
 0x8c5   :  { %v7073_v8 = vrot.slane %v7072_v39, 4 }
 0x8c6   :  { %v7065_v55 = vrot.slane %v7064_v16, 2 }
 0x8c7   :  { %v7074_v59 = vadd.f32 %v7073_v8, %v7072_v39 }
 0x8c8   :  { %v7066_v4 = vadd.f32 %v7065_v55, %v7064_v16 }
 0x8c9   :  { %v7075_v62 = vrot.slane %v7074_v59, 2 }
 0x8ca   :  { %v7067_v28 = vrot.slane %v7066_v4, 1 }
 0x8cb   :  { %v7076_v2 = vadd.f32 %v7075_v62, %v7074_v59 }
 0x8cc   :  { %v7068_v60 = vadd.f32 %v7067_v28, %v7066_v4 }
 0x8cd   :  { %v7077_v6 = vrot.slane %v7076_v2, 1 }
 0x8ce   :  { %v7069_v3 = vmul.f32 0.001953125, %v7068_v60 }
 0x8cf   :  { %v7078_v7 = vadd.f32 %v7077_v6, %v7076_v2 }
 0x8d0   :  { %v7080_v15 = vmul.f32 %v7069_v3, %v7069_v3 }
 0x8d1   :  { %v7079_v30 = vmul.f32 0.001953125, %v7078_v7 }
 0x8d3   :  { %v7081_v24 = vsub.f32 %v7079_v30, %v7080_v15 }
 0x8d5   :  { %v7082_v29 = vadd.f32 1e-05, %v7081_v24 }
 0x8d7   :  { %12229 = vrsqrt.f32 %v7082_v29 }
 0x8e1   :  { %v12230_v49 = vpop.eup %12229 }
 0x8e2   :  { %v7084_v41 = vmul.f32 %v12230_v49, %v4074_v56 }
 0x8e4   :  { %v7088_v14 = vsel %vm3082_vm6, %v7084_v41, 0  ;;  %v7085_v11 = vmul.f32 %v7084_v41, %v7069_v3 }
 0x8e5   :  { %v7156_v51 = vand.u32 4294901760, %v7088_v14 }
 0x8e6   :  { %v7086_v46 = vsub.f32 %v4075_v22, %v7085_v11 }
 0x8e7   :  { %v7157_v0 = vsub.f32 %v7088_v14, %v7156_v51 }
 0x8e8   :  { %v7537_v38 = vsel %vm3082_vm6, %v7086_v46, 0 }
 0x8e9   :  { %v7158_v21 = vand.u32 4294901760, %v7157_v0  ;;  %v7605_v53 = vand.u32 4294901760, %v7537_v38 }
 0x8eb   :  { %v7159_v57 = vsub.f32 %v7157_v0, %v7158_v21  ;;  %v7606_v47 = vsub.f32 %v7537_v38, %v7605_v53 }
 0x8ed   :  { %v7160_v27 = vand.u32 4294901760, %v7159_v57  ;;  %v7607_v40 = vand.u32 4294901760, %v7606_v47 }
 0x8ef   :  { %10528 = vmatmul.mubr.f32.vlgmr.msra.gmra.mrb[30].mxu0 %v7160_v27  ;;  %v7608_v50 = vsub.f32 %v7606_v47, %v7607_v40 }
 0x8f0   :  { %10531 = vmatpush3.msra.mxu0 %v15771_v61  ;;  %10532 = vmatprep.mubr.msk.f32.mxu0 %vm12234_vm5, %v15769_v42 }
 0x8f1   :  { %10535 = vmatprep.subr.mxu0 %v15769_v42  ;;  %v7609_v33 = vand.u32 4294901760, %v7608_v50 }
 0x8f7   :  { %10533 = vmatmul.mubr.f32.vlgmr.msra.gmra.mrb[30].mxu0 %v7156_v51 }
 0x8f8   :  { %10536 = vmatpush3.msra.mxu0 %v15772_v17  ;;  %10537 = vmatprep.mubr.msk.f32.mxu0 %vm12234_vm5, %v15769_v42 }
 0x8f9   :  { %10540 = vmatprep.subr.mxu0 %v15769_v42 }
 0x8ff   :  { %10538 = vmatmul.mubr.f32.vlgmr.msra.gmra.mrb[30].mxu0 %v7157_v0 }
 0x900   :  { %10541 = vmatpush3.msra.mxu0 %v15770_v58  ;;  %10542 = vmatprep.mubr.msk.f32.mxu0 %vm12234_vm5, %v15769_v42 }
 0x901   :  { %10545 = vmatprep.subr.mxu0 %v15769_v42 }
 0x907   :  { %10543 = vmatmul.mubr.f32.vlgmr.msra.gmra.mrb[30].mxu0 %v7158_v21 }
 0x908   :  { %10546 = vmatpush3.msra.mxu0 %v15773_v63  ;;  %10547 = vmatprep.mubr.msk.f32.mxu0 %vm12234_vm5, %v15769_v42 }
 0x909   :  { %10550 = vmatprep.subr.mxu0 %v15769_v42 }
 0x90f   :  { %10548 = vmatmul.mubr.f32.vlgmr.msra.gmra.mrb[30].mxu0 %v7156_v51 }
 0x910   :  { %10551 = vmatpush3.msra.mxu0 %v15770_v58  ;;  %10552 = vmatprep.mubr.msk.f32.mxu0 %vm12234_vm5, %v15769_v42 }
 0x911   :  { %10555 = vmatprep.subr.mxu0 %v15769_v42 }
 0x917   :  { %10553 = vmatmul.mubr.f32.vlgmr.msra.gmra.mrb[30].mxu0 %v7156_v51 }
 0x918   :  { %10556 = vmatpush3.msra.mxu0 %v15770_v58  ;;  %10557 = vmatprep.mubr.msk.f32.mxu0 %vm12234_vm5, %v15769_v42 }
 0x919   :  { %10560 = vmatprep.subr.mxu0 %v15769_v42 }
 0x91b   :  { %10558 = vmatmul.mubr.f32.vlgmr.msra.gmra.mrb[32].mxu0 %v7609_v33 }
 0x91c   :  { %10561 = vmatpush3.msra.mxu0 %v15771_v61  ;;  %10562 = vmatprep.mubr.msk.f32.mxu0 %vm12234_vm5, %v15769_v42 }
 0x91d   :  { %10565 = vmatprep.subr.mxu0 %v15769_v42 }
 0x923   :  { %10563 = vmatmul.mubr.f32.vlgmr.msra.gmra.mrb[32].mxu0 %v7605_v53 }
 0x924   :  { %10566 = vmatpush3.msra.mxu0 %v15772_v17  ;;  %10567 = vmatprep.mubr.msk.f32.mxu0 %vm12234_vm5, %v15769_v42 }
 0x925   :  { %10570 = vmatprep.subr.mxu0 %v15769_v42 }
 0x92b   :  { %10568 = vmatmul.mubr.f32.vlgmr.msra.gmra.mrb[32].mxu0 %v7606_v47 }
 0x92c   :  { %10571 = vmatpush3.msra.mxu0 %v15770_v58  ;;  %10572 = vmatprep.mubr.msk.f32.mxu0 %vm12234_vm5, %v15769_v42 }
 0x92d   :  { %10575 = vmatprep.subr.mxu0 %v15769_v42 }
 0x933   :  { %10573 = vmatmul.mubr.f32.vlgmr.msra.gmra.mrb[32].mxu0 %v7607_v40 }
 0x934   :  { %10576 = vmatpush3.msra.mxu0 %v15773_v63  ;;  %10577 = vmatprep.mubr.msk.f32.mxu0 %vm12234_vm5, %v15769_v42 }
 0x935   :  { %10580 = vmatprep.subr.mxu0 %v15769_v42 }
 0x93b   :  { %10578 = vmatmul.mubr.f32.vlgmr.msra.gmra.mrb[32].mxu0 %v7605_v53 }
 0x93c   :  { %10581 = vmatpush3.msra.mxu0 %v15770_v58  ;;  %10582 = vmatprep.mubr.msk.f32.mxu0 %vm12234_vm5, %v15769_v42  ;;  %v12232_v58 = vld [vmem:[%s15256_s0 + $0x8] sm:$0xff] }
 0x943   :  { %10583 = vmatmul.mubr.f32.vlgmr.msra.gmra.mrb[32].mxu0 %v7605_v53 }
 0x9ea   :  { %v7532_v23 = vpop.f32.mrb[30].mxu0 }
 0x9eb   :  { %v10554_v32 = vpop.f32.mrb[31].mxu0  ;;  %v7988_v12 = vrot.slane %v7532_v23, %v15774_v26 }
 0x9ed   :  { %v7989_v25 = vmul.f32 %v14951_v34, %v7988_v12  ;;  %v7990_v48 = vmul.f32 %v14949_v45, %v7988_v12 }
 0xa16   :  { %v7981_v20 = vpop.f32.mrb[32].mxu0 }
 0xa17   :  { %v7994_v9 = vrot.slane %v7981_v20, %v15774_v26  ;;  %v10584_v5 = vpop.f32.mrb[33].mxu0 }
 0xa19   :  { %v7995_v52 = vadd.f32 %v7994_v9, %v7989_v25  ;;  %v7996_v31 = vadd.f32 %v7994_v9, %v7990_v48 }
 0xa1b   :  { %v7997_v42 = vadd.f32 %v12231_v37, %v7995_v52  ;;  %v7998_v13 = vadd.f32 %v12232_v58, %v7996_v31 }
 0xa1d   :  { %7999 = vst [vmem:[%s15260_s5] sm:$0xff] %v7997_v42  ;;  %8000 = vst [vmem:[%s15260_s5 + $0x8] sm:$0xff] %v7998_v13 }

</bundles_post_ra>
